<compile_context>
chip_gen: v5e
topology: v5e:2x2
jax: 0.10.0
libtpu: 0.0.40
codegen_flags: <defaults>
</compile_context>

<pallas_src>
import functools

import jax
import jax.numpy as jnp
from jax import lax
from jax.experimental import pallas as pl
from jax.experimental.pallas import tpu as pltpu


def _bigate_kernel(f1_ref, f2_ref, h1_ref, h2_ref, w1_ref, w2_ref,
                   b1_ref, b2_ref, o1_ref, o2_ref, p_scr, *, precision):
    # f1_ref: (1, TH, W, C1)   f2_ref: (1, TH, W, C2)   (input dtype)
    # h1_ref: (1, 2, W, C1)    h2_ref: (1, 2, W, C2)    halo rows (top, bottom)
    # w1_ref: (C1, 16)         w2_ref: (C2, 16)         taps t = dh*3+dw in cols 0..8
    # b1_ref / b2_ref: (1, 1) f32 scalars in SMEM
    # o1_ref: (1, TH, W, C1)   o2_ref: (1, TH, W, C2)
    # p_scr:  (TH+2, 16, W+2) f32 scratch: (row, tap, col), W in lanes.
    TH = o1_ref.shape[1]
    W = o1_ref.shape[2]

    # Zero only the two border columns (conv zero padding).  Rows 0..TH+1 of
    # columns 1..W are fully overwritten by every conv_map call below.
    zcol = jnp.zeros((TH + 2, 16, 1), jnp.float32)
    p_scr[:, :, 0:1] = zcol
    p_scr[:, :, W + 1:W + 2] = zcol

    def conv_map(blk, halo, wmat, bias):
        # blk: (TH, W, C), halo: (2, W, C), wmat: (C, 16) -> (TH, W) f32 map.
        C = blk.shape[-1]
        # Per-pixel, per-tap partial products on the MXU (f32 accumulation).
        p_main = jnp.dot(blk.reshape(TH * W, C), wmat,
                         preferred_element_type=jnp.float32,
                         precision=precision).reshape(TH, W, 16)
        p_halo = jnp.dot(halo.reshape(2 * W, C), wmat,
                         preferred_element_type=jnp.float32,
                         precision=precision).reshape(2, W, 16)

        # One batched transpose per feature: taps -> sublanes, W -> lanes.
        p_main_t = jnp.transpose(p_main, (0, 2, 1))      # (TH, 16, W)
        p_halo_t = jnp.transpose(p_halo, (0, 2, 1))      # (2, 16, W)

        # Assemble the zero-padded per-tap map: rows = [top halo, tile rows,
        # bottom halo]; border columns stay zero (P is linear, so P(0) == 0;
        # the conv bias is added once below).
        p_scr[1:TH + 1, :, 1:W + 1] = p_main_t
        p_scr[0:1, :, 1:W + 1] = p_halo_t[0:1]
        p_scr[TH + 1:TH + 2, :, 1:W + 1] = p_halo_t[1:2]

        # 3x3 window = lane-dense sum of 9 shifted slices of the padded map.
        m = jnp.full((TH, W), bias, dtype=jnp.float32)
        for dh in range(3):
            for dw in range(3):
                m = m + p_scr[dh:dh + TH, dh * 3 + dw, dw:dw + W]
        return m

    f1 = f1_ref[0]                      # (TH, W, C1), input dtype (no f32 copy)
    f2 = f2_ref[0]                      # (TH, W, C2)

    map1 = conv_map(f1, h1_ref[0], w1_ref[...], b1_ref[0, 0])   # gate from feat1
    map2 = conv_map(f2, h2_ref[0], w2_ref[...], b2_ref[0, 0])   # gate from feat2

    scale1 = jax.nn.sigmoid(map1)       # (TH, W) f32, lane-dense on the EUP
    scale2 = jax.nn.sigmoid(map2)

    # Gate broadcast over channels (lane dim of the NHWC tiles).  The small
    # (TH, W) -> (TH, W, 1) relayout is ~TH*W/1024 vregs; the heavy multiply
    # stays in the input dtype (bf16 activations keep a bf16 gate multiply).
    o1_ref[0] = (f1 * scale2[:, :, None].astype(f1.dtype)).astype(o1_ref.dtype)
    o2_ref[0] = (f2 * scale1[:, :, None].astype(f2.dtype)).astype(o2_ref.dtype)


def _gather_halos(f, row_tile):
    """f: (B, H, W, C) NHWC.  Returns (B, 2*n_h, W, C): for tile h, row 2h is
    the row just above the tile and row 2h+1 the row just below (zeros at the
    image boundary).  Costs ~2/row_tile of one input pass — replaces a full
    HBM pad pass."""
    B, H, W, C = f.shape
    n_h = H // row_tile
    starts = jnp.arange(n_h) * row_tile
    top_idx = starts - 1
    bot_idx = starts + row_tile
    top = jnp.take(f, jnp.clip(top_idx, 0, H - 1), axis=1)      # (B, n_h, W, C)
    bot = jnp.take(f, jnp.clip(bot_idx, 0, H - 1), axis=1)
    zero = jnp.zeros((), f.dtype)
    top = jnp.where((top_idx >= 0)[None, :, None, None], top, zero)
    bot = jnp.where((bot_idx < H)[None, :, None, None], bot, zero)
    halo = jnp.stack([top, bot], axis=2)                        # (B, n_h, 2, W, C)
    return halo.reshape(B, 2 * n_h, W, C)


def _prep_weight(w, dtype):
    """(1, C, 3, 3) conv weight -> MXU-ready (C, 16), taps t = dh*3+dw in
    columns 0..8 (columns 9..15 are zero padding)."""
    C = w.shape[1]
    wt = jnp.transpose(w[0], (1, 2, 0)).reshape(9, C).T         # (C, 9)
    return jnp.pad(wt, ((0, 0), (0, 7))).astype(dtype)          # (C, 16)


def _vmem_capacity_bytes():
    """Best-effort physical VMEM per TensorCore; conservative default 64 MiB
    (v7x) when the query is unavailable."""
    cap = None
    try:
        info = pltpu.get_tpu_info()
        for attr in ("vmem_capacity_bytes", "vmem_bytes", "vmem_size_bytes"):
            v = getattr(info, attr, None)
            if v:
                cap = int(v)
                break
    except Exception:
        cap = None
    return cap if cap else (64 << 20)


def _working_set_bytes(th, W, C1, C2, itemsize):
    """Approximate per-step VMEM working set (double-buffered blocks + scratch
    + f32 intermediates)."""
    tile_io = 2 * th * W * (C1 + C2) * itemsize      # in + out tiles, both feats
    halos = 2 * W * (C1 + C2) * itemsize
    dbuf = 2 * (tile_io + halos)                     # pipeline double-buffering
    scratch = (th + 2) * 16 * (W + 2) * 4
    interm = 3 * th * W * 16 * 4                     # f32 P map + its transpose
    return dbuf + scratch + interm


def _pick_row_tile(B, H, W, C1, C2, itemsize, budget):
    """Largest divisor of H whose working set fits the VMEM budget, preferring
    tilings with >= 2 total grid steps (keeps both v7x TensorCores busy)."""
    divisors = sorted((d for d in range(1, H + 1) if H % d == 0), reverse=True)
    best = None
    for d in divisors:
        if _working_set_bytes(d, W, C1, C2, itemsize) > budget:
            continue
        if best is None:
            best = d
        if B * (H // d) >= 2:
            return d
    return best if best is not None else divisors[-1]


def bigate_pallas_nhwc(f1, f2, w1, b1, w2, b2, *, row_tile=None, precision=None):
    """Core (optimized) entry point.  f1: (B, H, W, C1), f2: (B, H, W, C2)
    channels-last.  w1: (1, C1, 3, 3), b1: (1,); w2: (1, C2, 3, 3), b2: (1,).
    `precision` is the MXU precision for the conv map (default: fast
    bf16-class passes; the map only feeds a sigmoid gate)."""
    B, H, W, C1 = f1.shape
    C2 = f2.shape[-1]
    assert f2.shape[:3] == (B, H, W)
    assert W % 8 == 0, "W must be a multiple of 8 (sublane tiling)"

    itemsize = jnp.dtype(f1.dtype).itemsize
    cap = _vmem_capacity_bytes()
    budget = min(int(cap * 0.72), 100 << 20)        # leave compiler headroom
    if row_tile is None:
        row_tile = _pick_row_tile(B, H, W, C1, C2, itemsize, budget)
    TH = row_tile
    assert H % TH == 0, "row_tile must divide H"
    n_h = H // TH

    ws = _working_set_bytes(TH, W, C1, C2, itemsize)
    vmem_limit = int(min(max(budget, 2 * ws, 32 << 20), max(cap - (8 << 20), 32 << 20)))

    w1m = _prep_weight(w1, f1.dtype)                # (C1, 16)
    w2m = _prep_weight(w2, f2.dtype)                # (C2, 16)
    b1s = b1.reshape(1, 1).astype(jnp.float32)
    b2s = b2.reshape(1, 1).astype(jnp.float32)

    halo1 = _gather_halos(f1, TH)                   # (B, 2*n_h, W, C1)
    halo2 = _gather_halos(f2, TH)                   # (B, 2*n_h, W, C2)

    kernel = functools.partial(_bigate_kernel, precision=precision)

    out1, out2 = pl.pallas_call(
        kernel,
        out_shape=(
            jax.ShapeDtypeStruct((B, H, W, C1), f1.dtype),
            jax.ShapeDtypeStruct((B, H, W, C2), f2.dtype),
        ),
        grid_spec=pltpu.PrefetchScalarGridSpec(
            num_scalar_prefetch=0,
            grid=(B, n_h),
            in_specs=[
                pl.BlockSpec((1, TH, W, C1), lambda b, h: (b, h, 0, 0)),
                pl.BlockSpec((1, TH, W, C2), lambda b, h: (b, h, 0, 0)),
                pl.BlockSpec((1, 2, W, C1), lambda b, h: (b, h, 0, 0)),
                pl.BlockSpec((1, 2, W, C2), lambda b, h: (b, h, 0, 0)),
                pl.BlockSpec((C1, 16), lambda b, h: (0, 0)),
                pl.BlockSpec((C2, 16), lambda b, h: (0, 0)),
                pl.BlockSpec(memory_space=pltpu.MemorySpace.SMEM),
                pl.BlockSpec(memory_space=pltpu.MemorySpace.SMEM),
            ],
            out_specs=[
                pl.BlockSpec((1, TH, W, C1), lambda b, h: (b, h, 0, 0)),
                pl.BlockSpec((1, TH, W, C2), lambda b, h: (b, h, 0, 0)),
            ],
            scratch_shapes=[pltpu.VMEM((TH + 2, 16, W + 2), jnp.float32)],
        ),
        compiler_params=pltpu.CompilerParams(
            dimension_semantics=("parallel", "parallel"),
            vmem_limit_bytes=vmem_limit),
    )(f1, f2, halo1, halo2, w1m, w2m, b1s, b2s)
    return out1, out2


def bigate_pallas(feat1, feat2, w1, b1, w2, b2, *, row_tile=None, precision=None):
    """PyTorch-parity NCHW entry point.  NOTE: the NCHW<->NHWC transposes cost
    two extra HBM passes; callers that can keep activations channels-last
    should call bigate_pallas_nhwc directly."""
    f1 = jnp.transpose(feat1, (0, 2, 3, 1))
    f2 = jnp.transpose(feat2, (0, 2, 3, 1))
    o1, o2 = bigate_pallas_nhwc(f1, f2, w1, b1, w2, b2,
                                row_tile=row_tile, precision=precision)
    return (jnp.transpose(o1, (0, 3, 1, 2)),
            jnp.transpose(o2, (0, 3, 1, 2)))


def _reference(feat1, feat2, w1, b1, w2, b2):
    """Pure-JAX reference (same math as the PyTorch module), NCHW."""
    dn = lax.conv_dimension_numbers(feat1.shape, w1.shape,
                                    ("NCHW", "OIHW", "NCHW"))
    m1 = lax.conv_general_dilated(feat1, w1, (1, 1), ((1, 1), (1, 1)),
                                  dimension_numbers=dn,
                                  precision=lax.Precision.HIGHEST)
    m1 = m1 + b1[None, :, None, None]
    dn2 = lax.conv_dimension_numbers(feat2.shape, w2.shape,
                                     ("NCHW", "OIHW", "NCHW"))
    m2 = lax.conv_general_dilated(feat2, w2, (1, 1), ((1, 1), (1, 1)),
                                  dimension_numbers=dn2,
                                  precision=lax.Precision.HIGHEST)
    m2 = m2 + b2[None, :, None, None]
    return feat1 * jax.nn.sigmoid(m2), feat2 * jax.nn.sigmoid(m1)


if __name__ == "__main__":
    key = jax.random.PRNGKey(0)
    k1, k2, k3, k4, k5, k6 = jax.random.split(key, 6)

    B, C1, C2, H, W = 2, 4, 8, 16, 16

    feat1 = jax.random.normal(k1, (B, C1, H, W), dtype=jnp.float32)
    feat2 = jax.random.normal(k2, (B, C2, H, W), dtype=jnp.float32)

    # Conv2d(C1, 1, 3) / Conv2d(C2, 1, 3) parameters, deterministic init.
    w1 = 0.1 * jax.random.normal(k3, (1, C1, 3, 3), dtype=jnp.float32)
    b1 = 0.1 * jax.random.normal(k4, (1,), dtype=jnp.float32)
    w2 = 0.1 * jax.random.normal(k5, (1, C2, 3, 3), dtype=jnp.float32)
    b2 = 0.1 * jax.random.normal(k6, (1,), dtype=jnp.float32)

    ref1, ref2 = _reference(feat1, feat2, w1, b1, w2, b2)

    # 1) Multi-tile path (2 H-tiles of 8 rows: interior + boundary halos),
    #    exact MXU precision -> tight tolerance.
    out1, out2 = bigate_pallas(feat1, feat2, w1, b1, w2, b2, row_tile=8,
                               precision=lax.Precision.HIGHEST)
    jax.block_until_ready((out1, out2))
    assert out1.shape == feat1.shape and out2.shape == feat2.shape
    assert jnp.allclose(out1, ref1, atol=1e-4, rtol=1e-4)
    assert jnp.allclose(out2, ref2, atol=1e-4, rtol=1e-4)

    # 2) Single-tile path (whole image per grid step), exact precision.
    out1b, out2b = bigate_pallas(feat1, feat2, w1, b1, w2, b2, row_tile=16,
                                 precision=lax.Precision.HIGHEST)
    jax.block_until_ready((out1b, out2b))
    assert jnp.allclose(out1b, ref1, atol=1e-4, rtol=1e-4)
    assert jnp.allclose(out2b, ref2, atol=1e-4, rtol=1e-4)

    # 3) Default (fast) MXU precision + auto row_tile / VMEM budget.  The
    #    conv map only feeds a sigmoid gate, so bf16-class matmul error is
    #    acceptable -> looser tolerance (still far below any halo/padding bug).
    out1c, out2c = bigate_pallas(feat1, feat2, w1, b1, w2, b2)
    jax.block_until_ready((out1c, out2c))
    assert jnp.allclose(out1c, ref1, atol=1e-2, rtol=1e-2)
    assert jnp.allclose(out2c, ref2, atol=1e-2, rtol=1e-2)

    print("KERNEL_OK")
</pallas_src>

<mosaic_0001>
module attributes {stable_mosaic.version = 11 : i64} {
  func.func @_bigate_kernel(%arg0: i32, %arg1: i32, %arg2: memref<1x8x16x4xf32, #tpu.memory_space<vmem>>, %arg3: memref<1x8x16x8xf32, #tpu.memory_space<vmem>>, %arg4: memref<1x2x16x4xf32, #tpu.memory_space<vmem>>, %arg5: memref<1x2x16x8xf32, #tpu.memory_space<vmem>>, %arg6: memref<4x16xf32, #tpu.memory_space<vmem>>, %arg7: memref<8x16xf32, #tpu.memory_space<vmem>>, %arg8: memref<1x1xf32, #tpu.memory_space<smem>>, %arg9: memref<1x1xf32, #tpu.memory_space<smem>>, %arg10: memref<1x8x16x4xf32, #tpu.memory_space<vmem>>, %arg11: memref<1x8x16x8xf32, #tpu.memory_space<vmem>>, %arg12: memref<10x16x18xf32, #tpu.memory_space<vmem>>) attributes {dimension_semantics = [#tpu.dimension_semantics<parallel>, #tpu.dimension_semantics<parallel>], iteration_bounds = array<i64: 2, 2>, scalar_prefetch = 0 : i64, scratch_operands = 1 : i64, tpu.core_type = #tpu.core_type<tc>, window_params = [{transform_indices = @transform_0, window_bounds = array<i64: 1, 8, 16, 4>}, {transform_indices = @transform_1, window_bounds = array<i64: 1, 8, 16, 8>}, {transform_indices = @transform_2, window_bounds = array<i64: 1, 2, 16, 4>}, {transform_indices = @transform_3, window_bounds = array<i64: 1, 2, 16, 8>}, {pipeline_mode = #tpu.pipeline_mode<synchronous>, transform_indices = @transform_4, window_bounds = array<i64: 4, 16>}, {pipeline_mode = #tpu.pipeline_mode<synchronous>, transform_indices = @transform_5, window_bounds = array<i64: 8, 16>}, {transform_indices = @transform_6, window_bounds = array<i64: 1, 1>}, {transform_indices = @transform_7, window_bounds = array<i64: 1, 1>}, {transform_indices = @transform_8, window_bounds = array<i64: 1, 8, 16, 4>}, {transform_indices = @transform_9, window_bounds = array<i64: 1, 8, 16, 8>}]} {
    %cst = arith.constant 0.000000e+00 : f32
    %0 = vector.broadcast %cst : f32 to vector<10x16x1xf32>
    %c0 = arith.constant 0 : index
    %c0_0 = arith.constant 0 : index
    %c0_1 = arith.constant 0 : index
    %1 = vector.load %arg12[%c0, %c0_0, %c0_1] : memref<10x16x18xf32, #tpu.memory_space<vmem>>, vector<10x16x1xf32>
    tpu.vector_store %arg12[%c0, %c0_0, %c0_1], %0 {strides = array<i32>} : memref<10x16x18xf32, #tpu.memory_space<vmem>>, vector<10x16x1xf32>,
    %c0_2 = arith.constant 0 : index
    %c0_3 = arith.constant 0 : index
    %c17 = arith.constant 17 : index
    %2 = vector.load %arg12[%c0_2, %c0_3, %c17] : memref<10x16x18xf32, #tpu.memory_space<vmem>>, vector<10x16x1xf32>
    tpu.vector_store %arg12[%c0_2, %c0_3, %c17], %0 {strides = array<i32>} : memref<10x16x18xf32, #tpu.memory_space<vmem>>, vector<10x16x1xf32>,
    %c0_4 = arith.constant 0 : index
    %c0_5 = arith.constant 0 : index
    %c0_6 = arith.constant 0 : index
    %c0_7 = arith.constant 0 : index
    %3 = vector.load %arg2[%c0_4, %c0_5, %c0_6, %c0_7] : memref<1x8x16x4xf32, #tpu.memory_space<vmem>>, vector<1x8x16x4xf32>
    %4 = vector.shape_cast %3 : vector<1x8x16x4xf32> to vector<8x16x4xf32>
    %c0_8 = arith.constant 0 : index
    %c0_9 = arith.constant 0 : index
    %c0_10 = arith.constant 0 : index
    %c0_11 = arith.constant 0 : index
    %5 = vector.load %arg3[%c0_8, %c0_9, %c0_10, %c0_11] : memref<1x8x16x8xf32, #tpu.memory_space<vmem>>, vector<1x8x16x8xf32>
    %6 = vector.shape_cast %5 : vector<1x8x16x8xf32> to vector<8x16x8xf32>
    %c0_12 = arith.constant 0 : index
    %c0_13 = arith.constant 0 : index
    %c0_14 = arith.constant 0 : index
    %c0_15 = arith.constant 0 : index
    %7 = vector.load %arg4[%c0_12, %c0_13, %c0_14, %c0_15] : memref<1x2x16x4xf32, #tpu.memory_space<vmem>>, vector<1x2x16x4xf32>
    %8 = vector.shape_cast %7 : vector<1x2x16x4xf32> to vector<2x16x4xf32>
    %c0_16 = arith.constant 0 : index
    %c0_17 = arith.constant 0 : index
    %9 = vector.load %arg6[%c0_16, %c0_17] : memref<4x16xf32, #tpu.memory_space<vmem>>, vector<4x16xf32>
    %c0_18 = arith.constant 0 : index
    %c0_19 = arith.constant 0 : index
    %10 = memref.load %arg8[%c0_18, %c0_19] : memref<1x1xf32, #tpu.memory_space<smem>>
    %11 = vector.shape_cast %4 : vector<8x16x4xf32> to vector<128x4xf32>
    %cst_20 = arith.constant dense<0.000000e+00> : vector<128x16xf32>
    %12 = tpu.matmul %11, %9, %cst_20 {dimension_numbers = #tpu.dot_dimension_numbers<[1], [0], [0], [1], [0, 0, 1, 1], [], []>, precision = #tpu.contract_precision<fp32>} : vector<128x4xf32>, vector<4x16xf32>, vector<128x16xf32> -> vector<128x16xf32>
    %13 = vector.shape_cast %12 : vector<128x16xf32> to vector<8x16x16xf32>
    %14 = vector.shape_cast %8 : vector<2x16x4xf32> to vector<32x4xf32>
    %cst_21 = arith.constant dense<0.000000e+00> : vector<32x16xf32>
    %15 = tpu.matmul %14, %9, %cst_21 {dimension_numbers = #tpu.dot_dimension_numbers<[1], [0], [0], [1], [0, 0, 1, 1], [], []>, precision = #tpu.contract_precision<fp32>} : vector<32x4xf32>, vector<4x16xf32>, vector<32x16xf32> -> vector<32x16xf32>
    %16 = vector.shape_cast %15 : vector<32x16xf32> to vector<2x16x16xf32>
    %17 = tpu.transpose %13, [0, 2, 1] : vector<8x16x16xf32> -> vector<8x16x16xf32>
    %18 = tpu.transpose %16, [0, 2, 1] : vector<2x16x16xf32> -> vector<2x16x16xf32>
    %c1 = arith.constant 1 : index
    %c0_22 = arith.constant 0 : index
    %c1_23 = arith.constant 1 : index
    %19 = vector.load %arg12[%c1, %c0_22, %c1_23] : memref<10x16x18xf32, #tpu.memory_space<vmem>>, vector<8x16x16xf32>
    tpu.vector_store %arg12[%c1, %c0_22, %c1_23], %17 {strides = array<i32>} : memref<10x16x18xf32, #tpu.memory_space<vmem>>, vector<8x16x16xf32>,
    %20 = vector.extract_strided_slice %18 {offsets = [0, 0, 0], sizes = [1, 16, 16], strides = [1, 1, 1]} : vector<2x16x16xf32> to vector<1x16x16xf32>
    %c0_24 = arith.constant 0 : index
    %c0_25 = arith.constant 0 : index
    %c1_26 = arith.constant 1 : index
    %21 = vector.load %arg12[%c0_24, %c0_25, %c1_26] : memref<10x16x18xf32, #tpu.memory_space<vmem>>, vector<1x16x16xf32>
    tpu.vector_store %arg12[%c0_24, %c0_25, %c1_26], %20 {strides = array<i32>} : memref<10x16x18xf32, #tpu.memory_space<vmem>>, vector<1x16x16xf32>,
    %22 = vector.extract_strided_slice %18 {offsets = [1, 0, 0], sizes = [1, 16, 16], strides = [1, 1, 1]} : vector<2x16x16xf32> to vector<1x16x16xf32>
    %c9 = arith.constant 9 : index
    %c0_27 = arith.constant 0 : index
    %c1_28 = arith.constant 1 : index
    %23 = vector.load %arg12[%c9, %c0_27, %c1_28] : memref<10x16x18xf32, #tpu.memory_space<vmem>>, vector<1x16x16xf32>
    tpu.vector_store %arg12[%c9, %c0_27, %c1_28], %22 {strides = array<i32>} : memref<10x16x18xf32, #tpu.memory_space<vmem>>, vector<1x16x16xf32>,
    %24 = vector.broadcast %10 : f32 to vector<8x16xf32>
    %c0_29 = arith.constant 0 : index
    %c0_30 = arith.constant 0 : index
    %c0_31 = arith.constant 0 : index
    %25 = vector.load %arg12[%c0_29, %c0_30, %c0_31] : memref<10x16x18xf32, #tpu.memory_space<vmem>>, vector<8x1x16xf32>
    %26 = vector.shape_cast %25 : vector<8x1x16xf32> to vector<8x16xf32>
    %27 = arith.addf %24, %26 : vector<8x16xf32>
    %c0_32 = arith.constant 0 : index
    %c1_33 = arith.constant 1 : index
    %c1_34 = arith.constant 1 : index
    %28 = vector.load %arg12[%c0_32, %c1_33, %c1_34] : memref<10x16x18xf32, #tpu.memory_space<vmem>>, vector<8x1x16xf32>
    %29 = vector.shape_cast %28 : vector<8x1x16xf32> to vector<8x16xf32>
    %30 = arith.addf %27, %29 : vector<8x16xf32>
    %c0_35 = arith.constant 0 : index
    %c2 = arith.constant 2 : index
    %c2_36 = arith.constant 2 : index
    %31 = vector.load %arg12[%c0_35, %c2, %c2_36] : memref<10x16x18xf32, #tpu.memory_space<vmem>>, vector<8x1x16xf32>
    %32 = vector.shape_cast %31 : vector<8x1x16xf32> to vector<8x16xf32>
    %33 = arith.addf %30, %32 : vector<8x16xf32>
    %c1_37 = arith.constant 1 : index
    %c3 = arith.constant 3 : index
    %c0_38 = arith.constant 0 : index
    %34 = vector.load %arg12[%c1_37, %c3, %c0_38] : memref<10x16x18xf32, #tpu.memory_space<vmem>>, vector<8x1x16xf32>
    %35 = vector.shape_cast %34 : vector<8x1x16xf32> to vector<8x16xf32>
    %36 = arith.addf %33, %35 : vector<8x16xf32>
    %c1_39 = arith.constant 1 : index
    %c4 = arith.constant 4 : index
    %c1_40 = arith.constant 1 : index
    %37 = vector.load %arg12[%c1_39, %c4, %c1_40] : memref<10x16x18xf32, #tpu.memory_space<vmem>>, vector<8x1x16xf32>
    %38 = vector.shape_cast %37 : vector<8x1x16xf32> to vector<8x16xf32>
    %39 = arith.addf %36, %38 : vector<8x16xf32>
    %c1_41 = arith.constant 1 : index
    %c5 = arith.constant 5 : index
    %c2_42 = arith.constant 2 : index
    %40 = vector.load %arg12[%c1_41, %c5, %c2_42] : memref<10x16x18xf32, #tpu.memory_space<vmem>>, vector<8x1x16xf32>
    %41 = vector.shape_cast %40 : vector<8x1x16xf32> to vector<8x16xf32>
    %42 = arith.addf %39, %41 : vector<8x16xf32>
    %c2_43 = arith.constant 2 : index
    %c6 = arith.constant 6 : index
    %c0_44 = arith.constant 0 : index
    %43 = vector.load %arg12[%c2_43, %c6, %c0_44] : memref<10x16x18xf32, #tpu.memory_space<vmem>>, vector<8x1x16xf32>
    %44 = vector.shape_cast %43 : vector<8x1x16xf32> to vector<8x16xf32>
    %45 = arith.addf %42, %44 : vector<8x16xf32>
    %c2_45 = arith.constant 2 : index
    %c7 = arith.constant 7 : index
    %c1_46 = arith.constant 1 : index
    %46 = vector.load %arg12[%c2_45, %c7, %c1_46] : memref<10x16x18xf32, #tpu.memory_space<vmem>>, vector<8x1x16xf32>
    %47 = vector.shape_cast %46 : vector<8x1x16xf32> to vector<8x16xf32>
    %48 = arith.addf %45, %47 : vector<8x16xf32>
    %c2_47 = arith.constant 2 : index
    %c8 = arith.constant 8 : index
    %c2_48 = arith.constant 2 : index
    %49 = vector.load %arg12[%c2_47, %c8, %c2_48] : memref<10x16x18xf32, #tpu.memory_space<vmem>>, vector<8x1x16xf32>
    %50 = vector.shape_cast %49 : vector<8x1x16xf32> to vector<8x16xf32>
    %51 = arith.addf %48, %50 : vector<8x16xf32>
    %c0_49 = arith.constant 0 : index
    %c0_50 = arith.constant 0 : index
    %c0_51 = arith.constant 0 : index
    %c0_52 = arith.constant 0 : index
    %52 = vector.load %arg5[%c0_49, %c0_50, %c0_51, %c0_52] : memref<1x2x16x8xf32, #tpu.memory_space<vmem>>, vector<1x2x16x8xf32>
    %53 = vector.shape_cast %52 : vector<1x2x16x8xf32> to vector<2x16x8xf32>
    %c0_53 = arith.constant 0 : index
    %c0_54 = arith.constant 0 : index
    %54 = vector.load %arg7[%c0_53, %c0_54] : memref<8x16xf32, #tpu.memory_space<vmem>>, vector<8x16xf32>
    %c0_55 = arith.constant 0 : index
    %c0_56 = arith.constant 0 : index
    %55 = memref.load %arg9[%c0_55, %c0_56] : memref<1x1xf32, #tpu.memory_space<smem>>
    %56 = vector.shape_cast %6 : vector<8x16x8xf32> to vector<128x8xf32>
    %cst_57 = arith.constant dense<0.000000e+00> : vector<128x16xf32>
    %57 = tpu.matmul %56, %54, %cst_57 {dimension_numbers = #tpu.dot_dimension_numbers<[1], [0], [0], [1], [0, 0, 1, 1], [], []>, precision = #tpu.contract_precision<fp32>} : vector<128x8xf32>, vector<8x16xf32>, vector<128x16xf32> -> vector<128x16xf32>
    %58 = vector.shape_cast %57 : vector<128x16xf32> to vector<8x16x16xf32>
    %59 = vector.shape_cast %53 : vector<2x16x8xf32> to vector<32x8xf32>
    %cst_58 = arith.constant dense<0.000000e+00> : vector<32x16xf32>
    %60 = tpu.matmul %59, %54, %cst_58 {dimension_numbers = #tpu.dot_dimension_numbers<[1], [0], [0], [1], [0, 0, 1, 1], [], []>, precision = #tpu.contract_precision<fp32>} : vector<32x8xf32>, vector<8x16xf32>, vector<32x16xf32> -> vector<32x16xf32>
    %61 = vector.shape_cast %60 : vector<32x16xf32> to vector<2x16x16xf32>
    %62 = tpu.transpose %58, [0, 2, 1] : vector<8x16x16xf32> -> vector<8x16x16xf32>
    %63 = tpu.transpose %61, [0, 2, 1] : vector<2x16x16xf32> -> vector<2x16x16xf32>
    %c1_59 = arith.constant 1 : index
    %c0_60 = arith.constant 0 : index
    %c1_61 = arith.constant 1 : index
    %64 = vector.load %arg12[%c1_59, %c0_60, %c1_61] : memref<10x16x18xf32, #tpu.memory_space<vmem>>, vector<8x16x16xf32>
    tpu.vector_store %arg12[%c1_59, %c0_60, %c1_61], %62 {strides = array<i32>} : memref<10x16x18xf32, #tpu.memory_space<vmem>>, vector<8x16x16xf32>,
    %65 = vector.extract_strided_slice %63 {offsets = [0, 0, 0], sizes = [1, 16, 16], strides = [1, 1, 1]} : vector<2x16x16xf32> to vector<1x16x16xf32>
    %c0_62 = arith.constant 0 : index
    %c0_63 = arith.constant 0 : index
    %c1_64 = arith.constant 1 : index
    %66 = vector.load %arg12[%c0_62, %c0_63, %c1_64] : memref<10x16x18xf32, #tpu.memory_space<vmem>>, vector<1x16x16xf32>
    tpu.vector_store %arg12[%c0_62, %c0_63, %c1_64], %65 {strides = array<i32>} : memref<10x16x18xf32, #tpu.memory_space<vmem>>, vector<1x16x16xf32>,
    %67 = vector.extract_strided_slice %63 {offsets = [1, 0, 0], sizes = [1, 16, 16], strides = [1, 1, 1]} : vector<2x16x16xf32> to vector<1x16x16xf32>
    %c9_65 = arith.constant 9 : index
    %c0_66 = arith.constant 0 : index
    %c1_67 = arith.constant 1 : index
    %68 = vector.load %arg12[%c9_65, %c0_66, %c1_67] : memref<10x16x18xf32, #tpu.memory_space<vmem>>, vector<1x16x16xf32>
    tpu.vector_store %arg12[%c9_65, %c0_66, %c1_67], %67 {strides = array<i32>} : memref<10x16x18xf32, #tpu.memory_space<vmem>>, vector<1x16x16xf32>,
    %69 = vector.broadcast %55 : f32 to vector<8x16xf32>
    %c0_68 = arith.constant 0 : index
    %c0_69 = arith.constant 0 : index
    %c0_70 = arith.constant 0 : index
    %70 = vector.load %arg12[%c0_68, %c0_69, %c0_70] : memref<10x16x18xf32, #tpu.memory_space<vmem>>, vector<8x1x16xf32>
    %71 = vector.shape_cast %70 : vector<8x1x16xf32> to vector<8x16xf32>
    %72 = arith.addf %69, %71 : vector<8x16xf32>
    %c0_71 = arith.constant 0 : index
    %c1_72 = arith.constant 1 : index
    %c1_73 = arith.constant 1 : index
    %73 = vector.load %arg12[%c0_71, %c1_72, %c1_73] : memref<10x16x18xf32, #tpu.memory_space<vmem>>, vector<8x1x16xf32>
    %74 = vector.shape_cast %73 : vector<8x1x16xf32> to vector<8x16xf32>
    %75 = arith.addf %72, %74 : vector<8x16xf32>
    %c0_74 = arith.constant 0 : index
    %c2_75 = arith.constant 2 : index
    %c2_76 = arith.constant 2 : index
    %76 = vector.load %arg12[%c0_74, %c2_75, %c2_76] : memref<10x16x18xf32, #tpu.memory_space<vmem>>, vector<8x1x16xf32>
    %77 = vector.shape_cast %76 : vector<8x1x16xf32> to vector<8x16xf32>
    %78 = arith.addf %75, %77 : vector<8x16xf32>
    %c1_77 = arith.constant 1 : index
    %c3_78 = arith.constant 3 : index
    %c0_79 = arith.constant 0 : index
    %79 = vector.load %arg12[%c1_77, %c3_78, %c0_79] : memref<10x16x18xf32, #tpu.memory_space<vmem>>, vector<8x1x16xf32>
    %80 = vector.shape_cast %79 : vector<8x1x16xf32> to vector<8x16xf32>
    %81 = arith.addf %78, %80 : vector<8x16xf32>
    %c1_80 = arith.constant 1 : index
    %c4_81 = arith.constant 4 : index
    %c1_82 = arith.constant 1 : index
    %82 = vector.load %arg12[%c1_80, %c4_81, %c1_82] : memref<10x16x18xf32, #tpu.memory_space<vmem>>, vector<8x1x16xf32>
    %83 = vector.shape_cast %82 : vector<8x1x16xf32> to vector<8x16xf32>
    %84 = arith.addf %81, %83 : vector<8x16xf32>
    %c1_83 = arith.constant 1 : index
    %c5_84 = arith.constant 5 : index
    %c2_85 = arith.constant 2 : index
    %85 = vector.load %arg12[%c1_83, %c5_84, %c2_85] : memref<10x16x18xf32, #tpu.memory_space<vmem>>, vector<8x1x16xf32>
    %86 = vector.shape_cast %85 : vector<8x1x16xf32> to vector<8x16xf32>
    %87 = arith.addf %84, %86 : vector<8x16xf32>
    %c2_86 = arith.constant 2 : index
    %c6_87 = arith.constant 6 : index
    %c0_88 = arith.constant 0 : index
    %88 = vector.load %arg12[%c2_86, %c6_87, %c0_88] : memref<10x16x18xf32, #tpu.memory_space<vmem>>, vector<8x1x16xf32>
    %89 = vector.shape_cast %88 : vector<8x1x16xf32> to vector<8x16xf32>
    %90 = arith.addf %87, %89 : vector<8x16xf32>
    %c2_89 = arith.constant 2 : index
    %c7_90 = arith.constant 7 : index
    %c1_91 = arith.constant 1 : index
    %91 = vector.load %arg12[%c2_89, %c7_90, %c1_91] : memref<10x16x18xf32, #tpu.memory_space<vmem>>, vector<8x1x16xf32>
    %92 = vector.shape_cast %91 : vector<8x1x16xf32> to vector<8x16xf32>
    %93 = arith.addf %90, %92 : vector<8x16xf32>
    %c2_92 = arith.constant 2 : index
    %c8_93 = arith.constant 8 : index
    %c2_94 = arith.constant 2 : index
    %94 = vector.load %arg12[%c2_92, %c8_93, %c2_94] : memref<10x16x18xf32, #tpu.memory_space<vmem>>, vector<8x1x16xf32>
    %95 = vector.shape_cast %94 : vector<8x1x16xf32> to vector<8x16xf32>
    %96 = arith.addf %93, %95 : vector<8x16xf32>
    %97 = arith.negf %51 : vector<8x16xf32>
    %98 = math.exp %97 : vector<8x16xf32>
    %cst_95 = arith.constant 1.000000e+00 : f32
    %99 = vector.broadcast %cst_95 : f32 to vector<8x16xf32>
    %100 = arith.addf %99, %98 : vector<8x16xf32>
    %101 = arith.divf %99, %100 : vector<8x16xf32>
    %102 = arith.negf %96 : vector<8x16xf32>
    %103 = math.exp %102 : vector<8x16xf32>
    %cst_96 = arith.constant 1.000000e+00 : f32
    %104 = vector.broadcast %cst_96 : f32 to vector<8x16xf32>
    %105 = arith.addf %104, %103 : vector<8x16xf32>
    %106 = arith.divf %104, %105 : vector<8x16xf32>
    %107 = vector.shape_cast %106 : vector<8x16xf32> to vector<8x16x1xf32>
    %108 = vector.broadcast %107 : vector<8x16x1xf32> to vector<8x16x4xf32>
    %109 = arith.mulf %4, %108 : vector<8x16x4xf32>
    %c0_97 = arith.constant 0 : index
    %c0_98 = arith.constant 0 : index
    %c0_99 = arith.constant 0 : index
    %c0_100 = arith.constant 0 : index
    %110 = vector.load %arg10[%c0_97, %c0_98, %c0_99, %c0_100] : memref<1x8x16x4xf32, #tpu.memory_space<vmem>>, vector<1x8x16x4xf32>
    %111 = vector.shape_cast %110 : vector<1x8x16x4xf32> to vector<8x16x4xf32>
    %112 = vector.shape_cast %109 : vector<8x16x4xf32> to vector<1x8x16x4xf32>
    tpu.vector_store %arg10[%c0_97, %c0_98, %c0_99, %c0_100], %112 {strides = array<i32>} : memref<1x8x16x4xf32, #tpu.memory_space<vmem>>, vector<1x8x16x4xf32>,
    %113 = vector.shape_cast %101 : vector<8x16xf32> to vector<8x16x1xf32>
    %114 = vector.broadcast %113 : vector<8x16x1xf32> to vector<8x16x8xf32>
    %115 = arith.mulf %6, %114 : vector<8x16x8xf32>
    %c0_101 = arith.constant 0 : index
    %c0_102 = arith.constant 0 : index
    %c0_103 = arith.constant 0 : index
    %c0_104 = arith.constant 0 : index
    %116 = vector.load %arg11[%c0_101, %c0_102, %c0_103, %c0_104] : memref<1x8x16x8xf32, #tpu.memory_space<vmem>>, vector<1x8x16x8xf32>
    %117 = vector.shape_cast %116 : vector<1x8x16x8xf32> to vector<8x16x8xf32>
    %118 = vector.shape_cast %115 : vector<8x16x8xf32> to vector<1x8x16x8xf32>
    tpu.vector_store %arg11[%c0_101, %c0_102, %c0_103, %c0_104], %118 {strides = array<i32>} : memref<1x8x16x8xf32, #tpu.memory_space<vmem>>, vector<1x8x16x8xf32>,
    return
  }
  func.func @transform_0(%arg0: i32, %arg1: i32) -> (i32, i32, i32, i32) {
    %c0_i32 = arith.constant 0 : i32
    %c0_i32_0 = arith.constant 0 : i32
    %c0_i32_1 = arith.constant 0 : i32
    return %arg0, %arg1, %c0_i32, %c0_i32_0 : i32, i32, i32, i32
  }
  func.func @transform_1(%arg0: i32, %arg1: i32) -> (i32, i32, i32, i32) {
    %c0_i32 = arith.constant 0 : i32
    %c0_i32_0 = arith.constant 0 : i32
    %c0_i32_1 = arith.constant 0 : i32
    return %arg0, %arg1, %c0_i32, %c0_i32_0 : i32, i32, i32, i32
  }
  func.func @transform_2(%arg0: i32, %arg1: i32) -> (i32, i32, i32, i32) {
    %c0_i32 = arith.constant 0 : i32
    %c0_i32_0 = arith.constant 0 : i32
    %c0_i32_1 = arith.constant 0 : i32
    return %arg0, %arg1, %c0_i32, %c0_i32_0 : i32, i32, i32, i32
  }
  func.func @transform_3(%arg0: i32, %arg1: i32) -> (i32, i32, i32, i32) {
    %c0_i32 = arith.constant 0 : i32
    %c0_i32_0 = arith.constant 0 : i32
    %c0_i32_1 = arith.constant 0 : i32
    return %arg0, %arg1, %c0_i32, %c0_i32_0 : i32, i32, i32, i32
  }
  func.func @transform_4(%arg0: i32, %arg1: i32) -> (i32, i32) {
    %c0_i32 = arith.constant 0 : i32
    %c0_i32_0 = arith.constant 0 : i32
    %c0_i32_1 = arith.constant 0 : i32
    return %c0_i32, %c0_i32_0 : i32, i32
  }
  func.func @transform_5(%arg0: i32, %arg1: i32) -> (i32, i32) {
    %c0_i32 = arith.constant 0 : i32
    %c0_i32_0 = arith.constant 0 : i32
    %c0_i32_1 = arith.constant 0 : i32
    return %c0_i32, %c0_i32_0 : i32, i32
  }
  func.func @transform_6(%arg0: i32, %arg1: i32) -> (i32, i32) {
    %c0_i32 = arith.constant 0 : i32
    %c0_i32_0 = arith.constant 0 : i32
    %c0_i32_1 = arith.constant 0 : i32
    return %c0_i32, %c0_i32_0 : i32, i32
  }
  func.func @transform_7(%arg0: i32, %arg1: i32) -> (i32, i32) {
    %c0_i32 = arith.constant 0 : i32
    %c0_i32_0 = arith.constant 0 : i32
    %c0_i32_1 = arith.constant 0 : i32
    return %c0_i32, %c0_i32_0 : i32, i32
  }
  func.func @transform_8(%arg0: i32, %arg1: i32) -> (i32, i32, i32, i32) {
    %c0_i32 = arith.constant 0 : i32
    %c0_i32_0 = arith.constant 0 : i32
    %c0_i32_1 = arith.constant 0 : i32
    return %arg0, %arg1, %c0_i32, %c0_i32_0 : i32, i32, i32, i32
  }
  func.func @transform_9(%arg0: i32, %arg1: i32) -> (i32, i32, i32, i32) {
    %c0_i32 = arith.constant 0 : i32
    %c0_i32_0 = arith.constant 0 : i32
    %c0_i32_1 = arith.constant 0 : i32
    return %arg0, %arg1, %c0_i32, %c0_i32_0 : i32, i32, i32, i32
  }
}

</mosaic_0001>

<bundles_post_ra>
// kernel: tpu_custom_call.1
= control target key start
LH: loop header
LB: loop body
LE: loop exit
PB: predicated region body
PF: predicated region fallthrough
CT: control target
= control target key end

     0   :  { %s5049_s13 = smov 0   ;;  %s5051_s14 = smov 0   ;;  %s6524_s0 = inlined_call_operand.vmem [shape: f32[2,16,16,4], index: 0, kind: input, shape index: {}]   ;;  %s6525_s1 = inlined_call_operand.vmem [shape: f32[2,16,16,8], index: 1, kind: input, shape index: {}]   ;;  %s6526_s2 = inlined_call_operand.vmem [shape: f32[2,4,16,4], index: 2, kind: input, shape index: {}]   ;;  %s6527_s3 = inlined_call_operand.vmem [shape: f32[2,4,16,8], index: 3, kind: input, shape index: {}]   ;;  %s6528_s4 = inlined_call_operand.vmem [shape: f32[4,16], index: 4, kind: input, shape index: {}]   ;;  %s6529_s5 = inlined_call_operand.vmem [shape: f32[8,16], index: 5, kind: input, shape index: {}]   ;;  %s6530_s6 = inlined_call_operand.<no memory space> [shape: f32[1,1], index: 6, kind: input, shape index: {}]   ;;  %s6531_s7 = inlined_call_operand.<no memory space> [shape: f32[1,1], index: 7, kind: input, shape index: {}]   ;;  %s6532_s8 = inlined_call_operand.vmem [shape: f32[2,16,16,4], index: 8, kind: output, shape index: {0}]   ;;  %s6533_s9 = inlined_call_operand.vmem [shape: f32[2,16,16,8], index: 9, kind: output, shape index: {1}]  }
   0x1   :  { %15 = sst [smem:[#allocation3]] %s6530_s6  ;;  %s5053_s15 = smov 0  }
   0x2   :  { %16 = sst [smem:[#allocation4]] %s6531_s7  ;;  %s5055_s16 = smov 0  }
   0x3   :  { %s5057_s17 = smov 0  }
   0x4 LB: > { %s31_s6 = sadd.s32 1, %s4979_s15  ;;  %s34_s7 = sadd.s32 1, %s4983_s16  ;;  %s4987_s17 = sphi %s5057_s17, %s22_s17   ;;  %s4983_s16 = sphi %s5055_s16, %s6549_s16   ;;  %s4979_s15 = sphi %s5053_s15, %s6548_s15   ;;  %s4975_s14 = sphi %s5051_s14, %s6547_s14   ;;  %s4971_s13 = sphi %s5049_s13, %s6546_s13  }
   0x5   : > { %p32_p0 = scmp.ge.s32.totalorder %s31_s6, 2  ;;  %p4750_p1 = scmp.ge.s32.totalorder %s4987_s17, 1 }
   0x6   : > { %p370_p2 = scmp.lt.s32.totalorder %s4987_s17, 5 }
   0x7   : > { %s6551_s6 = smov (%p32_p0, %s31_s6), 0  ;;  %s6553_s7 = smov (!%p32_p0, %s34_s7), %s4983_s16 }
   0x8   : > { %p371_p3 = pnand %p4750_p1, %p370_p2  ;;  %p36_p4 = scmp.ge.s32.totalorder %s6553_s7, 2 }
   0xa   : > { %s6555_s7 = smov (%p36_p4, %s6553_s7), 0  ;;  %374 = sbr.rel (%p371_p3) target bundleno = 2050 (0x802), region = 52 }
   0xf   : > { %v600_v0 = vld [vmem:[%s6528_s4] sm:$0xf]  ;;  %vm651_vm0 = vcmask 1043456   ;;  %s4751_s20 = sshll.u32 %s4971_s13, 3  ;;  %p457_p5 = scmp.lt.s32.totalorder %s4975_s14, 1  ;;  %vm602_vm1 = vcmask 31744  }
  0x10   : > { %v653_v1 = vsel %vm651_vm0, %v600_v0, 0  ;;  %p459_p6 = scmp.lt.s32.totalorder %s4751_s20, 15  ;;  %s4759_s28 = sshll.u32 %s4971_s13, 1  ;;  %vm522_vm2 = vcmask 7168   ;;  %vm543_vm3 = vcmask 146568   ;;  %vm2284_vm4 = vcmask 64512  }
  0x11   : > { %v5085_v2 = vand.u32 4294901760, %v653_v1  ;;  %s6557_s14 = smov (!%p457_p5, %s4975_s14), 1  ;;  %p481_p7 = scmp.lt.s32.totalorder %s4759_s28, 3  ;;  %vm1902_vm5 = vcmask 138248  }
  0x12   : > { %s6559_s20 = smov (!%p459_p6, %s4751_s20), 15  ;;  %s4753_s21 = sshll.u32 %s6557_s14, 5 }
  0x13   : > { %v817_v3 = vsub.f32 %v653_v1, %v5085_v2  ;;  %1002 = vmatpush.msra.mxu3 %v5085_v2  ;;  %671 = vmatpush.msra.mxu0 %v5085_v2  ;;  %s4752_s22 = sshll.u32 %s6559_s20, 1  ;;  %s6561_s28 = smov (!%p481_p7, %s4759_s28), 3 }
  0x14   : > { %s463_s23 = sadd.s32 %s4753_s21, %s4752_s22  ;;  %s4760_s29 = sshll.u32 %s6561_s28, 1 }
  0x15   : > { %904 = vmatpush.msra.mxu2 %v817_v3  ;;  %v5093_v4 = vand.u32 4294901760, %v817_v3  ;;  %s5095_s24 = sshll.u32 %s463_s23, 3  ;;  %s4761_s30 = sshll.u32 %s6557_s14, 3 }
  0x16   : > { %s5102_s27 = scalar_lea.vmem %s6524_s0, %s5095_s24  ;;  %s5257_s10 = sadd.s32 %s4761_s30, %s4760_s29 }
  0x17   : > { %1294 = vmatpush.msrb.mxu2 %v5085_v2  ;;  %v819_v5 = vsub.f32 %v817_v3, %v5093_v4  ;;  %1118 = vmatpush.msrb.mxu0 %v5093_v4  ;;  %v564_v6 = vld [vmem:[%s5102_s27] sm:$0xff]  ;;  %v565_v7 = vld [vmem:[%s5102_s27 + $0x8] sm:$0xff]  ;;  %v566_v13 = vld [vmem:[%s5102_s27 + $0x10] sm:$0xff]  ;;  %s4762_s11 = sshll.u32 %s5257_s10, 3  ;;  %s4989_s18 = smov 1  }
  0x18   : > { %v604_v8 = vsel %vm602_vm1, %v564_v6, 0  ;;  %v607_v10 = vsel %vm602_vm1, %v565_v7, 0  ;;  %v610_v16 = vsel %vm602_vm1, %v566_v13, 0  ;;  %v567_v22 = vld [vmem:[%s5102_s27 + $0x18] sm:$0xff]  ;;  %v568_v29 = vld [vmem:[%s5102_s27 + $0x20] sm:$0xff]  ;;  %v569_v36 = vld [vmem:[%s5102_s27 + $0x28] sm:$0xff]  ;;  %s5269_s14 = scalar_lea.vmem %s6526_s2, %s4762_s11  ;;  %s5502_s21 = scalar_lea.vmem %s6525_s1, %s5095_s24 }
  0x19   : > { %v820_v9 = vand.u32 4294901760, %v819_v5  ;;  %v5110_v11 = vand.u32 4294901760, %v604_v8  ;;  %v5112_v12 = vand.u32 4294901760, %v607_v10  ;;  %v5120_v20 = vand.u32 4294901760, %v610_v16  ;;  %v570_v43 = vld [vmem:[%s5102_s27 + $0x30] sm:$0xff]  ;;  %v571_v50 = vld [vmem:[%s5102_s27 + $0x38] sm:$0xff]  ;;  %s5892_s12 = scalar_lea.vmem %s6527_s3, %s4762_s11  ;;  %s6427_s20 = scalar_lea.vmem %s6532_s8, %s5095_s24 }
  0x1a   : > { %v613_v25 = vsel %vm602_vm1, %v567_v22, 0  ;;  %v616_v32 = vsel %vm602_vm1, %v568_v29, 0  ;;  %v619_v39 = vsel %vm602_vm1, %v569_v36, 0  ;;  %v622_v46 = vsel %vm602_vm1, %v570_v43, 0  ;;  %v572_v57 = vld [vmem:[%s5102_s27 + $0x40] sm:$0xff]  ;;  %v573_v0 = vld [vmem:[%s5102_s27 + $0x48] sm:$0xff] }
  0x1b   : > { %821 = vmatpush.msra.mxu1 %v820_v9  ;;  %1348 = vmatpush.msrb.mxu3 %v820_v9  ;;  %v673_v14 = vsub.f32 %v604_v8, %v5110_v11  ;;  %v681_v15 = vsub.f32 %v607_v10, %v5112_v12  ;;  %v689_v24 = vsub.f32 %v610_v16, %v5120_v20  ;;  %v5127_v28 = vand.u32 4294901760, %v613_v25  ;;  %v574_v9 = vld [vmem:[%s5102_s27 + $0x50] sm:$0xff]  ;;  %s4991_s25 = smov 127   ;;  %s4992_s26 = smov 126  }
  0x1c   : > { %823 = vmatmul.f32.vlgmr.msra.gmra.mxu1 %v5110_v11  ;;  %v5133_v35 = vand.u32 4294901760, %v616_v32  ;;  %v5139_v42 = vand.u32 4294901760, %v619_v39  ;;  %v5145_v49 = vand.u32 4294901760, %v622_v46  ;;  %v625_v53 = vsel %vm602_vm1, %v571_v50, 0  ;;  %v578_v43 = vld [vmem:[%s5102_s27 + $0x70] sm:$0xff]  ;;  %s601_s28 = sld [smem:[#allocation3]] }
  0x1d   : > { %1200 = vmatpush.msrb.mxu1 %v5085_v2  ;;  %907 = vmatmul.f32.vlgmr.msra.gmra.mxu2 %v673_v14  ;;  %v674_v17 = vand.u32 4294901760, %v673_v14  ;;  %v682_v19 = vand.u32 4294901760, %v681_v15  ;;  %v690_v27 = vand.u32 4294901760, %v689_v24  ;;  %v697_v31 = vsub.f32 %v613_v25, %v5127_v28  ;;  %s2283_s10 = sld [smem:[#allocation4]] }
  0x1e   : > { %1383 = vmatpush.msra.mxu2 %v817_v3  ;;  %v705_v38 = vsub.f32 %v616_v32, %v5133_v35  ;;  %v713_v45 = vsub.f32 %v619_v39, %v5139_v42  ;;  %v721_v52 = vsub.f32 %v622_v46, %v5145_v49  ;;  %v5151_v56 = vand.u32 4294901760, %v625_v53 }
  0x1f   : > { %1006 = vmatmul.f32.vlgmr.msra.gmra.mxu3 %v674_v17  ;;  %v675_v18 = vsub.f32 %v673_v14, %v674_v17  ;;  %v683_v23 = vsub.f32 %v681_v15, %v682_v19  ;;  %v691_v30 = vsub.f32 %v689_v24, %v690_v27  ;;  %v698_v34 = vand.u32 4294901760, %v697_v31 }
  0x20   : > { %1421 = vmatpush.msra.mxu3 %v5085_v2  ;;  %v706_v41 = vand.u32 4294901760, %v705_v38  ;;  %v714_v48 = vand.u32 4294901760, %v713_v45  ;;  %v722_v55 = vand.u32 4294901760, %v721_v52  ;;  %v729_v59 = vsub.f32 %v625_v53, %v5151_v56 }
  0x21   : > { %v676_v21 = vand.u32 4294901760, %v675_v18  ;;  %v684_v26 = vand.u32 4294901760, %v683_v23  ;;  %v692_v33 = vand.u32 4294901760, %v691_v30  ;;  %v699_v37 = vsub.f32 %v697_v31, %v698_v34  ;;  %v575_v18 = vld [vmem:[%s5102_s27 + $0x58] sm:$0xff] }
  0x22   : > { %v707_v44 = vsub.f32 %v705_v38, %v706_v41  ;;  %v715_v51 = vsub.f32 %v713_v45, %v714_v48  ;;  %v723_v58 = vsub.f32 %v721_v52, %v722_v55  ;;  %v628_v60 = vsel %vm602_vm1, %v572_v57, 0 }
  0x23   : > { %677 = vmatmul.f32.vlgmr.msra.gmra.mxu0 %v676_v21  ;;  %v700_v40 = vand.u32 4294901760, %v699_v37  ;;  %v730_v62 = vand.u32 4294901760, %v729_v59  ;;  %v5157_v63 = vand.u32 4294901760, %v628_v60  ;;  %v631_v5 = vsel %vm602_vm1, %v573_v0, 0 }
  0x24   : > { %827 = vmatmul.f32.gmra.mxu1 %v5112_v12  ;;  %v708_v47 = vand.u32 4294901760, %v707_v44  ;;  %v716_v54 = vand.u32 4294901760, %v715_v51  ;;  %v724_v61 = vand.u32 4294901760, %v723_v58  ;;  %v5163_v8 = vand.u32 4294901760, %v631_v5  ;;  %v579_v51 = vld [vmem:[%s5102_s27 + $0x78] sm:$0xff] }
  0x25   : > { %912 = vmatmul.f32.gmra.mxu2 %v681_v15  ;;  %v731_v1 = vsub.f32 %v729_v59, %v730_v62  ;;  %v737_v3 = vsub.f32 %v628_v60, %v5157_v63  ;;  %v634_v14 = vsel %vm602_vm1, %v574_v9, 0  ;;  %v637_v22 = vsel %vm602_vm1, %v575_v18, 0 }
  0x26   : > { %v745_v13 = vsub.f32 %v631_v5, %v5163_v8  ;;  %v5169_v17 = vand.u32 4294901760, %v634_v14  ;;  %v5175_v25 = vand.u32 4294901760, %v637_v22  ;;  %v646_v46 = vsel %vm602_vm1, %v578_v43, 0 }
  0x27   : > { %1012 = vmatmul.f32.gmra.mxu3 %v682_v19  ;;  %v732_v6 = vand.u32 4294901760, %v731_v1  ;;  %v738_v7 = vand.u32 4294901760, %v737_v3  ;;  %v5193_v50 = vand.u32 4294901760, %v646_v46 }
  0x28   : > { %v746_v16 = vand.u32 4294901760, %v745_v13  ;;  %v753_v21 = vsub.f32 %v634_v14, %v5169_v17  ;;  %v761_v29 = vsub.f32 %v637_v22, %v5175_v25 }
  0x29   : > { %v739_v10 = vsub.f32 %v737_v3, %v738_v7  ;;  %v785_v53 = vsub.f32 %v646_v46, %v5193_v50 }
  0x2a   : > { %v747_v19 = vsub.f32 %v745_v13, %v746_v16  ;;  %v762_v32 = vand.u32 4294901760, %v761_v29 }
  0x2b   : > { %685 = vmatmul.f32.gmra.mxu0 %v684_v26  ;;  %v740_v15 = vand.u32 4294901760, %v739_v10  ;;  %v576_v26 = vld [vmem:[%s5102_s27 + $0x60] sm:$0xff]  ;;  %v786_v57 = vand.u32 4294901760, %v785_v53 }
  0x2c   : > { %831 = vmatmul.f32.gmra.mxu1 %v5120_v20  ;;  %v748_v23 = vand.u32 4294901760, %v747_v19  ;;  %v640_v30 = vsel %vm602_vm1, %v576_v26, 0  ;;  %v763_v36 = vsub.f32 %v761_v29, %v762_v32 }
  0x2d   : > { %917 = vmatmul.f32.gmra.mxu2 %v689_v24  ;;  %v754_v24 = vand.u32 4294901760, %v753_v21 }
  0x2e   : > { %v764_v39 = vand.u32 4294901760, %v763_v36 }
  0x2f   : > { %1018 = vmatmul.f32.gmra.mxu3 %v690_v27  ;;  %v755_v27 = vsub.f32 %v753_v21, %v754_v24 }
  0x33   : > { %693 = vmatmul.f32.gmra.mxu0 %v692_v33  ;;  %v5181_v33 = vand.u32 4294901760, %v640_v30 }
  0x34   : > { %835 = vmatmul.f32.gmra.mxu1 %v5127_v28 }
  0x35   : > { %922 = vmatmul.f32.gmra.mxu2 %v697_v31  ;;  %v756_v31 = vand.u32 4294901760, %v755_v27  ;;  %v769_v37 = vsub.f32 %v640_v30, %v5181_v33 }
  0x37   : > { %1024 = vmatmul.f32.gmra.mxu3 %v698_v34  ;;  %v577_v34 = vld [vmem:[%s5102_s27 + $0x68] sm:$0xff] }
  0x3b   : > { %701 = vmatmul.f32.gmra.mxu0 %v700_v40  ;;  %v770_v40 = vand.u32 4294901760, %v769_v37 }
  0x3c   : > { %839 = vmatmul.f32.gmra.mxu1 %v5133_v35 }
  0x3d   : > { %927 = vmatmul.f32.gmra.mxu2 %v705_v38  ;;  %v643_v38 = vsel %vm602_vm1, %v577_v34, 0  ;;  %v771_v44 = vsub.f32 %v769_v37, %v770_v40 }
  0x3f   : > { %1030 = vmatmul.f32.gmra.mxu3 %v706_v41  ;;  %v5187_v41 = vand.u32 4294901760, %v643_v38 }
  0x43   : > { %709 = vmatmul.f32.gmra.mxu0 %v708_v47  ;;  %v772_v47 = vand.u32 4294901760, %v771_v44 }
  0x44   : > { %843 = vmatmul.f32.gmra.mxu1 %v5139_v42 }
  0x45   : > { %932 = vmatmul.f32.gmra.mxu2 %v713_v45  ;;  %v777_v45 = vsub.f32 %v643_v38, %v5187_v41 }
  0x47   : > { %1036 = vmatmul.f32.gmra.mxu3 %v714_v48  ;;  %v778_v48 = vand.u32 4294901760, %v777_v45 }
  0x4b   : > { %717 = vmatmul.f32.gmra.mxu0 %v716_v54  ;;  %v649_v54 = vsel %vm602_vm1, %v579_v51, 0 }
  0x4c   : > { %847 = vmatmul.f32.gmra.mxu1 %v5145_v49  ;;  %v5199_v58 = vand.u32 4294901760, %v649_v54 }
  0x4d   : > { %937 = vmatmul.f32.gmra.mxu2 %v721_v52  ;;  %v779_v52 = vsub.f32 %v777_v45, %v778_v48 }
  0x4e   : > { %v793_v60 = vsub.f32 %v649_v54, %v5199_v58 }
  0x4f   : > { %1042 = vmatmul.f32.gmra.mxu3 %v722_v55  ;;  %v780_v55 = vand.u32 4294901760, %v779_v52  ;;  %v599_v52 = vld [vmem:[%s5269_s14 + $0x18] sm:$0xff] }
  0x50   : > { %v1276_v54 = vsel %vm602_vm1, %v599_v52, 0 }
  0x53   : > { %725 = vmatmul.f32.gmra.mxu0 %v724_v61 }
  0x54   : > { %851 = vmatmul.f32.gmra.mxu1 %v5151_v56 }
  0x55   : > { %942 = vmatmul.f32.gmra.mxu2 %v729_v59  ;;  %v787_v59 = vsub.f32 %v785_v53, %v786_v57 }
  0x57   : > { %1048 = vmatmul.f32.gmra.mxu3 %v730_v62  ;;  %v788_v61 = vand.u32 4294901760, %v787_v59  ;;  %v794_v62 = vand.u32 4294901760, %v793_v60 }
  0x59   : > { %v795_v0 = vsub.f32 %v793_v60, %v794_v62 }
  0x5b   : > { %733 = vmatmul.f32.gmra.mxu0 %v732_v6  ;;  %v796_v1 = vand.u32 4294901760, %v795_v0 }
  0x5c   : > { %855 = vmatmul.f32.gmra.mxu1 %v5157_v63 }
  0x5d   : > { %947 = vmatmul.f32.gmra.mxu2 %v737_v3 }
  0x5f   : > { %1054 = vmatmul.f32.gmra.mxu3 %v738_v7 }
  0x63   : > { %741 = vmatmul.f32.gmra.mxu0 %v740_v15 }
  0x64   : > { %859 = vmatmul.f32.gmra.mxu1 %v5163_v8 }
  0x65   : > { %952 = vmatmul.f32.gmra.mxu2 %v745_v13 }
  0x67   : > { %1060 = vmatmul.f32.gmra.mxu3 %v746_v16 }
  0x6b   : > { %749 = vmatmul.f32.gmra.mxu0 %v748_v23 }
  0x6c   : > { %863 = vmatmul.f32.gmra.mxu1 %v5169_v17 }
  0x6d   : > { %957 = vmatmul.f32.gmra.mxu2 %v753_v21 }
  0x6f   : > { %1066 = vmatmul.f32.gmra.mxu3 %v754_v24 }
  0x73   : > { %757 = vmatmul.f32.gmra.mxu0 %v756_v31 }
  0x74   : > { %867 = vmatmul.f32.gmra.mxu1 %v5175_v25 }
  0x75   : > { %962 = vmatmul.f32.gmra.mxu2 %v761_v29  ;;  %v597_v29 = vld [vmem:[%s5269_s14 + $0x8] sm:$0xff] }
  0x76   : > { %v1270_v30 = vsel %vm602_vm1, %v597_v29, 0 }
  0x77   : > { %1072 = vmatmul.f32.gmra.mxu3 %v762_v32  ;;  %v5288_v32 = vand.u32 4294901760, %v1270_v30 }
  0x7b   : > { %765 = vmatmul.f32.gmra.mxu0 %v764_v39 }
  0x7c   : > { %871 = vmatmul.f32.gmra.mxu1 %v5181_v33 }
  0x7d   : > { %967 = vmatmul.f32.gmra.mxu2 %v769_v37 }
  0x7f   : > { %1078 = vmatmul.f32.gmra.mxu3 %v770_v40  ;;  %v598_v40 = vld [vmem:[%s5269_s14 + $0x10] sm:$0xff] }
  0x80   : > { %v1273_v43 = vsel %vm602_vm1, %v598_v40, 0 }
  0x83   : > { %773 = vmatmul.f32.gmra.mxu0 %v772_v47 }
  0x84   : > { %875 = vmatmul.f32.gmra.mxu1 %v5187_v41 }
  0x85   : > { %972 = vmatmul.f32.gmra.mxu2 %v777_v45  ;;  %v5303_v45 = vand.u32 4294901760, %v1273_v43 }
  0x87   : > { %1084 = vmatmul.f32.gmra.mxu3 %v778_v48  ;;  %v1312_v47 = vsub.f32 %v1273_v43, %v5303_v45 }
  0x8b   : > { %781 = vmatmul.f32.gmra.mxu0 %v780_v55 }
  0x8c   : > { %879 = vmatmul.f32.gmra.mxu1 %v5193_v50 }
  0x8d   : > { %977 = vmatmul.f32.gmra.mxu2 %v785_v53 }
  0x8f   : > { %1090 = vmatmul.f32.gmra.mxu3 %v786_v57  ;;  %v5315_v57 = vand.u32 4294901760, %v1276_v54 }
  0x93   : > { %789 = vmatmul.f32.gmra.mxu0 %v788_v61 }
  0x94   : > { %883 = vmatmul.f32.gmra.mxu1 %v5199_v58 }
  0x95   : > { %982 = vmatmul.f32.gmra.mxu2 %v793_v60  ;;  %v1320_v60 = vsub.f32 %v1276_v54, %v5315_v57 }
  0x97   : > { %1096 = vmatmul.f32.gmra.mxu3 %v794_v62 }
  0x99   : > { %v5204_v3 = vpop.f32.mrf.mxu1 }
  0x9b   : > { %797 = vmatmul.f32.gmra.mxu0 %v796_v1 }
  0x9c   : > { %1202 = vmatmul.f32.vlgmr.msrb.gmra.mxu1 %v5110_v11 }
  0xa0   : > { %v5207_v5 = vpop.f32.mrf.mxu0  ;;  %v5290_v34 = vpop.f32.mrf.mxu2 }
  0xa1   : > { %v5209_v6 = vpop.f32.mrf.mxu1 }
  0xa2   : > { %v1007_v38 = vpop.f32.mrf.mxu3 }
  0xa3   : > { %1120 = vmatmul.f32.vlgmr.msrb.gmra.mxu0 %v5110_v11 }
  0xa4   : > { %1206 = vmatmul.f32.gmra.mxu1 %v5112_v12 }
  0xa8   : > { %v5213_v7 = vpop.f32.mrf.mxu0 }
  0xa9   : > { %v5215_v9 = vpop.f32.mrf.mxu1 }
  0xaa   : > { %v1013_v53 = vpop.f32.mrf.mxu3 }
  0xab   : > { %1124 = vmatmul.f32.gmra.mxu0 %v5112_v12 }
  0xac   : > { %1210 = vmatmul.f32.gmra.mxu1 %v5120_v20 }
  0xb0   : > { %v5219_v10 = vpop.f32.mrf.mxu0 }
  0xb1   : > { %v5221_v13 = vpop.f32.mrf.mxu1 }
  0xb3   : > { %1128 = vmatmul.f32.gmra.mxu0 %v5120_v20 }
  0xb4   : > { %1214 = vmatmul.f32.gmra.mxu1 %v5127_v28 }
  0xb8   : > { %v5225_v11 = vpop.f32.mrf.mxu0 }
  0xb9   : > { %v5227_v14 = vpop.f32.mrf.mxu1 }
  0xbb   : > { %1132 = vmatmul.f32.gmra.mxu0 %v5127_v28 }
  0xbc   : > { %1218 = vmatmul.f32.gmra.mxu1 %v5133_v35 }
  0xc0   : > { %v5231_v12 = vpop.f32.mrf.mxu0 }
  0xc1   : > { %v5233_v15 = vpop.f32.mrf.mxu1 }
  0xc3   : > { %1136 = vmatmul.f32.gmra.mxu0 %v5133_v35 }
  0xc4   : > { %1222 = vmatmul.f32.gmra.mxu1 %v5139_v42 }
  0xc8   : > { %v5237_v20 = vpop.f32.mrf.mxu0 }
  0xc9   : > { %v5239_v16 = vpop.f32.mrf.mxu1 }
  0xcb   : > { %1140 = vmatmul.f32.gmra.mxu0 %v5139_v42 }
  0xcc   : > { %1226 = vmatmul.f32.gmra.mxu1 %v5145_v49 }
  0xd0   : > { %v5244_v28 = vpop.f32.mrf.mxu0 }
  0xd1   : > { %v5246_v18 = vpop.f32.mrf.mxu1 }
  0xd3   : > { %1144 = vmatmul.f32.gmra.mxu0 %v5145_v49 }
  0xd4   : > { %1230 = vmatmul.f32.gmra.mxu1 %v5151_v56 }
  0xd8   : > { %v5250_v35 = vpop.f32.mrf.mxu0 }
  0xd9   : > { %v5253_v19 = vpop.f32.mrf.mxu1 }
  0xdb   : > { %1148 = vmatmul.f32.gmra.mxu0 %v5151_v56  ;;  %v596_v56 = vld [vmem:[%s5269_s14] sm:$0xff]  ;;  %s6224_s14 = scalar_lea.vmem %s6533_s9, %s5095_s24 }
  0xdc   : > { %1234 = vmatmul.f32.gmra.mxu1 %v5157_v63  ;;  %v1267_v21 = vsel %vm602_vm1, %v596_v56, 0  ;;  %v1019_v56 = vpop.f32.mrf.mxu3 }
  0xdd   : > { %v5275_v22 = vand.u32 4294901760, %v1267_v21 }
  0xdf   : > { %v1296_v24 = vsub.f32 %v1267_v21, %v5275_v22  ;;  %1350 = vmatmul.f32.vlgmr.msrb.gmra.mxu3 %v5275_v22 }
  0xe0   : > { %v5260_v42 = vpop.f32.mrf.mxu0  ;;  %1499 = vmatpush.msrb.mxu3 %v5085_v2  ;;  %v1304_v2 = vsub.f32 %v1270_v30, %v5288_v32 }
  0xe1   : > { %v5262_v49 = vpop.f32.mrf.mxu1  ;;  %v1297_v27 = vand.u32 4294901760, %v1296_v24 }
  0xe2   : > { %v1305_v37 = vand.u32 4294901760, %v1304_v2 }
  0xe3   : > { %1152 = vmatmul.f32.gmra.mxu0 %v5157_v63  ;;  %v1298_v63 = vsub.f32 %v1296_v24, %v1297_v27 }
  0xe4   : > { %1238 = vmatmul.f32.gmra.mxu1 %v5163_v8  ;;  %v1306_v39 = vsub.f32 %v1304_v2, %v1305_v37 }
  0xe5   : > { %v1299_v31 = vand.u32 4294901760, %v1298_v63 }
  0xe6   : > { %v1307_v44 = vand.u32 4294901760, %v1306_v39 }
  0xe7   : > { %1300 = vmatmul.f32.vlgmr.msrb.gmra.mxu2 %v1299_v31  ;;  %1354 = vmatmul.f32.gmra.mxu3 %v5288_v32 }
  0xe8   : > { %v5277_v23 = vpop.f32.mrf.mxu0  ;;  %1465 = vmatpush.msrb.mxu2 %v5093_v4  ;;  %v913_v4 = vpop.f32.mrf.mxu2 }
  0xe9   : > { %v5281_v26 = vpop.f32.mrf.mxu1 }
  0xeb   : > { %1156 = vmatmul.f32.gmra.mxu0 %v5163_v8 }
  0xec   : > { %1242 = vmatmul.f32.gmra.mxu1 %v5169_v17 }
  0xef   : > { %1308 = vmatmul.f32.gmra.mxu2 %v1307_v44  ;;  %1358 = vmatmul.f32.gmra.mxu3 %v5303_v45 }
  0xf0   : > { %v5292_v36 = vpop.f32.mrf.mxu0  ;;  %v918_v62 = vpop.f32.mrf.mxu2 }
  0xf1   : > { %v5296_v8 = vpop.f32.mrf.mxu1 }
  0xf3   : > { %1160 = vmatmul.f32.gmra.mxu0 %v5169_v17  ;;  %v1313_v17 = vand.u32 4294901760, %v1312_v47 }
  0xf4   : > { %1246 = vmatmul.f32.gmra.mxu1 %v5175_v25 }
  0xf5   : > { %v1314_v51 = vsub.f32 %v1312_v47, %v1313_v17 }
  0xf7   : > { %v1315_v55 = vand.u32 4294901760, %v1314_v51  ;;  %1362 = vmatmul.f32.gmra.mxu3 %v5315_v57 }
  0xf8   : > { %v5305_v46 = vpop.f32.mrf.mxu0  ;;  %v923_v29 = vpop.f32.mrf.mxu2 }
  0xf9   : > { %v5309_v48 = vpop.f32.mrf.mxu1  ;;  %1316 = vmatmul.f32.gmra.mxu2 %v1315_v55 }
  0xfb   : > { %1164 = vmatmul.f32.gmra.mxu0 %v5175_v25  ;;  %v1321_v25 = vand.u32 4294901760, %v1320_v60 }
  0xfc   : > { %1250 = vmatmul.f32.gmra.mxu1 %v5181_v33 }
  0xfd   : > { %v1322_v0 = vsub.f32 %v1320_v60, %v1321_v25 }
  0xff   : > { %v1323_v1 = vand.u32 4294901760, %v1322_v0  ;;  %1425 = vmatmul.f32.vlgmr.msra.gmra.mxu3 %v1297_v27  ;;  %v825_v27 = vadd.f32 %v5204_v3, %v5207_v5 }
 0x100   : > { %v5317_v59 = vpop.f32.mrf.mxu0  ;;  %v928_v39 = vpop.f32.mrf.mxu2 }
 0x101   : > { %v5321_v61 = vpop.f32.mrf.mxu1  ;;  %1324 = vmatmul.f32.gmra.mxu2 %v1323_v1  ;;  %v909_v43 = vadd.f32 %v5290_v34, %v825_v27  ;;  %v833_v34 = vadd.f32 %v5215_v9, %v5219_v10 }
 0x103   : > { %1168 = vmatmul.f32.gmra.mxu0 %v5181_v33  ;;  %v1025_v33 = vpop.f32.mrf.mxu3 }
 0x104   : > { %1254 = vmatmul.f32.gmra.mxu1 %v5187_v41 }
 0x107   : > { %1431 = vmatmul.f32.gmra.mxu3 %v1305_v37  ;;  %v1008_v37 = vadd.f32 %v1007_v38, %v909_v43 }
 0x108   : > { %v5325_v21 = vpop.f32.mrf.mxu0  ;;  %v933_v51 = vpop.f32.mrf.mxu2 }
 0x109   : > { %v5327_v63 = vpop.f32.mrf.mxu1  ;;  %1386 = vmatmul.f32.vlgmr.msra.gmra.mxu2 %v1296_v24 }
 0x10b   : > { %1172 = vmatmul.f32.gmra.mxu0 %v5187_v41  ;;  %v1031_v24 = vpop.f32.mrf.mxu3 }
 0x10c   : > { %1258 = vmatmul.f32.gmra.mxu1 %v5193_v50 }
 0x10f   : > { %1437 = vmatmul.f32.gmra.mxu3 %v1313_v17 }
 0x110   : > { %v5331_v30 = vpop.f32.mrf.mxu0  ;;  %v938_v38 = vpop.f32.mrf.mxu2 }
 0x111   : > { %v5333_v31 = vpop.f32.mrf.mxu1  ;;  %1391 = vmatmul.f32.gmra.mxu2 %v1304_v2 }
 0x112   : > { %6534 = vst [vmem:[#allocation5_spill] sm:$0xff] %v5333_v31 }
 0x113   : > { %1176 = vmatmul.f32.gmra.mxu0 %v5193_v50  ;;  %v829_v50 = vadd.f32 %v5209_v6, %v5213_v7  ;;  %v1037_v2 = vpop.f32.mrf.mxu3  ;;  %v919_v7 = vadd.f32 %v918_v62, %v833_v34 }
 0x114   : > { %1262 = vmatmul.f32.gmra.mxu1 %v5199_v58 }
 0x115   : > { %v914_v52 = vadd.f32 %v913_v4, %v829_v50  ;;  %v837_v4 = vadd.f32 %v5221_v13, %v5225_v11 }
 0x117   : > { %1443 = vmatmul.f32.gmra.mxu3 %v1321_v25  ;;  %v1014_v17 = vadd.f32 %v1013_v53, %v914_v52  ;;  %v1020_v25 = vadd.f32 %v1019_v56, %v919_v7  ;;  %v924_v53 = vadd.f32 %v923_v29, %v837_v4  ;;  %v845_v29 = vadd.f32 %v5233_v15, %v5237_v20 }
 0x118   : > { %v5339_v40 = vpop.f32.mrf.mxu0  ;;  %v943_v27 = vpop.f32.mrf.mxu2 }
 0x119   : > { %6535 = vst [vmem:[#allocation6_spill] sm:$0xff] %v5339_v40  ;;  %v1203_v41 = vpop.f32.mrf.mxu1  ;;  %1396 = vmatmul.f32.gmra.mxu2 %v1312_v47  ;;  %v1026_v62 = vadd.f32 %v1025_v33, %v924_v53 }
 0x11b   : > { %1180 = vmatmul.f32.gmra.mxu0 %v5199_v58  ;;  %v1043_v0 = vpop.f32.mrf.mxu3 }
 0x11f   : > { %1501 = vmatmul.f32.vlgmr.msrb.gmra.mxu3 %v5275_v22 }
 0x120   : > { %v1121_v44 = vpop.f32.mrf.mxu0 }
 0x121   : > { %v1122_v3 = vadd.f32 %v1121_v44, %v1008_v37  ;;  %v1207_v5 = vpop.f32.mrf.mxu1  ;;  %1401 = vmatmul.f32.gmra.mxu2 %v1320_v60  ;;  %v5358_v44 = vpop.f32.mrf.mxu2 }
 0x123   : > { %v1204_v54 = vadd.f32 %v1203_v41, %v1122_v3  ;;  %v841_v41 = vadd.f32 %v5227_v14, %v5231_v12  ;;  %v1049_v13 = vpop.f32.mrf.mxu3  ;;  %v934_v12 = vadd.f32 %v933_v51, %v845_v29 }
 0x125   : > { %1517 = vxpose.xlu0.b32.start [1/2] (short) (narrow) %v1204_v54, 16  ;;  %v929_v43 = vadd.f32 %v928_v39, %v841_v41  ;;  %v1038_v39 = vadd.f32 %v1037_v2, %v934_v12 }
 0x127   : > { %1505 = vmatmul.f32.gmra.mxu3 %v5288_v32  ;;  %v1032_v50 = vadd.f32 %v1031_v24, %v929_v43  ;;  %v849_v24 = vadd.f32 %v5239_v16, %v5244_v28 }
 0x128   : > { %v1125_v55 = vpop.f32.mrf.mxu0 }
 0x129   : > { %v1126_v58 = vadd.f32 %v1125_v55, %v1014_v17  ;;  %v1211_v6 = vpop.f32.mrf.mxu1  ;;  %1467 = vmatmul.f32.vlgmr.msrb.gmra.mxu2 %v5275_v22  ;;  %v5367_v15 = vpop.f32.mrf.mxu2  ;;  %v853_v55 = vadd.f32 %v5246_v18, %v5250_v35 }
 0x12b   : > { %v1208_v47 = vadd.f32 %v1207_v5, %v1126_v58 }
 0x12d   : > { %1518 = vxpose.xlu0.b32.end [2/2] (short) (narrow) %v1208_v47, 16 }
 0x12f   : > { %1509 = vmatmul.f32.gmra.mxu3 %v5303_v45 }
 0x130   : > { %v1129_v1 = vpop.f32.mrf.mxu0 }
 0x131   : > { %v1130_v9 = vadd.f32 %v1129_v1, %v1020_v25  ;;  %v1215_v10 = vpop.f32.mrf.mxu1  ;;  %1471 = vmatmul.f32.gmra.mxu2 %v5288_v32  ;;  %v5362_v32 = vpop.f32.mrf.mxu3 }
 0x132   : > { %v5373_v16 = vpop.f32.mrf.mxu2 }
 0x133   : > { %v1212_v60 = vadd.f32 %v1211_v6, %v1130_v9  ;;  %v944_v6 = vadd.f32 %v943_v27, %v853_v55 }
 0x135   : > { %1549 = vxpose.xlu1.b32.start [1/2] (short) (narrow) %v1212_v60, 16 }
 0x137   : > { %1513 = vmatmul.f32.gmra.mxu3 %v5315_v57 }
 0x138   : > { %v1133_v56 = vpop.f32.mrf.mxu0 }
 0x139   : > { %v1134_v11 = vadd.f32 %v1133_v56, %v1026_v62  ;;  %v1219_v22 = vpop.f32.mrf.mxu1  ;;  %1475 = vmatmul.f32.gmra.mxu2 %v5303_v45  ;;  %v939_v45 = vadd.f32 %v938_v38, %v849_v24  ;;  %v5369_v17 = vpop.f32.mrf.mxu3 }
 0x13a   : > { %v5377_v1 = vpop.f32.mrf.mxu2 }
 0x13b   : > { %v1216_v37 = vadd.f32 %v1215_v10, %v1134_v11  ;;  %v1044_v34 = vadd.f32 %v1043_v0, %v939_v45 }
 0x13d   : > { %1550 = vxpose.xlu1.b32.end [2/2] (short) (narrow) %v1216_v37, 16 }
 0x140   : > { %v1137_v33 = vpop.f32.mrf.mxu0 }
 0x141   : > { %v1138_v14 = vadd.f32 %v1137_v33, %v1032_v50  ;;  %v1223_v5 = vpop.f32.mrf.mxu1  ;;  %1479 = vmatmul.f32.gmra.mxu2 %v5315_v57  ;;  %v1050_v57 = vadd.f32 %v1049_v13, %v944_v6  ;;  %v5375_v7 = vpop.f32.mrf.mxu3 }
 0x142   : > { %v5381_v18 = vpop.f32.mrf.mxu2 }
 0x143   : > { %v1220_v3 = vadd.f32 %v1219_v22, %v1138_v14 }
 0x145   : > { %1581 = vxpose.xlu2.b32.start [1/2] (short) (narrow) %v1220_v3, 16 }
 0x148   : > { %v1141_v52 = vpop.f32.mrf.mxu0 }
 0x149   : > { %v1142_v20 = vadd.f32 %v1141_v52, %v1038_v39  ;;  %v1227_v51 = vpop.f32.mrf.mxu1  ;;  %v5379_v0 = vpop.f32.mrf.mxu3 }
 0x14a   : > { %v5385_v9 = vpop.f32.mrf.mxu2 }
 0x14b   : > { %v1224_v54 = vadd.f32 %v1223_v5, %v1142_v20 }
 0x14d   : > { %1582 = vxpose.xlu2.b32.end [2/2] (short) (narrow) %v1224_v54, 16 }
 0x150   : > { %v1145_v2 = vpop.f32.mrf.mxu0 }
 0x151   : > { %v1146_v58 = vadd.f32 %v1145_v2, %v1044_v34  ;;  %v1231_v47 = vpop.f32.mrf.mxu1  ;;  %v5383_v35 = vpop.f32.mrf.mxu3 }
 0x152   : > { %v5389_v53 = vpop.f32.mrf.mxu2 }
 0x153   : > { %v1228_v28 = vadd.f32 %v1227_v51, %v1146_v58 }
 0x155   : > { %1613 = vxpose.xlu0.b32.start [1/2] (short) (narrow) %v1228_v28, 16 }
 0x158   : > { %v1149_v38 = vpop.f32.mrf.mxu0 }
 0x159   : > { %v1150_v25 = vadd.f32 %v1149_v38, %v1050_v57  ;;  %v5387_v10 = vpop.f32.mrf.mxu3  ;;  %v1235_v51 = vpop.f32.mrf.mxu1 }
 0x15a   : > { %v5393_v27 = vpop.f32.mrf.mxu2 }
 0x15b   : > { %v1232_v4 = vadd.f32 %v1231_v47, %v1150_v25  ;;  %6537 = vst [vmem:[#allocation8_spill] sm:$0xff] %v5393_v27 }
 0x15d   : > { %1614 = vxpose.xlu0.b32.end [2/2] (short) (narrow) %v1232_v4, 16 }
 0x160   : > { %v1153_v45 = vpop.f32.mrf.mxu0 }
 0x161   : > { %v5391_v60 = vpop.f32.mrf.mxu3  ;;  %v5400_v6 = vpop.f32.mrf.mxu1 }
 0x162   : > { %6536 = vst [vmem:[#allocation7_spill] sm:$0xff] %v5391_v60 }
 0x168   : > { %v1157_v2 = vpop.f32.mrf.mxu0 }
 0x169   : > { %v5395_v62 = vpop.f32.mrf.mxu3  ;;  %v5404_v27 = vpop.f32.mrf.mxu1 }
 0x16a   : > { %6538 = vst [vmem:[#allocation9_spill] sm:$0xff] %v5395_v62  ;;  %v1301_v41 = vpop.f32.mrf.mxu2  ;;  %v857_v62 = vadd.f32 %v5253_v19, %v5260_v42 }
 0x170   : > { %v1161_v25 = vpop.f32.mrf.mxu0 }
 0x171   : > { %v1351_v56 = vpop.f32.mrf.mxu3 }
 0x172   : > { %v1309_v13 = vpop.f32.mrf.mxu2  ;;  %v1352_v58 = vadd.f32 %v1351_v56, %v1301_v41  ;;  %v949_v56 = vadd.f32 %v5358_v44, %v857_v62  ;;  %v865_v62 = vadd.f32 %v5281_v26, %v5292_v36 }
 0x174   : > { %v1056_v42 = vadd.f32 %v5362_v32, %v949_v56 }
 0x178   : > { %v1165_v44 = vpop.f32.mrf.mxu0 }
 0x179   : > { %v1355_v11 = vpop.f32.mrf.mxu3 }
 0x17a   : > { %v1356_v4 = vadd.f32 %v1355_v11, %v1309_v13 }
 0x17c   : > { %v1317_v22 = vpop.f32.mrf.mxu2 }
 0x181   : > { %v1359_v43 = vpop.f32.mrf.mxu3 }
 0x182   : > { %v1360_v57 = vadd.f32 %v1359_v43, %v1317_v22  ;;  %v4990_v43 = vmov 0.0  }
 0x183   : > { %525 = vst.msk [vmem:[#allocation2 + $0x10] sm:$0xff] %vm522_vm2, %v4990_v43 }
 0x184   : > { %v1325_v37 = vpop.f32.mrf.mxu2  ;;  %546 = vst.msk [vmem:[#allocation2 + $0x10] sm:$0xff] %vm543_vm3, %v4990_v43 }
 0x185   : > { %523 = vst.msk [vmem:[#allocation2] sm:$0xff] %vm522_vm2, %v4990_v43 }
 0x186   : > { %527 = vst.msk [vmem:[#allocation2 + $0x20] sm:$0xff] %vm522_vm2, %v4990_v43 }
 0x187   : > { %528 = vst.msk [vmem:[#allocation2 + $0x28] sm:$0xff] %vm522_vm2, %v4990_v43 }
 0x188   : > { %529 = vst.msk [vmem:[#allocation2 + $0x30] sm:$0xff] %vm522_vm2, %v4990_v43 }
 0x189   : > { %v1363_v50 = vpop.f32.mrf.mxu3  ;;  %530 = vst.msk [vmem:[#allocation2 + $0x38] sm:$0xff] %vm522_vm2, %v4990_v43 }
 0x18a   : > { %v1364_v31 = vadd.f32 %v1363_v50, %v1325_v37  ;;  %v861_v37 = vadd.f32 %v5262_v49, %v5277_v23  ;;  %v959_v49 = vadd.f32 %v5373_v16, %v865_v62  ;;  %v873_v23 = vadd.f32 %v5309_v48, %v5317_v59  ;;  %531 = vst.msk [vmem:[#allocation2 + $0x40] sm:$0xff] %vm522_vm2, %v4990_v43 }
 0x18b   : > { %532 = vst.msk [vmem:[#allocation2 + $0x48] sm:$0xff] %vm522_vm2, %v4990_v43  ;;  %v869_v59 = vadd.f32 %v5296_v8, %v5305_v46 }
 0x18c   : > { %v1387_v29 = vpop.f32.mrf.mxu2  ;;  %v954_v32 = vadd.f32 %v5367_v15, %v861_v37  ;;  %v1068_v48 = vadd.f32 %v5375_v7, %v959_v49  ;;  %v969_v16 = vadd.f32 %v5381_v18, %v873_v23  ;;  %533 = vst.msk [vmem:[#allocation2 + $0x50] sm:$0xff] %vm522_vm2, %v4990_v43  ;;  %v877_v7 = vadd.f32 %v5321_v61, %v5325_v21  ;;  %v584_v23 = vld [vmem:[%s5502_s21 + $0x20] sm:$0xff] }
 0x18d   : > { %v1388_v38 = vadd.f32 %v1387_v29, %v1352_v58  ;;  %534 = vst.msk [vmem:[#allocation2 + $0x58] sm:$0xff] %vm522_vm2, %v4990_v43  ;;  %v964_v8 = vadd.f32 %v5377_v1, %v869_v59 }
 0x18e   : > { %535 = vst.msk [vmem:[#allocation2 + $0x60] sm:$0xff] %vm522_vm2, %v4990_v43  ;;  %v1080_v46 = vadd.f32 %v5383_v35, %v969_v16  ;;  %v974_v21 = vadd.f32 %v5385_v9, %v877_v7 }
 0x18f   : > { %536 = vst.msk [vmem:[#allocation2 + $0x68] sm:$0xff] %vm522_vm2, %v4990_v43  ;;  %v1074_v61 = vadd.f32 %v5379_v0, %v964_v8 }
 0x190   : > { %537 = vst.msk [vmem:[#allocation2 + $0x70] sm:$0xff] %vm522_vm2, %v4990_v43 }
 0x191   : > { %v1426_v33 = vpop.f32.mrf.mxu3  ;;  %538 = vst.msk [vmem:[#allocation2 + $0x78] sm:$0xff] %vm522_vm2, %v4990_v43  ;;  %v1166_v1 = vadd.f32 %v1165_v44, %v1074_v61 }
 0x192   : > { %539 = vst.msk [vmem:[#allocation2 + $0x80] sm:$0xff] %vm522_vm2, %v4990_v43 }
 0x193   : > { %540 = vst.msk [vmem:[#allocation2 + $0x88] sm:$0xff] %vm522_vm2, %v4990_v43 }
 0x194   : > { %v1392_v14 = vpop.f32.mrf.mxu2  ;;  %541 = vst.msk [vmem:[#allocation2 + $0x90] sm:$0xff] %vm522_vm2, %v4990_v43 }
 0x195   : > { %v1393_v40 = vadd.f32 %v1392_v14, %v1356_v4  ;;  %542 = vst.msk [vmem:[#allocation2 + $0x98] sm:$0xff] %vm522_vm2, %v4990_v43 }
 0x196   : > { %544 = vst.msk [vmem:[#allocation2] sm:$0xff] %vm543_vm3, %v4990_v43 }
 0x197   : > { %548 = vst.msk [vmem:[#allocation2 + $0x20] sm:$0xff] %vm543_vm3, %v4990_v43 }
 0x198   : > { %549 = vst.msk [vmem:[#allocation2 + $0x28] sm:$0xff] %vm543_vm3, %v4990_v43 }
 0x199   : > { %v1432_v12 = vpop.f32.mrf.mxu3  ;;  %550 = vst.msk [vmem:[#allocation2 + $0x30] sm:$0xff] %vm543_vm3, %v4990_v43 }
 0x19a   : > { %v1433_v13 = vadd.f32 %v1432_v12, %v1393_v40  ;;  %v1154_v40 = vadd.f32 %v1153_v45, %v1056_v42  ;;  %v1062_v12 = vadd.f32 %v5369_v17, %v954_v32  ;;  %v1162_v17 = vadd.f32 %v1161_v25, %v1068_v48  ;;  %551 = vst.msk [vmem:[#allocation2 + $0x38] sm:$0xff] %vm543_vm3, %v4990_v43 }
 0x19b   : > { %552 = vst.msk [vmem:[#allocation2 + $0x40] sm:$0xff] %vm543_vm3, %v4990_v43 }
 0x19c   : > { %v1397_v3 = vpop.f32.mrf.mxu2  ;;  %v1236_v26 = vadd.f32 %v1235_v51, %v1154_v40  ;;  %553 = vst.msk [vmem:[#allocation2 + $0x48] sm:$0xff] %vm543_vm3, %v4990_v43  ;;  %v583_v40 = vld [vmem:[%s5502_s21 + $0x18] sm:$0xff] }
 0x19d   : > { %554 = vst.msk [vmem:[#allocation2 + $0x50] sm:$0xff] %vm543_vm3, %v4990_v43 }
 0x19e   : > { %555 = vst.msk [vmem:[#allocation2 + $0x58] sm:$0xff] %vm543_vm3, %v4990_v43 }
 0x19f   : > { %556 = vst.msk [vmem:[#allocation2 + $0x60] sm:$0xff] %vm543_vm3, %v4990_v43 }
 0x1a0   : > { %557 = vst.msk [vmem:[#allocation2 + $0x68] sm:$0xff] %vm543_vm3, %v4990_v43 }
 0x1a1   : > { %v1438_v39 = vpop.f32.mrf.mxu3  ;;  %558 = vst.msk [vmem:[#allocation2 + $0x70] sm:$0xff] %vm543_vm3, %v4990_v43 }
 0x1a2   : > { %559 = vst.msk [vmem:[#allocation2 + $0x78] sm:$0xff] %vm543_vm3, %v4990_v43 }
 0x1a3   : > { %560 = vst.msk [vmem:[#allocation2 + $0x80] sm:$0xff] %vm543_vm3, %v4990_v43 }
 0x1a4   : > { %v1402_v52 = vpop.f32.mrf.mxu2  ;;  %561 = vst.msk [vmem:[#allocation2 + $0x88] sm:$0xff] %vm543_vm3, %v4990_v43 }
 0x1a5   : > { %v1403_v11 = vadd.f32 %v1402_v52, %v1364_v31  ;;  %v1169_v52 = vpop.f32.mrf.mxu0  ;;  %562 = vst.msk [vmem:[#allocation2 + $0x90] sm:$0xff] %vm543_vm3, %v4990_v43 }
 0x1a6   : > { %v1170_v51 = vadd.f32 %v1169_v52, %v1080_v46  ;;  %563 = vst.msk [vmem:[#allocation2 + $0x98] sm:$0xff] %vm543_vm3, %v4990_v43  ;;  %v585_v46 = vld [vmem:[%s5502_s21 + $0x28] sm:$0xff] }
 0x1a7   : > { %v2301_v7 = vsel %vm2284_vm4, %v585_v46, 0 }
 0x1a9   : > { %v1444_v20 = vpop.f32.mrf.mxu3 }
 0x1aa   : > { %v1445_v31 = vadd.f32 %v1444_v20, %v1403_v11 }
 0x1ac   : > { %v1468_v34 = vpop.f32.mrf.mxu2 }
 0x1b1   : > { %v1502_v55 = vpop.f32.mrf.mxu3 }
 0x1b4   : > { %v1472_v28 = vpop.f32.mrf.mxu2 }
 0x1b5   : > { %v1473_v50 = vadd.f32 %v1472_v28, %v1433_v13  ;;  %v580_v28 = vld [vmem:[%s5502_s21] sm:$0xff] }
 0x1b9   : > { %v1506_v47 = vpop.f32.mrf.mxu3 }
 0x1ba   : > { %v1507_v36 = vadd.f32 %v1506_v47, %v1473_v50  ;;  %v2286_v47 = vsel %vm2284_vm4, %v580_v28, 0 }
 0x1bb   : > { %v5519_v4 = vand.u32 4294901760, %v2286_v47 }
 0x1c1   : > { %v1510_v22 = vpop.f32.mrf.mxu3 }
 0x1c9   : > { %v1533_v5 = vpop.trf.xlu0 }
 0x1ca   : > { %1853 = vrot.lane.b32.xlu1 %v1533_v5, %s4989_s18  ;;  %v1427_v5 = vadd.f32 %v1426_v33, %v1388_v38  ;;  %v1247_v33 = vpop.f32.mrf.mxu1 }
 0x1cb   : > { %v1248_v0 = vadd.f32 %v1247_v33, %v1166_v1 }
 0x1cc   : > { %v1469_v41 = vadd.f32 %v1468_v34, %v1427_v5  ;;  %v1244_v34 = vadd.f32 %v5404_v27, %v1162_v17  ;;  %v1173_v27 = vpop.f32.mrf.mxu0 }
 0x1ce   : > { %v1503_v29 = vadd.f32 %v1502_v55, %v1469_v41  ;;  %v1086_v55 = vadd.f32 %v5387_v10, %v974_v21  ;;  %v2351_v41 = vsub.f32 %v2286_v47, %v5519_v4  ;;  %v586_v21 = vld [vmem:[%s5502_s21 + $0x30] sm:$0xff] }
 0x1cf   : > { %v2304_v1 = vsel %vm2284_vm4, %v586_v21, 0  ;;  %v594_v21 = vld [vmem:[%s5502_s21 + $0x70] sm:$0xff] }
 0x1d0   : > { %v1174_v9 = vadd.f32 %v1173_v27, %v1086_v55  ;;  %v2352_v11 = vand.u32 4294901760, %v2351_v41 }
 0x1d1   : > { %v1534_v24 = vpop.trf.xlu0 }
 0x1d2   : > { %1855 = vrot.lane.b32.xlu2 %v1534_v24, %s4989_s18  ;;  %v1398_v24 = vadd.f32 %v1397_v3, %v1360_v57  ;;  %v1514_v3 = vpop.f32.mrf.mxu3  ;;  %v1251_v45 = vpop.f32.mrf.mxu1  ;;  %v581_v57 = vld [vmem:[%s5502_s21 + $0x8] sm:$0xff] }
 0x1d3   : > { %v1252_v35 = vadd.f32 %v1251_v45, %v1170_v51  ;;  %v2289_v25 = vsel %vm2284_vm4, %v581_v57, 0 }
 0x1d4   : > { %v1439_v60 = vadd.f32 %v1438_v39, %v1398_v24  ;;  %v1158_v39 = vadd.f32 %v1157_v2, %v1062_v12  ;;  %v5521_v5 = vand.u32 4294901760, %v2289_v25  ;;  %v582_v24 = vld [vmem:[%s5502_s21 + $0x10] sm:$0xff]  ;;  %v2298_v12 = vsel %vm2284_vm4, %v584_v23, 0  ;;  %v592_v23 = vld [vmem:[%s5502_s21 + $0x60] sm:$0xff] }
 0x1d5   : > { %v2292_v13 = vsel %vm2284_vm4, %v582_v24, 0  ;;  %v5551_v59 = vand.u32 4294901760, %v2298_v12 }
 0x1d6   : > { %v1240_v18 = vadd.f32 %v5400_v6, %v1158_v39  ;;  %v2282_v6 = vld [vmem:[%s6529_s5] sm:$0xff]  ;;  %v2359_v56 = vsub.f32 %v2289_v25, %v5521_v5  ;;  %v5537_v37 = vand.u32 4294901760, %v2292_v13 }
 0x1d7   : > { %v5515_v38 = vand.u32 4294901760, %v2282_v6  ;;  %v2383_v39 = vsub.f32 %v2298_v12, %v5551_v59  ;;  %v2322_v12 = vsel %vm2284_vm4, %v592_v23, 0 }
 0x1d8   : > { %v2360_v42 = vand.u32 4294901760, %v2359_v56  ;;  %v2367_v50 = vsub.f32 %v2292_v13, %v5537_v37 }
 0x1d9   : > { %v1565_v54 = vpop.trf.xlu1  ;;  %2349 = vmatpush.msra.mxu2 %v5515_v38  ;;  %2680 = vmatpush.msra.mxu1 %v5515_v38 }
 0x1da   : > { %1857 = vrot.lane.b32.xlu0 %v1565_v54, %s4989_s18  ;;  %v1476_v54 = vpop.f32.mrf.mxu2  ;;  %v1255_v2 = vpop.f32.mrf.mxu1  ;;  %2684 = vmatmul.f32.vlgmr.msra.gmra.mxu1 %v2352_v11 }
 0x1db   : > { %v1477_v19 = vadd.f32 %v1476_v54, %v1439_v60  ;;  %v1256_v10 = vadd.f32 %v1255_v2, %v1174_v9  ;;  %v2495_v54 = vsub.f32 %v2282_v6, %v5515_v38 }
 0x1dd   : > { %v1511_v60 = vadd.f32 %v1510_v22, %v1477_v19  ;;  %v5531_v43 = vand.u32 4294901760, %v2495_v54  ;;  %2582 = vmatpush.msra.mxu0 %v2495_v54  ;;  %v2353_v19 = vsub.f32 %v2351_v41, %v2352_v11 }
 0x1de   : > { %v5492_v58 = vpop.trf.xlu2  ;;  %2585 = vmatmul.f32.vlgmr.msra.gmra.mxu0 %v2351_v41  ;;  %v588_v41 = vld [vmem:[%s5502_s21 + $0x40] sm:$0xff] }
 0x1df   : > { %2796 = vmatpush.msrb.mxu2 %v5531_v43  ;;  %2972 = vmatpush.msrb.mxu0 %v5515_v38  ;;  %v2354_v62 = vand.u32 4294901760, %v2353_v19 }
 0x1e1   : > { %3061 = vmatpush.msra.mxu0 %v2495_v54  ;;  %2355 = vmatmul.f32.vlgmr.msra.gmra.mxu2 %v2354_v62 }
 0x1e2   : > { %v1480_v14 = vpop.f32.mrf.mxu2  ;;  %2690 = vmatmul.f32.gmra.mxu1 %v2360_v42 }
 0x1e3   : > { %v1481_v15 = vadd.f32 %v1480_v14, %v1445_v31  ;;  %v2361_v31 = vsub.f32 %v2359_v56, %v2360_v42  ;;  %v2368_v14 = vand.u32 4294901760, %v2367_v50 }
 0x1e5   : > { %v1515_v20 = vadd.f32 %v1514_v3, %v1481_v15  ;;  %v2362_v33 = vand.u32 4294901760, %v2361_v31  ;;  %v1566_v15 = vpop.trf.xlu1 }
 0x1e6   : > { %v5529_v22 = vpop.trf.xlu2  ;;  %2590 = vmatmul.f32.gmra.mxu0 %v2359_v56  ;;  %v2310_v56 = vsel %vm2284_vm4, %v588_v41, 0 }
 0x1e7   : > { %v5584_v13 = vand.u32 4294901760, %v2310_v56 }
 0x1e9   : > { %2363 = vmatmul.f32.gmra.mxu2 %v2362_v33  ;;  %v2415_v11 = vsub.f32 %v2310_v56, %v5584_v13 }
 0x1ea   : > { %2696 = vmatmul.f32.gmra.mxu1 %v2368_v14 }
 0x1ee   : > { %2595 = vmatmul.f32.gmra.mxu0 %v2367_v50 }
 0x1f8   : > { %1773 = vxpose.xlu2.b32.start [1/2] (short) (narrow) %v1503_v29, 16  ;;  %v2497_v29 = vsub.f32 %v2495_v54, %v5531_v43 }
 0x1f9   : > { %v1629_v54 = vpop.trf.xlu0 }
 0x1fa   : > { %v2498_v44 = vand.u32 4294901760, %v2497_v29  ;;  %v2416_v29 = vand.u32 4294901760, %v2415_v11 }
 0x1fc   : > { %1805 = vxpose.xlu0.b32.start [1/2] (short) (narrow) %v1511_v60, 16  ;;  %2499 = vmatpush.msra.mxu3 %v2498_v44  ;;  %v2295_v60 = vsel %vm2284_vm4, %v583_v40, 0  ;;  %v2417_v19 = vsub.f32 %v2415_v11, %v2416_v29 }
 0x1fd   : > { %3026 = vmatpush.msrb.mxu1 %v2498_v44  ;;  %2501 = vmatmul.f32.vlgmr.msra.gmra.mxu3 %v5519_v4  ;;  %v5545_v49 = vand.u32 4294901760, %v2295_v60 }
 0x1fe   : > { %2878 = vmatpush.msrb.mxu3 %v5515_v38 }
 0x1ff   : > { %1645 = vxpose.xlu1.b32.start [1/2] (short) (narrow) %v1236_v26, 16  ;;  %3099 = vmatpush.msra.mxu1 %v5515_v38  ;;  %v2369_v26 = vsub.f32 %v2367_v50, %v2368_v14  ;;  %v590_v50 = vld [vmem:[%s5502_s21 + $0x50] sm:$0xff]  ;;  %v591_v14 = vld [vmem:[%s5502_s21 + $0x58] sm:$0xff] }
 0x200   : > { %1774 = vxpose.xlu2.b32.end [2/2] (short) (narrow) %v1507_v36, 16  ;;  %v2375_v36 = vsub.f32 %v2295_v60, %v5545_v49  ;;  %v2316_v60 = vsel %vm2284_vm4, %v590_v50, 0 }
 0x201   : > { %v2370_v3 = vand.u32 4294901760, %v2369_v26  ;;  %v5596_v33 = vand.u32 4294901760, %v2316_v60  ;;  %v2319_v26 = vsel %vm2284_vm4, %v591_v14, 0 }
 0x202   : > { %v2376_v48 = vand.u32 4294901760, %v2375_v36  ;;  %2600 = vmatmul.f32.gmra.mxu0 %v2375_v36 }
 0x203   : > { %2371 = vmatmul.f32.gmra.mxu2 %v2370_v3 }
 0x204   : > { %1806 = vxpose.xlu0.b32.end [2/2] (short) (narrow) %v1515_v20, 16  ;;  %v2377_v16 = vsub.f32 %v2375_v36, %v2376_v48  ;;  %v2384_v20 = vand.u32 4294901760, %v2383_v39  ;;  %2702 = vmatmul.f32.gmra.mxu1 %v2376_v48  ;;  %v2431_v36 = vsub.f32 %v2316_v60, %v5596_v33 }
 0x205   : > { %2505 = vmatmul.f32.gmra.mxu3 %v5521_v5 }
 0x206   : > { %v2378_v17 = vand.u32 4294901760, %v2377_v16  ;;  %v2385_v8 = vsub.f32 %v2383_v39, %v2384_v20  ;;  %v2432_v3 = vand.u32 4294901760, %v2431_v36 }
 0x207   : > { %1646 = vxpose.xlu1.b32.end [2/2] (short) (narrow) %v1240_v18, 16  ;;  %v5559_v18 = vand.u32 4294901760, %v2301_v7 }
 0x208   : > { %1677 = vxpose.xlu2.b32.start [1/2] (short) (narrow) %v1244_v34, 16  ;;  %v2386_v45 = vand.u32 4294901760, %v2385_v8  ;;  %v2433_v16 = vsub.f32 %v2431_v36, %v2432_v3 }
 0x209   : > { %v2391_v51 = vsub.f32 %v2301_v7, %v5559_v18 }
 0x20a   : > { %2605 = vmatmul.f32.gmra.mxu0 %v2383_v39 }
 0x20b   : > { %2379 = vmatmul.f32.gmra.mxu2 %v2378_v17  ;;  %v2392_v34 = vand.u32 4294901760, %v2391_v51  ;;  %v2434_v17 = vand.u32 4294901760, %v2433_v16 }
 0x20c   : > { %1709 = vxpose.xlu0.b32.start [1/2] (short) (narrow) %v1252_v35, 16  ;;  %2708 = vmatmul.f32.gmra.mxu1 %v2384_v20  ;;  %v5565_v35 = vand.u32 4294901760, %v2304_v1  ;;  %v593_v20 = vld [vmem:[%s5502_s21 + $0x68] sm:$0xff] }
 0x20d   : > { %2509 = vmatmul.f32.gmra.mxu3 %v5537_v37  ;;  %v2393_v61 = vsub.f32 %v2391_v51, %v2392_v34 }
 0x20e   : > { %v2399_v55 = vsub.f32 %v2304_v1, %v5565_v35 }
 0x20f   : > { %v2394_v27 = vand.u32 4294901760, %v2393_v61 }
 0x210   : > { %1678 = vxpose.xlu2.b32.end [2/2] (short) (narrow) %v1248_v0, 16  ;;  %v2400_v0 = vand.u32 4294901760, %v2399_v55 }
 0x212   : > { %2610 = vmatmul.f32.gmra.mxu0 %v2391_v51  ;;  %v2401_v9 = vsub.f32 %v2399_v55, %v2400_v0 }
 0x213   : > { %2387 = vmatmul.f32.gmra.mxu2 %v2386_v45  ;;  %v2325_v45 = vsel %vm2284_vm4, %v593_v20, 0  ;;  %v6541_v20 = vld [vmem:[#allocation5_spill] sm:$0xff] }
 0x214   : > { %1710 = vxpose.xlu0.b32.end [2/2] (short) (narrow) %v1256_v10, 16  ;;  %2714 = vmatmul.f32.gmra.mxu1 %v2392_v34  ;;  %v2402_v2 = vand.u32 4294901760, %v2401_v9  ;;  %v587_v10 = vld [vmem:[%s5502_s21 + $0x38] sm:$0xff]  ;;  %v5613_v61 = vand.u32 4294901760, %v2325_v45 }
 0x215   : > { %2513 = vmatmul.f32.gmra.mxu3 %v5545_v49  ;;  %v2307_v6 = vsel %vm2284_vm4, %v587_v10, 0 }
 0x216   : > { %v5572_v28 = vand.u32 4294901760, %v2307_v6 }
 0x218   : > { %v2407_v57 = vsub.f32 %v2307_v6, %v5572_v28 }
 0x21a   : > { %2615 = vmatmul.f32.gmra.mxu0 %v2399_v55  ;;  %v2408_v47 = vand.u32 4294901760, %v2407_v57 }
 0x21b   : > { %2395 = vmatmul.f32.gmra.mxu2 %v2394_v27  ;;  %v2455_v27 = vsub.f32 %v2325_v45, %v5613_v61 }
 0x21c   : > { %2720 = vmatmul.f32.gmra.mxu1 %v2400_v0  ;;  %v2409_v25 = vsub.f32 %v2407_v57, %v2408_v47  ;;  %v2328_v0 = vsel %vm2284_vm4, %v594_v21, 0 }
 0x21d   : > { %2517 = vmatmul.f32.gmra.mxu3 %v5551_v59  ;;  %v5620_v10 = vand.u32 4294901760, %v2328_v0 }
 0x21e   : > { %v2410_v24 = vand.u32 4294901760, %v2409_v25 }
 0x21f   : > { %v2463_v25 = vsub.f32 %v2328_v0, %v5620_v10 }
 0x221   : > { %v2464_v41 = vand.u32 4294901760, %v2463_v25 }
 0x222   : > { %2620 = vmatmul.f32.gmra.mxu0 %v2407_v57  ;;  %v595_v57 = vld [vmem:[%s5502_s21 + $0x78] sm:$0xff] }
 0x223   : > { %2403 = vmatmul.f32.gmra.mxu2 %v2402_v2  ;;  %v2456_v2 = vand.u32 4294901760, %v2455_v27 }
 0x224   : > { %2726 = vmatmul.f32.gmra.mxu1 %v2408_v47 }
 0x225   : > { %2521 = vmatmul.f32.gmra.mxu3 %v5559_v18  ;;  %v2457_v47 = vsub.f32 %v2455_v27, %v2456_v2 }
 0x22a   : > { %2625 = vmatmul.f32.gmra.mxu0 %v2415_v11  ;;  %v2465_v11 = vsub.f32 %v2463_v25, %v2464_v41 }
 0x22b   : > { %2411 = vmatmul.f32.gmra.mxu2 %v2410_v24  ;;  %v2331_v24 = vsel %vm2284_vm4, %v595_v57, 0 }
 0x22c   : > { %v1856_v32 = vpop.permute.xlu2 %1855  ;;  %2732 = vmatmul.f32.gmra.mxu1 %v2416_v29  ;;  %v5627_v56 = vand.u32 4294901760, %v2331_v24 }
 0x22d   : > { %2525 = vmatmul.f32.gmra.mxu3 %v5565_v35 }
 0x22e   : > { %v2471_v29 = vsub.f32 %v2331_v24, %v5627_v56 }
 0x235   : > { %2529 = vmatmul.f32.gmra.mxu3 %v5572_v28 }
 0x23c   : > { %v1854_v52 = vpop.permute.xlu1 %1853 }
 0x23d   : > { %1903 = vst.msk [vmem:[#allocation2 + $0x10] sm:$0xff] %vm1902_vm5, %v1854_v52  ;;  %2533 = vmatmul.f32.gmra.mxu3 %v5584_v13  ;;  %v5607_v52 = vand.u32 4294901760, %v2322_v12 }
 0x23f   : > { %v2447_v7 = vsub.f32 %v2322_v12, %v5607_v52 }
 0x241   : > { %v2448_v34 = vand.u32 4294901760, %v2447_v7 }
 0x243   : > { %v2449_v1 = vsub.f32 %v2447_v7, %v2448_v34 }
 0x245   : > { %v2450_v9 = vand.u32 4294901760, %v2449_v1 }
 0x261   : > { %1859 = vrot.lane.b32.xlu1 %v1566_v15, %s4989_s18  ;;  %v5603_v15 = vand.u32 4294901760, %v2319_v26 }
 0x263   : > { %v2439_v48 = vsub.f32 %v2319_v26, %v5603_v15 }
 0x265   : > { %v2440_v39 = vand.u32 4294901760, %v2439_v48 }
 0x267   : > { %v2441_v46 = vsub.f32 %v2439_v48, %v2440_v39 }
 0x269   : > { %1861 = vrot.lane.b32.xlu1 %v5492_v58, %s4989_s18  ;;  %v589_v58 = vld [vmem:[%s5502_s21 + $0x48] sm:$0xff]  ;;  %v2442_v51 = vand.u32 4294901760, %v2441_v46 }
 0x26a   : > { %v2313_v42 = vsel %vm2284_vm4, %v589_v58, 0  ;;  %v2472_v58 = vand.u32 4294901760, %v2471_v29 }
 0x26b   : > { %v5590_v44 = vand.u32 4294901760, %v2313_v42 }
 0x26d   : > { %v2423_v62 = vsub.f32 %v2313_v42, %v5590_v44  ;;  %2537 = vmatmul.f32.gmra.mxu3 %v5590_v44  ;;  %v2473_v42 = vsub.f32 %v2471_v29, %v2472_v58 }
 0x26f   : > { %v2424_v40 = vand.u32 4294901760, %v2423_v62  ;;  %2630 = vmatmul.f32.gmra.mxu0 %v2423_v62 }
 0x271   : > { %1865 = vrot.lane.b32.xlu1 %v1629_v54, %s4989_s18  ;;  %v2425_v31 = vsub.f32 %v2423_v62, %v2424_v40  ;;  %2738 = vmatmul.f32.gmra.mxu1 %v2424_v40  ;;  %v2458_v54 = vand.u32 4294901760, %v2457_v47  ;;  %v2356_v40 = vpop.f32.mrf.mxu2 }
 0x273   : > { %v2426_v32 = vand.u32 4294901760, %v2425_v31 }
 0x275   : > { %2541 = vmatmul.f32.gmra.mxu3 %v5596_v33 }
 0x277   : > { %2635 = vmatmul.f32.gmra.mxu0 %v2431_v36 }
 0x279   : > { %1863 = vrot.lane.b32.xlu2 %v5529_v22, %s4989_s18  ;;  %v2418_v22 = vand.u32 4294901760, %v2417_v19  ;;  %2744 = vmatmul.f32.gmra.mxu1 %v2432_v3  ;;  %v2466_v19 = vand.u32 4294901760, %v2465_v11  ;;  %v2364_v14 = vpop.f32.mrf.mxu2 }
 0x27b   : > { %2419 = vmatmul.f32.gmra.mxu2 %v2418_v22  ;;  %v2474_v22 = vand.u32 4294901760, %v2473_v42 }
 0x27d   : > { %2545 = vmatmul.f32.gmra.mxu3 %v5603_v15 }
 0x27f   : > { %2640 = vmatmul.f32.gmra.mxu0 %v2439_v48 }
 0x280   : > { %v2502_v31 = vpop.f32.mrf.mxu3 }
 0x281   : > { %2750 = vmatmul.f32.gmra.mxu1 %v2440_v39  ;;  %v5638_v60 = vadd.f32 %v2502_v31, %v2356_v40  ;;  %v1177_v39 = vpop.f32.mrf.mxu0 }
 0x283   : > { %2427 = vmatmul.f32.gmra.mxu2 %v2426_v32  ;;  %v1630_v32 = vpop.trf.xlu0 }
 0x284   : > { %1867 = vrot.lane.b32.xlu2 %v1630_v32, %s4989_s18 }
 0x285   : > { %2549 = vmatmul.f32.gmra.mxu3 %v5607_v52 }
 0x286   : > { %v2372_v3 = vpop.f32.mrf.mxu2 }
 0x287   : > { %2645 = vmatmul.f32.gmra.mxu0 %v2447_v7  ;;  %v1259_v7 = vpop.f32.mrf.mxu1 }
 0x288   : > { %v2506_v26 = vpop.f32.mrf.mxu3 }
 0x289   : > { %2756 = vmatmul.f32.gmra.mxu1 %v2448_v34  ;;  %v5646_v36 = vadd.f32 %v2506_v26, %v2364_v14 }
 0x28b   : > { %2435 = vmatmul.f32.gmra.mxu2 %v2434_v17  ;;  %v1858_v12 = vpop.permute.xlu0 %1857  ;;  %v6540_v17 = vld [vmem:[#allocation6_spill] sm:$0xff] }
 0x28c   : > { %1905 = vst.msk [vmem:[#allocation2 + $0x20] sm:$0xff] %vm1902_vm5, %v1858_v12 }
 0x28d   : > { %2553 = vmatmul.f32.gmra.mxu3 %v5613_v61 }
 0x28f   : > { %2650 = vmatmul.f32.gmra.mxu0 %v2455_v27  ;;  %v1181_v27 = vpop.f32.mrf.mxu0 }
 0x290   : > { %v2510_v46 = vpop.f32.mrf.mxu3 }
 0x291   : > { %v1789_v8 = vpop.trf.xlu2  ;;  %2762 = vmatmul.f32.gmra.mxu1 %v2456_v2  ;;  %v5658_v45 = vadd.f32 %v2510_v46, %v2372_v3 }
 0x293   : > { %2443 = vmatmul.f32.gmra.mxu2 %v2442_v51  ;;  %v2380_v51 = vpop.f32.mrf.mxu2 }
 0x295   : > { %2557 = vmatmul.f32.gmra.mxu3 %v5620_v10 }
 0x297   : > { %2655 = vmatmul.f32.gmra.mxu0 %v2463_v25  ;;  %v1263_v25 = vpop.f32.mrf.mxu1 }
 0x299   : > { %v1790_v55 = vpop.trf.xlu2  ;;  %2768 = vmatmul.f32.gmra.mxu1 %v2464_v41 }
 0x29a   : > { %1923 = vrot.lane.b32.xlu0 %v1790_v55, %s4989_s18  ;;  %v6543_v55 = vld [vmem:[#allocation9_spill] sm:$0xff] }
 0x29b   : > { %2451 = vmatmul.f32.gmra.mxu2 %v2450_v9  ;;  %v2514_v9 = vpop.f32.mrf.mxu3  ;;  %v2388_v57 = vpop.f32.mrf.mxu2 }
 0x29c   : > { %v5665_v2 = vadd.f32 %v2514_v9, %v2380_v51 }
 0x29d   : > { %2561 = vmatmul.f32.gmra.mxu3 %v5627_v56 }
 0x29f   : > { %2660 = vmatmul.f32.gmra.mxu0 %v2471_v29 }
 0x2a1   : > { %2774 = vmatmul.f32.gmra.mxu1 %v2472_v58  ;;  %v5634_v62 = vpop.trf.xlu2 }
 0x2a3   : > { %v1661_v6 = vpop.trf.xlu1  ;;  %2459 = vmatmul.f32.gmra.mxu2 %v2458_v54  ;;  %v2518_v24 = vpop.f32.mrf.mxu3 }
 0x2a4   : > { %1869 = vrot.lane.b32.xlu1 %v1661_v6, %s4989_s18  ;;  %v5670_v54 = vadd.f32 %v2518_v24, %v2388_v57  ;;  %v2396_v41 = vpop.f32.mrf.mxu2 }
 0x2a5   : > { %2880 = vmatmul.f32.vlgmr.msrb.gmra.mxu3 %v5519_v4 }
 0x2a9   : > { %v1694_v50 = vpop.trf.xlu2 }
 0x2aa   : > { %1875 = vrot.lane.b32.xlu0 %v1694_v50, %s4989_s18 }
 0x2ab   : > { %2467 = vmatmul.f32.gmra.mxu2 %v2466_v19  ;;  %v1662_v23 = vpop.trf.xlu1  ;;  %v2522_v11 = vpop.f32.mrf.mxu3 }
 0x2ac   : > { %1921 = vrot.lane.b32.xlu1 %v1789_v8, %s4989_s18  ;;  %1871 = vrot.lane.b32.xlu2 %v1662_v23, %s4989_s18  ;;  %v885_v8 = vadd.f32 %v6541_v20, %v6540_v17  ;;  %v5674_v29 = vadd.f32 %v2522_v11, %v2396_v41 }
 0x2ad   : > { %2884 = vmatmul.f32.gmra.mxu3 %v5521_v5 }
 0x2b3   : > { %2475 = vmatmul.f32.gmra.mxu2 %v2474_v22  ;;  %v2526_v19 = vpop.f32.mrf.mxu3  ;;  %v1821_v22 = vpop.trf.xlu0 }
 0x2b4   : > { %1931 = vrot.lane.b32.xlu2 %v1821_v22, %s4989_s18 }
 0x2b5   : > { %2888 = vmatmul.f32.gmra.mxu3 %v5537_v37 }
 0x2bb   : > { %2798 = vmatmul.f32.vlgmr.msrb.gmra.mxu2 %v5519_v4  ;;  %v881_v4 = vadd.f32 %v5327_v63, %v5331_v30  ;;  %v6539_v63 = vld [vmem:[#allocation7_spill] sm:$0xff] }
 0x2bd   : > { %2892 = vmatmul.f32.gmra.mxu3 %v5545_v49 }
 0x2c3   : > { %2802 = vmatmul.f32.gmra.mxu2 %v5521_v5  ;;  %v979_v5 = vadd.f32 %v5389_v53, %v881_v4  ;;  %v6542_v53 = vld [vmem:[#allocation8_spill] sm:$0xff] }
 0x2c4   : > { %v984_v1 = vadd.f32 %v6542_v53, %v885_v8 }
 0x2c5   : > { %v1092_v30 = vadd.f32 %v6539_v63, %v979_v5  ;;  %2896 = vmatmul.f32.gmra.mxu3 %v5551_v59 }
 0x2c6   : > { %v1098_v0 = vadd.f32 %v6543_v55, %v984_v1  ;;  %v2070_v55 = vld [vmem:[#allocation2 + $0x24] sm:$0x1] }
 0x2c7   : > { %v1178_v34 = vadd.f32 %v1177_v39, %v1092_v30 }
 0x2c8   : > { %v1182_v6 = vadd.f32 %v1181_v27, %v1098_v0 }
 0x2cb   : > { %2806 = vmatmul.f32.gmra.mxu2 %v5537_v37  ;;  %v1260_v37 = vadd.f32 %v1259_v7, %v1178_v34  ;;  %v5723_v34 = vpop.f32.mrf.mxu1 }
 0x2cd   : > { %2900 = vmatmul.f32.gmra.mxu3 %v5559_v18 }
 0x2d3   : > { %v1864_v48 = vpop.permute.xlu2 %1863  ;;  %v1860_v16 = vpop.permute.xlu1 %1859  ;;  %2810 = vmatmul.f32.gmra.mxu2 %v5545_v49  ;;  %v1264_v49 = vadd.f32 %v1263_v25, %v1182_v6  ;;  %v2182_v6 = vld [vmem:[#allocation2 + $0x27] sm:$0x1] }
 0x2d4   : > { %1908 = vst.msk [vmem:[#allocation2 + $0x38] sm:$0xff] %vm1902_vm5, %v1864_v48 }
 0x2d5   : > { %1906 = vst.msk [vmem:[#allocation2 + $0x28] sm:$0xff] %vm1902_vm5, %v1860_v16  ;;  %2904 = vmatmul.f32.gmra.mxu3 %v5565_v35 }
 0x2db   : > { %v1862_v21 = vpop.permute.xlu1 %1861  ;;  %2814 = vmatmul.f32.gmra.mxu2 %v5551_v59  ;;  %v2404_v59 = vpop.f32.mrf.mxu2 }
 0x2dc   : > { %1907 = vst.msk [vmem:[#allocation2 + $0x30] sm:$0xff] %vm1902_vm5, %v1862_v21  ;;  %v5678_v58 = vadd.f32 %v2526_v19, %v2404_v59  ;;  %v5728_v21 = vpop.f32.mrf.mxu1  ;;  %v2231_v19 = vld [vmem:[#allocation2 + $0x38] sm:$0x1] }
 0x2dd   : > { %2908 = vmatmul.f32.gmra.mxu3 %v5572_v28 }
 0x2e1   : > { %1741 = vxpose.xlu1.b32.start [1/2] (short) (narrow) %v1260_v37, 16  ;;  %v1959_v37 = vld [vmem:[#allocation2 + $0x21] sm:$0x1] }
 0x2e3   : > { %v1866_v47 = vpop.permute.xlu1 %1865  ;;  %2818 = vmatmul.f32.gmra.mxu2 %v5559_v18  ;;  %v2412_v42 = vpop.f32.mrf.mxu2  ;;  %v2008_v25 = vld [vmem:[#allocation2 + $0x32] sm:$0x1]  ;;  %v2119_v41 = vld [vmem:[#allocation2 + $0x35] sm:$0x1] }
 0x2e4   : > { %1909 = vst.msk [vmem:[#allocation2 + $0x40] sm:$0xff] %vm1902_vm5, %v1866_v47  ;;  %v2530_v18 = vpop.f32.mrf.mxu3  ;;  %v5733_v1 = vpop.f32.mrf.mxu1 }
 0x2e5   : > { %2912 = vmatmul.f32.gmra.mxu3 %v5584_v13  ;;  %v5683_v40 = vadd.f32 %v2530_v18, %v2412_v42 }
 0x2e9   : > { %1742 = vxpose.xlu1.b32.end [2/2] (short) (narrow) %v1264_v49, 16 }
 0x2eb   : > { %2822 = vmatmul.f32.gmra.mxu2 %v5565_v35 }
 0x2ec   : > { %v2534_v31 = vpop.f32.mrf.mxu3  ;;  %v5738_v27 = vpop.f32.mrf.mxu1 }
 0x2ed   : > { %2916 = vmatmul.f32.gmra.mxu3 %v5590_v44 }
 0x2f3   : > { %2826 = vmatmul.f32.gmra.mxu2 %v5572_v28 }
 0x2f4   : > { %v2538_v32 = vpop.f32.mrf.mxu3  ;;  %v5743_v9 = vpop.f32.mrf.mxu1 }
 0x2f5   : > { %2920 = vmatmul.f32.gmra.mxu3 %v5596_v33 }
 0x2fb   : > { %2830 = vmatmul.f32.gmra.mxu2 %v5584_v13  ;;  %v1822_v13 = vpop.trf.xlu0 }
 0x2fc   : > { %v2542_v26 = vpop.f32.mrf.mxu3  ;;  %v5748_v47 = vpop.f32.mrf.mxu1 }
 0x2fd   : > { %2924 = vmatmul.f32.gmra.mxu3 %v5603_v15 }
 0x2fe   : > { %v2420_v35 = vpop.f32.mrf.mxu2 }
 0x2ff   : > { %v5687_v50 = vadd.f32 %v2534_v31, %v2420_v35  ;;  %v1868_v35 = vpop.permute.xlu2 %1867 }
 0x300   : > { %1910 = vst.msk [vmem:[#allocation2 + $0x48] sm:$0xff] %vm1902_vm5, %v1868_v35 }
 0x303   : > { %2834 = vmatmul.f32.gmra.mxu2 %v5590_v44 }
 0x304   : > { %v2546_v48 = vpop.f32.mrf.mxu3  ;;  %v5753_v24 = vpop.f32.mrf.mxu1 }
 0x305   : > { %2928 = vmatmul.f32.gmra.mxu3 %v5607_v52 }
 0x306   : > { %v2428_v28 = vpop.f32.mrf.mxu2 }
 0x307   : > { %v5691_v14 = vadd.f32 %v2538_v32, %v2428_v28 }
 0x30b   : > { %2838 = vmatmul.f32.gmra.mxu2 %v5596_v33  ;;  %v1725_v33 = vpop.trf.xlu0 }
 0x30c   : > { %1877 = vrot.lane.b32.xlu2 %v1725_v33, %s4989_s18  ;;  %v2550_v39 = vpop.f32.mrf.mxu3  ;;  %v5758_v59 = vpop.f32.mrf.mxu1  ;;  %v1958_v33 = vld [vmem:[#allocation2 + $0x11] sm:$0x1] }
 0x30d   : > { %2932 = vmatmul.f32.gmra.mxu3 %v5613_v61 }
 0x30e   : > { %v2436_v4 = vpop.f32.mrf.mxu2 }
 0x30f   : > { %v5696_v12 = vadd.f32 %v2542_v26, %v2436_v4  ;;  %v1872_v4 = vpop.permute.xlu2 %1871 }
 0x310   : > { %1912 = vst.msk [vmem:[#allocation2 + $0x58] sm:$0xff] %vm1902_vm5, %v1872_v4 }
 0x313   : > { %2842 = vmatmul.f32.gmra.mxu2 %v5603_v15  ;;  %v1726_v53 = vpop.trf.xlu0 }
 0x314   : > { %v2554_v30 = vpop.f32.mrf.mxu3  ;;  %v5764_v18 = vpop.f32.mrf.mxu1 }
 0x315   : > { %2936 = vmatmul.f32.gmra.mxu3 %v5620_v10 }
 0x316   : > { %v1870_v23 = vpop.permute.xlu1 %1869  ;;  %v2444_v44 = vpop.f32.mrf.mxu2 }
 0x317   : > { %1911 = vst.msk [vmem:[#allocation2 + $0x50] sm:$0xff] %vm1902_vm5, %v1870_v23  ;;  %v5701_v16 = vadd.f32 %v2546_v48, %v2444_v44  ;;  %v2006_v23 = vld [vmem:[#allocation2 + $0x12] sm:$0x1]  ;;  %v2117_v48 = vld [vmem:[#allocation2 + $0x15] sm:$0x1] }
 0x31b   : > { %2846 = vmatmul.f32.gmra.mxu2 %v5607_v52 }
 0x31c   : > { %v2558_v52 = vpop.f32.mrf.mxu3 }
 0x31d   : > { %2940 = vmatmul.f32.gmra.mxu3 %v5627_v56 }
 0x31e   : > { %v1922_v3 = vpop.permute.xlu1 %1921  ;;  %v2452_v5 = vpop.f32.mrf.mxu2  ;;  %v1962_v31 = vld [vmem:[#allocation2 + $0x51] sm:$0x1] }
 0x31f   : > { %1927 = vst.msk [vmem:[#allocation2] sm:$0xff] %vm1902_vm5, %v1922_v3  ;;  %v5706_v63 = vadd.f32 %v2550_v39, %v2452_v5  ;;  %v1924_v39 = vpop.permute.xlu0 %1923 }
 0x323   : > { %2850 = vmatmul.f32.gmra.mxu2 %v5613_v61  ;;  %v5721_v61 = vpop.f32.mrf.mxu0 }
 0x324   : > { %v2562_v7 = vpop.f32.mrf.mxu3 }
 0x326   : > { %v2460_v15 = vpop.f32.mrf.mxu2  ;;  %v2005_v26 = vld [vmem:[#allocation2 + $0x2] sm:$0x1] }
 0x327   : > { %v5710_v17 = vadd.f32 %v2554_v30, %v2460_v15  ;;  %v2073_v30 = vld [vmem:[#allocation2 + $0x54] sm:$0x1] }
 0x32b   : > { %2854 = vmatmul.f32.gmra.mxu2 %v5620_v10  ;;  %v5726_v10 = vpop.f32.mrf.mxu0 }
 0x32e   : > { %v2468_v20 = vpop.f32.mrf.mxu2 }
 0x32f   : > { %v5714_v8 = vadd.f32 %v2558_v52, %v2468_v20 }
 0x333   : > { %2858 = vmatmul.f32.gmra.mxu2 %v5627_v56  ;;  %v5731_v56 = vpop.f32.mrf.mxu0 }
 0x336   : > { %v2476_v46 = vpop.f32.mrf.mxu2 }
 0x337   : > { %v5717_v51 = vadd.f32 %v2562_v7, %v2476_v46  ;;  %v1960_v46 = vld [vmem:[#allocation2 + $0x31] sm:$0x1]  ;;  %v2069_v7 = vld [vmem:[#allocation2 + $0x14] sm:$0x1] }
 0x343   : > { %1873 = vrot.lane.b32.xlu1 %v5634_v62, %s4989_s18  ;;  %v5736_v62 = vpop.f32.mrf.mxu0 }
 0x34b   : > { %1933 = vrot.lane.b32.xlu1 %v1822_v13, %s4989_s18  ;;  %v5741_v0 = vpop.f32.mrf.mxu0  ;;  %v5772_v13 = vpop.f32.mrf.mxu1 }
 0x353   : > { %1879 = vrot.lane.b32.xlu1 %v1726_v53, %s4989_s18  ;;  %v5746_v57 = vpop.f32.mrf.mxu0  ;;  %v2745_v5 = vpop.f32.mrf.mxu1 }
 0x354   : > { %v1876_v53 = vpop.permute.xlu0 %1875 }
 0x355   : > { %1914 = vst.msk [vmem:[#allocation2 + $0x68] sm:$0xff] %vm1902_vm5, %v1876_v53 }
 0x35b   : > { %1977 = vrot.lane.b32.xlu1 %v1959_v37, %s4991_s25  ;;  %v5751_v49 = vpop.f32.mrf.mxu0 }
 0x363   : > { %2087 = vrot.lane.b32.xlu1 %v2070_v55, %s4991_s25  ;;  %v5756_v11 = vpop.f32.mrf.mxu0  ;;  %v2185_v55 = vld [vmem:[#allocation2 + $0x57] sm:$0x1] }
 0x36b   : > { %2198 = vrot.lane.b32.xlu1 %v2182_v6, %s4991_s25  ;;  %v5761_v42 = vpop.f32.mrf.mxu0 }
 0x373   : > { %2027 = vrot.lane.b32.xlu1 %v2008_v25, %s4992_s26  ;;  %v5768_v28 = vpop.f32.mrf.mxu0 }
 0x37b   : > { %2137 = vrot.lane.b32.xlu1 %v2119_v41, %s4992_s26  ;;  %v2636_v3 = vpop.f32.mrf.mxu0  ;;  %v2071_v41 = vld [vmem:[#allocation2 + $0x34] sm:$0x1] }
 0x37c   : > { %v2637_v44 = vadd.f32 %v2636_v3, %v5696_v12  ;;  %v2751_v12 = vpop.f32.mrf.mxu1 }
 0x37e   : > { %v5779_v15 = vadd.f32 %v2745_v5, %v2637_v44  ;;  %v1932_v5 = vpop.permute.xlu2 %1931 }
 0x37f   : > { %1938 = vst.msk [vmem:[#allocation2 + $0x90] sm:$0xff] %vm1902_vm5, %v1932_v5 }
 0x383   : > { %2248 = vrot.lane.b32.xlu1 %v2231_v19, %s4992_s26  ;;  %v2641_v20 = vpop.f32.mrf.mxu0 }
 0x384   : > { %v2642_v52 = vadd.f32 %v2641_v20, %v5701_v16  ;;  %v2007_v16 = vld [vmem:[#allocation2 + $0x22] sm:$0x1]  ;;  %v2757_v19 = vpop.f32.mrf.mxu1  ;;  %v2120_v20 = vld [vmem:[#allocation2 + $0x45] sm:$0x1] }
 0x385   : > { %v1757_v22 = vpop.trf.xlu1 }
 0x386   : > { %1881 = vrot.lane.b32.xlu0 %v1757_v22, %s4989_s18  ;;  %v5785_v37 = vadd.f32 %v2751_v12, %v2642_v52  ;;  %v1961_v52 = vld [vmem:[#allocation2 + $0x41] sm:$0x1] }
 0x38b   : > { %1983 = vrot.lane.b32.xlu1 %v1962_v31, %s4991_s25  ;;  %v2646_v6 = vpop.f32.mrf.mxu0 }
 0x38c   : > { %v2647_v25 = vadd.f32 %v2646_v6, %v5706_v63  ;;  %v2763_v4 = vpop.f32.mrf.mxu1  ;;  %v2234_v6 = vld [vmem:[#allocation2 + $0x68] sm:$0x1] }
 0x38d   : > { %v1758_v32 = vpop.trf.xlu1 }
 0x38e   : > { %2023 = vrot.lane.b32.xlu0 %v2006_v23, %s4992_s26  ;;  %1883 = vrot.lane.b32.xlu2 %v1758_v32, %s4989_s18  ;;  %v5792_v22 = vadd.f32 %v2757_v19, %v2647_v25  ;;  %v2183_v32 = vld [vmem:[#allocation2 + $0x37] sm:$0x1]  ;;  %v2118_v23 = vld [vmem:[#allocation2 + $0x25] sm:$0x1]  ;;  %v2184_v25 = vld [vmem:[#allocation2 + $0x47] sm:$0x1]  ;;  %v2799_v19 = vpop.f32.mrf.mxu2 }
 0x393   : > { %2021 = vrot.lane.b32.xlu1 %v2005_v26, %s4992_s26  ;;  %v2651_v35 = vpop.f32.mrf.mxu0 }
 0x394   : > { %v2652_v31 = vadd.f32 %v2651_v35, %v5710_v17  ;;  %v2769_v17 = vpop.f32.mrf.mxu1 }
 0x396   : > { %2133 = vrot.lane.b32.xlu0 %v2117_v48, %s4992_s26  ;;  %1975 = vrot.lane.b32.xlu2 %v1958_v33, %s4991_s25  ;;  %v5797_v63 = vadd.f32 %v2763_v4, %v2652_v31  ;;  %v2009_v48 = vld [vmem:[#allocation2 + $0x42] sm:$0x1]  ;;  %v2230_v33 = vld [vmem:[#allocation2 + $0x28] sm:$0x1]  ;;  %v2587_v31 = vadd.f32 %v5721_v61, %v5638_v60 }
 0x398   : > { %v2686_v4 = vadd.f32 %v5723_v34, %v2587_v31 }
 0x39b   : > { %2093 = vrot.lane.b32.xlu1 %v2073_v30, %s4991_s25  ;;  %v2656_v26 = vpop.f32.mrf.mxu0 }
 0x39c   : > { %v2657_v3 = vadd.f32 %v2656_v26, %v5714_v8  ;;  %v1878_v8 = vpop.permute.xlu2 %1877  ;;  %v2800_v26 = vadd.f32 %v2799_v19, %v2686_v4  ;;  %v2602_v4 = vadd.f32 %v5736_v62, %v5665_v2 }
 0x39d   : > { %1915 = vst.msk [vmem:[#allocation2 + $0x70] sm:$0xff] %vm1902_vm5, %v1878_v8 }
 0x39e   : > { %1979 = vrot.lane.b32.xlu0 %v1960_v46, %s4991_s25  ;;  %2085 = vrot.lane.b32.xlu2 %v2069_v7, %s4991_s25  ;;  %v5803_v39 = vadd.f32 %v2769_v17, %v2657_v3  ;;  %v2232_v7 = vld [vmem:[#allocation2 + $0x48] sm:$0x1]  ;;  %v2592_v3 = vadd.f32 %v5726_v10, %v5646_v36 }
 0x3a0   : > { %v2692_v5 = vadd.f32 %v5728_v21, %v2592_v3  ;;  %v2704_v3 = vadd.f32 %v5738_v27, %v2602_v4 }
 0x3a3   : > { %2204 = vrot.lane.b32.xlu1 %v2185_v55, %s4991_s25  ;;  %v2072_v55 = vld [vmem:[#allocation2 + $0x44] sm:$0x1] }
 0x3a6   : > { %2089 = vrot.lane.b32.xlu0 %v2071_v41, %s4991_s25  ;;  %2025 = vrot.lane.b32.xlu2 %v2007_v16, %s4992_s26  ;;  %v2010_v16 = vld [vmem:[#allocation2 + $0x52] sm:$0x1] }
 0x3ae   : > { %2200 = vrot.lane.b32.xlu0 %v2183_v32, %s4991_s25  ;;  %2135 = vrot.lane.b32.xlu2 %v2118_v23, %s4992_s26  ;;  %v2881_v32 = vpop.f32.mrf.mxu3  ;;  %v2121_v23 = vld [vmem:[#allocation2 + $0x55] sm:$0x1] }
 0x3af   : > { %v2882_v17 = vadd.f32 %v2881_v32, %v2800_v26 }
 0x3b5   : > { %v1874_v44 = vpop.permute.xlu1 %1873 }
 0x3b6   : > { %1913 = vst.msk [vmem:[#allocation2 + $0x60] sm:$0xff] %vm1902_vm5, %v1874_v44  ;;  %2029 = vrot.lane.b32.xlu0 %v2009_v48, %s4992_s26  ;;  %2246 = vrot.lane.b32.xlu2 %v2230_v33, %s4992_s26  ;;  %v2803_v44 = vpop.f32.mrf.mxu2  ;;  %v2233_v33 = vld [vmem:[#allocation2 + $0x58] sm:$0x1]  ;;  %v2885_v60 = vpop.f32.mrf.mxu3 }
 0x3b7   : > { %v2804_v34 = vadd.f32 %v2803_v44, %v2692_v5 }
 0x3bd   : > { %v1934_v30 = vpop.permute.xlu1 %1933  ;;  %v2011_v46 = vld [vmem:[#allocation2 + $0x62] sm:$0x1]  ;;  %v2122_v12 = vld [vmem:[#allocation2 + $0x65] sm:$0x1] }
 0x3be   : > { %1939 = vst.msk [vmem:[#allocation2 + $0x98] sm:$0xff] %vm1902_vm5, %v1934_v30  ;;  %2139 = vrot.lane.b32.xlu0 %v2120_v20, %s4992_s26  ;;  %1981 = vrot.lane.b32.xlu2 %v1961_v52, %s4991_s25  ;;  %v2807_v30 = vpop.f32.mrf.mxu2  ;;  %v2886_v52 = vadd.f32 %v2885_v60, %v2804_v34  ;;  %v2889_v10 = vpop.f32.mrf.mxu3 }
 0x3bf   : > { %2033 = vrot.lane.b32.xlu1 %v2011_v46, %s4992_s26 }
 0x3c5   : > { %v1880_v53 = vpop.permute.xlu1 %1879  ;;  %v2237_v41 = vld [vmem:[#allocation2 + $0x98] sm:$0x1] }
 0x3c6   : > { %1916 = vst.msk [vmem:[#allocation2 + $0x78] sm:$0xff] %vm1902_vm5, %v1880_v53  ;;  %2250 = vrot.lane.b32.xlu0 %v2232_v7, %s4992_s26  ;;  %2091 = vrot.lane.b32.xlu2 %v2072_v55, %s4991_s25  ;;  %v2811_v46 = vpop.f32.mrf.mxu2  ;;  %v2597_v53 = vadd.f32 %v5731_v56, %v5658_v45  ;;  %v2607_v55 = vadd.f32 %v5741_v0, %v5670_v54 }
 0x3c7   : > { %2143 = vrot.lane.b32.xlu1 %v2122_v12, %s4992_s26  ;;  %v2893_v12 = vpop.f32.mrf.mxu3  ;;  %v2612_v54 = vadd.f32 %v5746_v57, %v5674_v29  ;;  %v2812_v2 = vadd.f32 %v2811_v46, %v2704_v3  ;;  %v5873_v46 = vstv %s601_s28 }
 0x3c8   : > { %v2698_v19 = vadd.f32 %v5733_v1, %v2597_v53  ;;  %v2710_v31 = vadd.f32 %v5743_v9, %v2607_v55  ;;  %v1945_v53 = vld [vmem:[#allocation2 + $0x40] sm:$0x1] }
 0x3c9   : > { %v2716_v1 = vadd.f32 %v5748_v47, %v2612_v54  ;;  %v2894_v57 = vadd.f32 %v2893_v12, %v2812_v2  ;;  %v2169_v2 = vld [vmem:[#allocation2 + $0x56] sm:$0x1] }
 0x3cd   : > { %v5819_v35 = vpop.permute.xlu1 %1977 }
 0x3ce   : > { %2202 = vrot.lane.b32.xlu2 %v2184_v25, %s4991_s25 }
 0x3cf   : > { %2254 = vrot.lane.b32.xlu1 %v2234_v6, %s4992_s26  ;;  %v2897_v32 = vpop.f32.mrf.mxu3 }
 0x3d5   : > { %v5827_v48 = vpop.permute.xlu1 %2087 }
 0x3d6   : > { %2031 = vrot.lane.b32.xlu2 %v2010_v16, %s4992_s26 }
 0x3d7   : > { %2260 = vrot.lane.b32.xlu1 %v2237_v41, %s4992_s26  ;;  %v2815_v41 = vpop.f32.mrf.mxu2 }
 0x3d8   : > { %v2816_v45 = vadd.f32 %v2815_v41, %v2710_v31 }
 0x3da   : > { %v2898_v44 = vadd.f32 %v2897_v32, %v2816_v45  ;;  %v1953_v32 = vadd.f32 %v1945_v53, %v5873_v46  ;;  %v2074_v53 = vld [vmem:[#allocation2 + $0x64] sm:$0x1] }
 0x3dd   : > { %v5832_v20 = vpop.permute.xlu1 %2198 }
 0x3de   : > { %2141 = vrot.lane.b32.xlu2 %v2121_v23, %s4992_s26  ;;  %v2808_v23 = vadd.f32 %v2807_v30, %v2698_v19  ;;  %v1944_v30 = vld [vmem:[#allocation2 + $0x30] sm:$0x1] }
 0x3df   : > { %v2819_v9 = vpop.f32.mrf.mxu2 }
 0x3e0   : > { %v2890_v26 = vadd.f32 %v2889_v10, %v2808_v23  ;;  %v2820_v62 = vadd.f32 %v2819_v9, %v2716_v1  ;;  %v2056_v23 = vld [vmem:[#allocation2 + $0x43] sm:$0x1]  ;;  %v2057_v9 = vld [vmem:[#allocation2 + $0x53] sm:$0x1] }
 0x3e5   : > { %v2028_v8 = vpop.permute.xlu1 %2027 }
 0x3e6   : > { %2252 = vrot.lane.b32.xlu2 %v2233_v33, %s4992_s26 }
 0x3e8   : > { %3195 = vxpose.xlu0.b32.start [1/2] (short) (narrow) %v2882_v17, 16  ;;  %v1884_v61 = vpop.permute.xlu2 %1883  ;;  %v2901_v17 = vpop.f32.mrf.mxu3 }
 0x3e9   : > { %1918 = vst.msk [vmem:[#allocation2 + $0x88] sm:$0xff] %vm1902_vm5, %v1884_v61  ;;  %v2902_v60 = vadd.f32 %v2901_v17, %v2820_v62 }
 0x3ed   : > { %v5847_v16 = vpop.permute.xlu1 %2137 }
 0x3f0   : > { %3196 = vxpose.xlu0.b32.end [2/2] (short) (narrow) %v2886_v52, 16  ;;  %v5834_v36 = vpop.permute.xlu2 %1975 }
 0x3f5   : > { %v5861_v33 = vpop.permute.xlu1 %2248 }
 0x3f8   : > { %v1882_v7 = vpop.permute.xlu0 %1881  ;;  %v5836_v21 = vpop.permute.xlu2 %2085 }
 0x3f9   : > { %1917 = vst.msk [vmem:[#allocation2 + $0x80] sm:$0xff] %vm1902_vm5, %v1882_v7  ;;  %v1952_v7 = vadd.f32 %v1944_v30, %v5873_v46 }
 0x3fd   : > { %v5865_v61 = vpop.permute.xlu1 %1983 }
 0x400   : > { %v5843_v6 = vpop.permute.xlu0 %2023  ;;  %v5845_v25 = vpop.permute.xlu2 %2025 }
 0x405   : > { %v5869_v34 = vpop.permute.xlu1 %2021 }
 0x408   : > { %v5855_v56 = vpop.permute.xlu0 %2133  ;;  %v5857_v0 = vpop.permute.xlu2 %2135 }
 0x40c   : > { %3259 = vxpose.xlu1.b32.start [1/2] (short) (narrow) %v2898_v44, 16  ;;  %3227 = vxpose.xlu2.b32.start [1/2] (short) (narrow) %v2890_v26, 16 }
 0x40d   : > { %v2094_v31 = vpop.permute.xlu1 %2093 }
 0x410   : > { %v1980_v5 = vpop.permute.xlu0 %1979  ;;  %v5863_v29 = vpop.permute.xlu2 %2246 }
 0x411   : > { %v2000_v12 = vadd.f32 %v1980_v5, %v1952_v7  ;;  %v2278_v7 = vld [vmem:[%s5892_s12] sm:$0xff] }
 0x413   : > { %v2048_v19 = vadd.f32 %v2028_v8, %v2000_v12  ;;  %v2076_v12 = vld [vmem:[#allocation2 + $0x84] sm:$0x1] }
 0x414   : > { %3260 = vxpose.xlu1.b32.end [2/2] (short) (narrow) %v2902_v60, 16  ;;  %3228 = vxpose.xlu2.b32.end [2/2] (short) (narrow) %v2894_v57, 16 }
 0x415   : > { %v2064_v45 = vadd.f32 %v2056_v23, %v2048_v19  ;;  %v2205_v5 = vpop.permute.xlu1 %2204 }
 0x418   : > { %v5867_v27 = vpop.permute.xlu0 %2089  ;;  %v1982_v47 = vpop.permute.xlu2 %1981 }
 0x419   : > { %v2001_v4 = vadd.f32 %v1982_v47, %v1953_v32  ;;  %v1957_v47 = vld [vmem:[#allocation2 + $0x1] sm:$0x1] }
 0x420   : > { %v5871_v52 = vpop.permute.xlu0 %2200  ;;  %v2092_v10 = vpop.permute.xlu2 %2091 }
 0x421   : > { %v2112_v54 = vadd.f32 %v2092_v10, %v2064_v45  ;;  %v1963_v10 = vld [vmem:[#allocation2 + $0x61] sm:$0x1]  ;;  %v2188_v45 = vld [vmem:[#allocation2 + $0x87] sm:$0x1] }
 0x428   : > { %v2030_v55 = vpop.permute.xlu0 %2029  ;;  %v5876_v41 = vpop.permute.xlu2 %2202 }
 0x429   : > { %v2049_v26 = vadd.f32 %v2030_v55, %v2001_v4  ;;  %v2945_v55 = vsel %vm2284_vm4, %v2278_v7, 0  ;;  %v2279_v4 = vld [vmem:[%s5892_s12 + $0x8] sm:$0xff]  ;;  %v2075_v7 = vld [vmem:[#allocation2 + $0x74] sm:$0x1] }
 0x42a   : > { %v5898_v19 = vand.u32 4294901760, %v2945_v55 }
 0x42b   : > { %v2065_v62 = vadd.f32 %v2057_v9, %v2049_v26  ;;  %v2948_v26 = vsel %vm2284_vm4, %v2279_v4, 0 }
 0x42c   : > { %3028 = vmatmul.f32.vlgmr.msrb.gmra.mxu1 %v5898_v19 }
 0x42d   : > { %v2113_v8 = vadd.f32 %v2094_v31, %v2065_v62  ;;  %v2974_v31 = vsub.f32 %v2945_v55, %v5898_v19  ;;  %3177 = vmatpush.msrb.mxu1 %v5515_v38  ;;  %v2012_v55 = vld [vmem:[#allocation2 + $0x72] sm:$0x1] }
 0x42f   : > { %v2975_v32 = vand.u32 4294901760, %v2974_v31 }
 0x430   : > { %v2140_v3 = vpop.permute.xlu0 %2139  ;;  %v5879_v44 = vpop.permute.xlu2 %2031 }
 0x431   : > { %v2160_v1 = vadd.f32 %v2140_v3, %v2112_v54  ;;  %v2976_v23 = vsub.f32 %v2974_v31, %v2975_v32  ;;  %v2186_v54 = vld [vmem:[#allocation2 + $0x67] sm:$0x1] }
 0x433   : > { %v2177_v17 = vadd.f32 %v2169_v2, %v2160_v1  ;;  %v2977_v3 = vand.u32 4294901760, %v2976_v23  ;;  %v5907_v1 = vand.u32 4294901760, %v2948_v26  ;;  %v1964_v2 = vld [vmem:[#allocation2 + $0x71] sm:$0x1] }
 0x435   : > { %v5881_v57 = vadd.f32 %v2205_v5, %v2177_v17  ;;  %2978 = vmatmul.f32.vlgmr.msrb.gmra.mxu0 %v2977_v3  ;;  %v2982_v9 = vsub.f32 %v2948_v26, %v5907_v1  ;;  %3032 = vmatmul.f32.gmra.mxu1 %v5907_v1  ;;  %v2280_v17 = vld [vmem:[%s5892_s12 + $0x10] sm:$0xff] }
 0x436   : > { %3143 = vmatpush.msrb.mxu0 %v5531_v43  ;;  %v2189_v5 = vld [vmem:[#allocation2 + $0x97] sm:$0x1] }
 0x437   : > { %v2983_v38 = vand.u32 4294901760, %v2982_v9 }
 0x438   : > { %v2142_v60 = vpop.permute.xlu2 %2141  ;;  %v5928_v26 = vpop.permute.xlu0 %2250 }
 0x439   : > { %v5883_v30 = vadd.f32 %v2142_v60, %v2113_v8  ;;  %v2984_v62 = vsub.f32 %v2982_v9, %v2983_v38  ;;  %v2951_v8 = vsel %vm2284_vm4, %v2280_v17, 0 }
 0x43b   : > { %v2985_v60 = vand.u32 4294901760, %v2984_v62  ;;  %v2187_v62 = vld [vmem:[#allocation2 + $0x77] sm:$0x1] }
 0x43d   : > { %2986 = vmatmul.f32.gmra.mxu0 %v2985_v60 }
 0x45e   : > { %1973 = vrot.lane.b32.xlu0 %v1957_v47, %s4991_s25  ;;  %v5916_v47 = vand.u32 4294901760, %v2951_v8 }
 0x460   : > { %3036 = vmatmul.f32.gmra.mxu1 %v5916_v47 }
 0x466   : > { %1985 = vrot.lane.b32.xlu0 %v1963_v10, %s4991_s25  ;;  %v2990_v10 = vsub.f32 %v2951_v8, %v5916_v47 }
 0x468   : > { %v2991_v43 = vand.u32 4294901760, %v2990_v10 }
 0x46e   : > { %2099 = vrot.lane.b32.xlu1 %v2076_v12, %s4991_s25  ;;  %2095 = vrot.lane.b32.xlu0 %v2074_v53, %s4991_s25  ;;  %v2992_v12 = vsub.f32 %v2990_v10, %v2991_v43  ;;  %v2281_v53 = vld [vmem:[%s5892_s12 + $0x18] sm:$0xff] }
 0x46f   : > { %v2954_v23 = vsel %vm2284_vm4, %v2281_v53, 0  ;;  %v2124_v53 = vld [vmem:[#allocation2 + $0x85] sm:$0x1] }
 0x470   : > { %v2993_v4 = vand.u32 4294901760, %v2992_v12 }
 0x472   : > { %2994 = vmatmul.f32.gmra.mxu0 %v2993_v4 }
 0x476   : > { %2210 = vrot.lane.b32.xlu1 %v2188_v45, %s4991_s25  ;;  %2206 = vrot.lane.b32.xlu0 %v2186_v54, %s4991_s25  ;;  %v5924_v45 = vand.u32 4294901760, %v2954_v23 }
 0x478   : > { %v2998_v54 = vsub.f32 %v2954_v23, %v5924_v45  ;;  %3040 = vmatmul.f32.gmra.mxu1 %v5924_v45 }
 0x47a   : > { %v2999_v3 = vand.u32 4294901760, %v2998_v54 }
 0x47c   : > { %v3000_v17 = vsub.f32 %v2998_v54, %v2999_v3 }
 0x47d   : > { %1987 = vrot.lane.b32.xlu2 %v1964_v2, %s4991_s25  ;;  %v5930_v2 = vpop.permute.xlu1 %2033 }
 0x47e   : > { %2212 = vrot.lane.b32.xlu0 %v2189_v5, %s4991_s25  ;;  %v2123_v5 = vld [vmem:[#allocation2 + $0x75] sm:$0x1]  ;;  %v3001_v8 = vand.u32 4294901760, %v3000_v17 }
 0x480   : > { %3002 = vmatmul.f32.gmra.mxu0 %v3001_v8  ;;  %3103 = vmatmul.f32.vlgmr.msra.gmra.mxu1 %v2975_v32  ;;  %v2236_v32 = vld [vmem:[#allocation2 + $0x88] sm:$0x1]  ;;  %v2622_v8 = vadd.f32 %v5756_v11, %v5683_v40 }
 0x485   : > { %2097 = vrot.lane.b32.xlu2 %v2075_v7, %s4991_s25  ;;  %v2235_v7 = vld [vmem:[#allocation2 + $0x78] sm:$0x1]  ;;  %v5935_v12 = vpop.permute.xlu1 %2143 }
 0x486   : > { %2035 = vrot.lane.b32.xlu0 %v2012_v55, %s4992_s26  ;;  %v5938_v55 = vpop.permute.xlu2 %2252 }
 0x488   : > { %3064 = vmatmul.f32.vlgmr.msra.gmra.mxu0 %v2974_v31  ;;  %3109 = vmatmul.f32.gmra.mxu1 %v2983_v38  ;;  %v2617_v31 = vadd.f32 %v5751_v49, %v5678_v58  ;;  %v2823_v38 = vpop.f32.mrf.mxu2 }
 0x48a   : > { %v2722_v17 = vadd.f32 %v5753_v24, %v2617_v31  ;;  %v2627_v24 = vadd.f32 %v5761_v42, %v5687_v50 }
 0x48c   : > { %v3211_v60 = vpop.trf.xlu0  ;;  %v2734_v40 = vadd.f32 %v5764_v18, %v2627_v24 }
 0x48d   : > { %2208 = vrot.lane.b32.xlu2 %v2187_v62, %s4991_s25  ;;  %v5941_v23 = vpop.permute.xlu1 %2254 }
 0x48e   : > { %2145 = vrot.lane.b32.xlu0 %v2123_v5, %s4992_s26  ;;  %v2905_v5 = vpop.f32.mrf.mxu3 }
 0x490   : > { %3069 = vmatmul.f32.gmra.mxu0 %v2982_v9  ;;  %3115 = vmatmul.f32.gmra.mxu1 %v2991_v43  ;;  %v2824_v43 = vadd.f32 %v2823_v38, %v2722_v17 }
 0x495   : > { %3531 = vrot.lane.b32.xlu2 %v3211_v60, %s4989_s18  ;;  %v5945_v62 = vpop.permute.xlu1 %2260  ;;  %v2906_v60 = vadd.f32 %v2905_v5, %v2824_v43  ;;  %v2053_v5 = vld [vmem:[#allocation2 + $0x13] sm:$0x1] }
 0x496   : > { %2256 = vrot.lane.b32.xlu0 %v2235_v7, %s4992_s26  ;;  %v2909_v49 = vpop.f32.mrf.mxu3 }
 0x498   : > { %3074 = vmatmul.f32.gmra.mxu0 %v2990_v10  ;;  %3121 = vmatmul.f32.gmra.mxu1 %v2999_v3  ;;  %v2728_v10 = vadd.f32 %v5758_v59, %v2622_v8  ;;  %v2827_v3 = vpop.f32.mrf.mxu2 }
 0x49a   : > { %v2828_v58 = vadd.f32 %v2827_v3, %v2728_v10 }
 0x49d   : > { %2147 = vrot.lane.b32.xlu2 %v2124_v53, %s4992_s26  ;;  %v5964_v53 = vpop.trf.xlu0 }
 0x49e   : > { %v2913_v11 = vpop.f32.mrf.mxu3 }
 0x4a0   : > { %3079 = vmatmul.f32.gmra.mxu0 %v2998_v54  ;;  %3179 = vmatmul.f32.vlgmr.msrb.gmra.mxu1 %v5898_v19  ;;  %v2910_v54 = vadd.f32 %v2909_v49, %v2828_v58  ;;  %v2831_v7 = vpop.f32.mrf.mxu2 }
 0x4a1   : > { %v2832_v59 = vadd.f32 %v2831_v7, %v2734_v40  ;;  %v2058_v7 = vld [vmem:[#allocation2 + $0x63] sm:$0x1] }
 0x4a5   : > { %2258 = vrot.lane.b32.xlu2 %v2236_v32, %s4992_s26  ;;  %v3243_v4 = vpop.trf.xlu2  ;;  %v2914_v32 = vadd.f32 %v2913_v11, %v2832_v59 }
 0x4a6   : > { %3535 = vrot.lane.b32.xlu1 %v3243_v4, %s4989_s18  ;;  %v2917_v31 = vpop.f32.mrf.mxu3 }
 0x4a8   : > { %3145 = vmatmul.f32.vlgmr.msrb.gmra.mxu0 %v5898_v19  ;;  %3183 = vmatmul.f32.gmra.mxu1 %v5907_v1  ;;  %v2632_v19 = vadd.f32 %v5768_v28, %v5691_v14  ;;  %v2835_v42 = vpop.f32.mrf.mxu2 }
 0x4aa   : > { %v2740_v50 = vadd.f32 %v5772_v13, %v2632_v19  ;;  %v1946_v13 = vld [vmem:[#allocation2 + $0x50] sm:$0x1] }
 0x4ab   : > { %v1954_v8 = vadd.f32 %v1946_v13, %v5873_v46  ;;  %v1948_v13 = vld [vmem:[#allocation2 + $0x70] sm:$0x1] }
 0x4ac   : > { %v2836_v18 = vadd.f32 %v2835_v42, %v2740_v50  ;;  %v2171_v42 = vld [vmem:[#allocation2 + $0x76] sm:$0x1] }
 0x4ad   : > { %v5969_v4 = vpop.trf.xlu2  ;;  %v2002_v58 = vadd.f32 %v5865_v61, %v1954_v8 }
 0x4ae   : > { %v2918_v14 = vadd.f32 %v2917_v31, %v2836_v18  ;;  %v2170_v18 = vld [vmem:[#allocation2 + $0x66] sm:$0x1] }
 0x4af   : > { %v2178_v61 = vadd.f32 %v2170_v18, %v5883_v30 }
 0x4b0   : > { %v3275_v9 = vpop.trf.xlu1  ;;  %3149 = vmatmul.f32.gmra.mxu0 %v5907_v1  ;;  %3187 = vmatmul.f32.gmra.mxu1 %v5916_v47  ;;  %v1941_v1 = vld [vmem:[#allocation2] sm:$0x1] }
 0x4b1   : > { %3539 = vrot.lane.b32.xlu1 %v3275_v9, %s4989_s18  ;;  %v1949_v38 = vadd.f32 %v1941_v1, %v5873_v46  ;;  %v1947_v9 = vld [vmem:[#allocation2 + $0x60] sm:$0x1] }
 0x4b2   : > { %v1955_v10 = vadd.f32 %v1947_v9, %v5873_v46  ;;  %v1956_v9 = vadd.f32 %v1948_v13, %v5873_v46 }
 0x4b8   : > { %3291 = vxpose.xlu0.b32.start [1/2] (short) (narrow) %v2906_v60, 16  ;;  %3153 = vmatmul.f32.gmra.mxu0 %v5916_v47 }
 0x4b9   : > { %3191 = vmatmul.f32.gmra.mxu1 %v5924_v45 }
 0x4c0   : > { %3292 = vxpose.xlu0.b32.end [2/2] (short) (narrow) %v2910_v54, 16  ;;  %3157 = vmatmul.f32.gmra.mxu0 %v5924_v45  ;;  %v2050_v45 = vadd.f32 %v5879_v44, %v2002_v58 }
 0x4c2   : > { %v2066_v11 = vadd.f32 %v2058_v7, %v2050_v45 }
 0x4cb   : > { %3323 = vxpose.xlu2.b32.start [1/2] (short) (narrow) %v2914_v32, 16 }
 0x4d0   : > { %v1974_v17 = vpop.permute.xlu0 %1973 }
 0x4d1   : > { %v1997_v28 = vadd.f32 %v1974_v17, %v1949_v38  ;;  %v5987_v17 = vpop.f32.mrf.mxu0 }
 0x4d3   : > { %v2045_v47 = vadd.f32 %v5869_v34, %v1997_v28  ;;  %3324 = vxpose.xlu2.b32.end [2/2] (short) (narrow) %v2918_v14, 16  ;;  %v2059_v34 = vld [vmem:[#allocation2 + $0x73] sm:$0x1]  ;;  %v5989_v14 = vpop.f32.mrf.mxu1  ;;  %v5991_v28 = vld [vmem:[#allocation2 + $0x10] sm:$0x1] }
 0x4d5   : > { %v5974_v43 = vadd.f32 %v2053_v5, %v2045_v47  ;;  %v3276_v5 = vpop.trf.xlu1 }
 0x4d7   : > { %v1988_v60 = vpop.permute.xlu2 %1987 }
 0x4d8   : > { %v1986_v3 = vpop.permute.xlu0 %1985  ;;  %v2004_v8 = vadd.f32 %v1988_v60, %v1956_v9 }
 0x4d9   : > { %v2003_v49 = vadd.f32 %v1986_v3, %v1955_v10  ;;  %v2979_v30 = vpop.f32.mrf.mxu0 }
 0x4db   : > { %v2051_v24 = vadd.f32 %v5930_v2, %v2003_v49  ;;  %v3029_v10 = vpop.f32.mrf.mxu1  ;;  %v2060_v49 = vld [vmem:[#allocation2 + $0x83] sm:$0x1] }
 0x4dd   : > { %v2067_v54 = vadd.f32 %v2059_v34, %v2051_v24 }
 0x4df   : > { %v2098_v40 = vpop.permute.xlu2 %2097 }
 0x4e0   : > { %v2115_v59 = vadd.f32 %v2098_v40, %v2067_v54  ;;  %v2096_v19 = vpop.permute.xlu0 %2095  ;;  %v2100_v24 = vpop.permute.xlu1 %2099 }
 0x4e1   : > { %v2114_v32 = vadd.f32 %v2096_v19, %v2066_v11  ;;  %v2987_v54 = vpop.f32.mrf.mxu0  ;;  %v2173_v19 = vld [vmem:[#allocation2 + $0x96] sm:$0x1] }
 0x4e3   : > { %v2162_v50 = vadd.f32 %v5935_v12, %v2114_v32  ;;  %v3033_v11 = vpop.f32.mrf.mxu1 }
 0x4e5   : > { %v2179_v1 = vadd.f32 %v2171_v42, %v2162_v50 }
 0x4e7   : > { %v2209_v31 = vpop.permute.xlu2 %2208 }
 0x4e8   : > { %v5983_v38 = vadd.f32 %v2209_v31, %v2179_v1  ;;  %v2207_v44 = vpop.permute.xlu0 %2206 }
 0x4e9   : > { %v5985_v2 = vadd.f32 %v2207_v44, %v2178_v61 }
 0x4eb   : > { %v3037_v60 = vpop.f32.mrf.mxu1 }
 0x4ef   : > { %v3532_v47 = vpop.permute.xlu2 %3531  ;;  %v2995_v18 = vpop.f32.mrf.mxu0 }
 0x4f0   : > { %3579 = vst.msk [vmem:[#allocation2 + $0x10] sm:$0xff] %vm1902_vm5, %v3532_v47  ;;  %v2213_v12 = vpop.permute.xlu0 %2212  ;;  %v3038_v31 = vadd.f32 %v3037_v60, %v2995_v18  ;;  %v3030_v18 = vadd.f32 %v3029_v10, %v2979_v30 }
 0x4f5   : > { %v3041_v44 = vpop.f32.mrf.mxu1 }
 0x4f7   : > { %v2148_v7 = vpop.permute.xlu2 %2147 }
 0x4f8   : > { %v2036_v3 = vpop.permute.xlu0 %2035 }
 0x4f9   : > { %v2052_v58 = vadd.f32 %v2036_v3, %v2004_v8 }
 0x4fb   : > { %v2068_v45 = vadd.f32 %v2060_v49, %v2052_v58 }
 0x4fd   : > { %v2116_v34 = vadd.f32 %v2100_v24, %v2068_v45  ;;  %v3003_v61 = vpop.f32.mrf.mxu0  ;;  %v3104_v9 = vpop.f32.mrf.mxu1 }
 0x4fe   : > { %v3042_v47 = vadd.f32 %v3041_v44, %v3003_v61 }
 0x4ff   : > { %v2164_v40 = vadd.f32 %v2148_v7, %v2116_v34 }
 0x500   : > { %v2146_v32 = vpop.permute.xlu0 %2145 }
 0x501   : > { %v2181_v50 = vadd.f32 %v2173_v19, %v2164_v40  ;;  %v5995_v42 = vadd.f32 %v2146_v32, %v2115_v59  ;;  %v2839_v40 = vpop.f32.mrf.mxu2  ;;  %v2921_v19 = vpop.f32.mrf.mxu3 }
 0x502   : > { %v2840_v32 = vadd.f32 %v2839_v40, %v5779_v15 }
 0x503   : > { %v5997_v1 = vadd.f32 %v2213_v12, %v2181_v50 }
 0x504   : > { %v2922_v50 = vadd.f32 %v2921_v19, %v2840_v32 }
 0x505   : > { %v3065_v13 = vpop.f32.mrf.mxu0  ;;  %v3110_v3 = vpop.f32.mrf.mxu1 }
 0x508   : > { %v6010_v44 = vpop.permute.xlu0 %2256 }
 0x509   : > { %v2843_v60 = vpop.f32.mrf.mxu2  ;;  %v2925_v61 = vpop.f32.mrf.mxu3 }
 0x50d   : > { %v3070_v8 = vpop.f32.mrf.mxu0  ;;  %v3116_v45 = vpop.f32.mrf.mxu1 }
 0x515   : > { %v3075_v58 = vpop.f32.mrf.mxu0  ;;  %v3122_v12 = vpop.f32.mrf.mxu1 }
 0x516   : > { %v3076_v49 = vadd.f32 %v3075_v58, %v3038_v31  ;;  %v2844_v31 = vadd.f32 %v2843_v60, %v5785_v37  ;;  %v2662_v60 = vadd.f32 %v5987_v17, %v5717_v51  ;;  %v6028_v17 = vld [vmem:[#allocation2 + $0x33] sm:$0x1] }
 0x518   : > { %v5999_v24 = vadd.f32 %v3116_v45, %v3076_v49  ;;  %v2926_v58 = vadd.f32 %v2925_v61, %v2844_v31  ;;  %v3034_v49 = vadd.f32 %v3033_v11, %v2987_v54  ;;  %v2847_v11 = vpop.f32.mrf.mxu2  ;;  %v6022_v61 = vld [vmem:[#allocation2 + $0x20] sm:$0x1] }
 0x51a   : > { %v3071_v45 = vadd.f32 %v3070_v8, %v3034_v49  ;;  %v2166_v49 = vld [vmem:[#allocation2 + $0x26] sm:$0x1] }
 0x51c   : > { %v3111_v30 = vadd.f32 %v3110_v3, %v3071_v45 }
 0x51d   : > { %v3080_v34 = vpop.f32.mrf.mxu0 }
 0x51e   : > { %v3081_v59 = vadd.f32 %v3080_v34, %v3042_v47 }
 0x520   : > { %v6003_v7 = vadd.f32 %v3122_v12, %v3081_v59  ;;  %v6012_v59 = vpop.permute.xlu2 %2258  ;;  %v2851_v8 = vpop.f32.mrf.mxu2 }
 0x525   : > { %v3146_v47 = vpop.f32.mrf.mxu0 }
 0x528   : > { %v2855_v32 = vpop.f32.mrf.mxu2 }
 0x529   : > { %v2856_v3 = vadd.f32 %v2855_v32, %v5803_v39 }
 0x52d   : > { %v3150_v37 = vpop.f32.mrf.mxu0 }
 0x52e   : > { %3533 = vrot.lane.b32.xlu0 %v5964_v53, %s4989_s18  ;;  %v3066_v53 = vadd.f32 %v3065_v13, %v3030_v18  ;;  %v3151_v13 = vadd.f32 %v3150_v37, %v3111_v30 }
 0x53c   : > { %3537 = vrot.lane.b32.xlu2 %v5969_v4, %s4989_s18  ;;  %v3105_v4 = vadd.f32 %v3104_v9, %v3066_v53  ;;  %v2929_v9 = vpop.f32.mrf.mxu3  ;;  %v2776_v53 = vadd.f32 %v5989_v14, %v2662_v60  ;;  %v6030_v14 = vld [vmem:[#allocation2 + $0x36] sm:$0x1] }
 0x53e   : > { %v3147_v34 = vadd.f32 %v3146_v47, %v3105_v4  ;;  %v2859_v47 = vpop.f32.mrf.mxu2 }
 0x53f   : > { %v2860_v39 = vadd.f32 %v2859_v47, %v2776_v53 }
 0x544   : > { %3541 = vrot.lane.b32.xlu2 %v3276_v5, %s4989_s18  ;;  %v3180_v5 = vpop.f32.mrf.mxu1  ;;  %v2933_v19 = vpop.f32.mrf.mxu3 }
 0x545   : > { %v3181_v10 = vadd.f32 %v3180_v5, %v3147_v34  ;;  %v2848_v5 = vadd.f32 %v2847_v11, %v5792_v22 }
 0x54c   : > { %v3184_v12 = vpop.f32.mrf.mxu1  ;;  %v2937_v18 = vpop.f32.mrf.mxu3 }
 0x54d   : > { %v3185_v54 = vadd.f32 %v3184_v12, %v3151_v13  ;;  %v2938_v31 = vadd.f32 %v2937_v18, %v2856_v3  ;;  %v3154_v12 = vpop.f32.mrf.mxu0 }
 0x550   : > { %3355 = vxpose.xlu0.b32.start [1/2] (short) (narrow) %v2922_v50, 16  ;;  %v6016_v50 = vpop.permute.xlu1 %2210 }
 0x554   : > { %v2941_v34 = vpop.f32.mrf.mxu3 }
 0x555   : > { %v2942_v51 = vadd.f32 %v2941_v34, %v2860_v39  ;;  %v3158_v32 = vpop.f32.mrf.mxu0 }
 0x556   : > { %v3159_v18 = vadd.f32 %v3158_v32, %v6003_v7 }
 0x558   : > { %3356 = vxpose.xlu0.b32.end [2/2] (short) (narrow) %v2926_v58, 16  ;;  %v6024_v58 = vld [vmem:[#allocation2 + $0x23] sm:$0x1]  ;;  %v3536_v4 = vpop.permute.xlu1 %3535 }
 0x559   : > { %3581 = vst.msk [vmem:[#allocation2 + $0x20] sm:$0xff] %vm1902_vm5, %v3536_v4  ;;  %v2109_v4 = vadd.f32 %v5836_v21, %v5974_v43 }
 0x55b   : > { %v2157_v39 = vadd.f32 %v5855_v56, %v2109_v4  ;;  %v4257_v56 = vlaneseq }
 0x55c   : > { %v3307_v15 = vpop.trf.xlu0 }
 0x55d   : > { %3543 = vrot.lane.b32.xlu1 %v3307_v15, %s4989_s18  ;;  %v2930_v15 = vadd.f32 %v2929_v9, %v2848_v5  ;;  %v2174_v34 = vadd.f32 %v2166_v49, %v2157_v39 }
 0x560   : > { %3451 = vxpose.xlu0.b32.start [1/2] (short) (narrow) %v3181_v10, 16  ;;  %v3540_v30 = vpop.permute.xlu1 %3539  ;;  %v2852_v10 = vadd.f32 %v2851_v8, %v5797_v63  ;;  %v3745_v39 = vld [vmem:[#allocation2 + $0x24] sm:$0x1] }
 0x561   : > { %3583 = vst.msk [vmem:[#allocation2 + $0x30] sm:$0xff] %vm1902_vm5, %v3540_v30  ;;  %v3792_v30 = vld [vmem:[#allocation2 + $0x15] sm:$0x1] }
 0x562   : > { %v2934_v22 = vadd.f32 %v2933_v19, %v2852_v10  ;;  %v6039_v19 = vld [vmem:[#allocation2 + $0x46] sm:$0x1] }
 0x564   : > { %v3339_v40 = vpop.trf.xlu2  ;;  %v3308_v37 = vpop.trf.xlu0 }
 0x565   : > { %3547 = vrot.lane.b32.xlu2 %v3339_v40, %s4989_s18  ;;  %v3188_v40 = vpop.f32.mrf.mxu1 }
 0x568   : > { %3452 = vxpose.xlu0.b32.end [2/2] (short) (narrow) %v3185_v54, 16  ;;  %v3155_v54 = vadd.f32 %v3154_v12, %v5999_v24  ;;  %v3635_v21 = vld [vmem:[#allocation2 + $0x31] sm:$0x1]  ;;  %v3746_v12 = vld [vmem:[#allocation2 + $0x34] sm:$0x1] }
 0x56a   : > { %v3189_v11 = vadd.f32 %v3188_v40, %v3155_v54 }
 0x56c   : > { %v3340_v45 = vpop.trf.xlu2 }
 0x56d   : > { %v3192_v3 = vpop.f32.mrf.mxu1 }
 0x56e   : > { %v3193_v60 = vadd.f32 %v3192_v3, %v3159_v18 }
 0x58b   : > { %3419 = vxpose.xlu2.b32.start [1/2] (short) (narrow) %v2938_v31, 16 }
 0x592   : > { %3387 = vxpose.xlu1.b32.start [1/2] (short) (narrow) %v2930_v15, 16  ;;  %v3681_v15 = vld [vmem:[#allocation2 + $0x12] sm:$0x1] }
 0x593   : > { %3420 = vxpose.xlu2.b32.end [2/2] (short) (narrow) %v2942_v51, 16  ;;  %v2222_v51 = vadd.f32 %v5832_v20, %v2174_v34  ;;  %v6059_v20 = vshrl.u32 %v4257_v56, 7  ;;  %v3682_v56 = vld [vmem:[#allocation2 + $0x22] sm:$0x1] }
 0x596   : > { %v3538_v13 = vpop.permute.xlu2 %3537 }
 0x597   : > { %3582 = vst.msk [vmem:[#allocation2 + $0x28] sm:$0xff] %vm1902_vm5, %v3538_v13 }
 0x59a   : > { %3388 = vxpose.xlu1.b32.end [2/2] (short) (narrow) %v2934_v22, 16 }
 0x59e   : > { %v3542_v63 = vpop.permute.xlu2 %3541 }
 0x59f   : > { %3584 = vst.msk [vmem:[#allocation2 + $0x38] sm:$0xff] %vm1902_vm5, %v3542_v63  ;;  %v3633_v63 = vld [vmem:[#allocation2 + $0x11] sm:$0x1] }
 0x5a0   : > { %v3534_v9 = vpop.permute.xlu0 %3533 }
 0x5a2   : > { %3483 = vxpose.xlu1.b32.start [1/2] (short) (narrow) %v3189_v11, 16  ;;  %v3857_v11 = vld [vmem:[#allocation2 + $0x37] sm:$0x1] }
 0x5aa   : > { %3484 = vxpose.xlu1.b32.end [2/2] (short) (narrow) %v3193_v60, 16 }
 0x5bf   : > { %v3548_v8 = vpop.permute.xlu2 %3547 }
 0x5c0   : > { %3587 = vst.msk [vmem:[#allocation2 + $0x50] sm:$0xff] %vm1902_vm5, %v3548_v8  ;;  %v3634_v8 = vld [vmem:[#allocation2 + $0x21] sm:$0x1] }
 0x5cf   : > { %v3544_v31 = vpop.permute.xlu1 %3543 }
 0x5d0   : > { %3585 = vst.msk [vmem:[#allocation2 + $0x40] sm:$0xff] %vm1902_vm5, %v3544_v31 }
 0x5d6   : > { %3545 = vrot.lane.b32.xlu0 %v3308_v37, %s4989_s18 }
 0x5d7   : > { %v3684_v60 = vld [vmem:[#allocation2 + $0x42] sm:$0x1] }
 0x5f4   : > { %v3371_v24 = vpop.trf.xlu0 }
 0x5f5   : > { %3551 = vrot.lane.b32.xlu0 %v3371_v24, %s4989_s18  ;;  %4839 = vset.pattern.permute.xlu2 %v6059_v20 }
 0x5fc   : > { %v3372_v7 = vpop.trf.xlu0 }
 0x5fd   : > { %3553 = vrot.lane.b32.xlu2 %v3372_v7, %s4989_s18  ;;  %4837 = vset.pattern.permute.xlu1 %v6059_v20 }
 0x604   : > { %v3467_v53 = vpop.trf.xlu0  ;;  %3549 = vrot.lane.b32.xlu1 %v3340_v45, %s4989_s18  ;;  %v2270_v45 = vadd.f32 %v5863_v29, %v2222_v51  ;;  %v6062_v29 = vadd.s32 8, %v6059_v20 }
 0x605   : > { %3597 = vrot.lane.b32.xlu0 %v3467_v53, %s4989_s18  ;;  %v3795_v53 = vld [vmem:[#allocation2 + $0x45] sm:$0x1] }
 0x606   : > { %v4775_v10 = vmul.f32 -1.442695, %v2270_v45  ;;  %4838 = vset.pattern.permute.xlu0 %v6062_v29 }
 0x608   : > { %4853 = vpow2.f32 %v4775_v10  ;;  %v3856_v10 = vld [vmem:[#allocation2 + $0x27] sm:$0x1] }
 0x60c   : > { %v3468_v47 = vpop.trf.xlu0 }
 0x60d   : > { %3599 = vrot.lane.b32.xlu2 %v3468_v47, %s4989_s18 }
 0x60e   : > { %v4854_v49 = vpop.eup %4853 }
 0x60f   : > { %v3976_v13 = vadd.f32 1.0, %v4854_v49 }
 0x611   : > { %4855 = vrcp.f32 %v3976_v13  ;;  %v3995_v47 = vand.u32 2147483648, %v3976_v13  ;;  %vm3989_vm7 = vweird.f32 %v3976_v13  ;;  %v3993_v4 = vand.u32 2147483647, %v3976_v13 }
 0x613   : > { %vm3994_vm9 = vcmp.eq.f32.partialorder %v3993_v4, 8.507059e+37  ;;  %v3747_v4 = vld [vmem:[#allocation2 + $0x44] sm:$0x1] }
 0x617   : > { %v4856_v54 = vpop.eup %4855 }
 0x618   : > { %v3985_v18 = vmul.f32 %v4856_v54, %v3976_v13  ;;  %vm3990_vm6 = vweird.f32 %v4856_v54 }
 0x619   : > { %vm3991_vm8 = vmor %vm3989_vm7, %vm3990_vm6 }
 0x61a   : > { %v3986_v3 = vsub.f32 1.0, %v3985_v18  ;;  %v6097_v18 = vld [vmem:[#allocation2 + $0x86] sm:$0x1] }
 0x61c   : > { %v3987_v31 = vmul.f32 %v4856_v54, %v3986_v3 }
 0x61e   : > { %v3988_v7 = vadd.f32 %v4856_v54, %v3987_v31  ;;  %v3636_v31 = vld [vmem:[#allocation2 + $0x41] sm:$0x1] }
 0x620   : > { %v3992_v34 = vsel %vm3991_vm8, %v4856_v54, %v3988_v7 }
 0x624   : > { %v3435_v5 = vpop.trf.xlu2 }
 0x625   : > { %3559 = vrot.lane.b32.xlu2 %v3435_v5, %s4989_s18  ;;  %v3744_v5 = vld [vmem:[#allocation2 + $0x14] sm:$0x1] }
 0x62c   : > { %v3436_v9 = vpop.trf.xlu2 }
 0x62d   : > { %3698 = vrot.lane.b32.xlu2 %v3681_v15, %s4992_s26  ;;  %v3996_v15 = vor.u32 1.1754944e-38, %v3995_v47  ;;  %v1951_v47 = vadd.f32 %v6022_v61, %v5873_v46 }
 0x62f   : > { %v6080_v51 = vsel %vm3994_vm9, %v3996_v15, %v3992_v34  ;;  %v3858_v15 = vld [vmem:[#allocation2 + $0x47] sm:$0x1] }
 0x635   : > { %3808 = vrot.lane.b32.xlu2 %v3792_v30, %s4992_s26  ;;  %v4392_v30 = vperm.slane %v6080_v51, 0 }
 0x636   : > { %v3403_v37 = vpop.trf.xlu1 }
 0x637   : > { %3555 = vrot.lane.b32.xlu1 %v3403_v37, %s4989_s18 }
 0x63d   : > { %3654 = vrot.lane.b32.xlu2 %v3635_v21, %s4991_s25 }
 0x63e   : > { %v3404_v43 = vpop.trf.xlu1 }
 0x63f   : > { %3557 = vrot.lane.b32.xlu0 %v3404_v43, %s4989_s18  ;;  %v3683_v43 = vld [vmem:[#allocation2 + $0x32] sm:$0x1] }
 0x645   : > { %3764 = vrot.lane.b32.xlu2 %v3746_v12, %s4991_s25  ;;  %v3793_v12 = vld [vmem:[#allocation2 + $0x25] sm:$0x1] }
 0x646   : > { %v3499_v22 = vpop.trf.xlu1 }
 0x647   : > { %3607 = vrot.lane.b32.xlu1 %v3499_v22, %s4989_s18  ;;  %v3794_v22 = vld [vmem:[#allocation2 + $0x35] sm:$0x1] }
 0x648   : > { %v3546_v40 = vpop.permute.xlu0 %3545 }
 0x649   : > { %3586 = vst.msk [vmem:[#allocation2 + $0x48] sm:$0xff] %vm1902_vm5, %v3546_v40 }
 0x64d   : > { %3874 = vrot.lane.b32.xlu2 %v3857_v11, %s4991_s25 }
 0x64e   : > { %v3500_v32 = vpop.trf.xlu1 }
 0x64f   : > { %3561 = vrot.lane.b32.xlu1 %v3436_v9, %s4989_s18  ;;  %3609 = vrot.lane.b32.xlu0 %v3500_v32, %s4989_s18  ;;  %v3904_v9 = vld [vmem:[#allocation2 + $0x28] sm:$0x1]  ;;  %v3905_v32 = vld [vmem:[#allocation2 + $0x38] sm:$0x1] }
 0x650   : > { %v3906_v45 = vld [vmem:[#allocation2 + $0x48] sm:$0x1] }
 0x655   : > { %3704 = vrot.lane.b32.xlu2 %v3684_v60, %s4992_s26  ;;  %v1950_v60 = vadd.f32 %v5991_v28, %v5873_v46  ;;  %v3748_v28 = vld [vmem:[#allocation2 + $0x54] sm:$0x1]  ;;  %v3859_v46 = vld [vmem:[#allocation2 + $0x57] sm:$0x1] }
 0x657   : > { %3650 = vrot.lane.b32.xlu1 %v3633_v63, %s4991_s25  ;;  %3652 = vrot.lane.b32.xlu0 %v3634_v8, %s4991_s25  ;;  %v3554_v24 = vpop.permute.xlu2 %3553  ;;  %v1998_v8 = vadd.f32 %v5834_v36, %v1950_v60  ;;  %v1999_v36 = vadd.f32 %v5819_v35, %v1951_v47 }
 0x658   : > { %3590 = vst.msk [vmem:[#allocation2 + $0x68] sm:$0xff] %vm1902_vm5, %v3554_v24  ;;  %v3637_v24 = vld [vmem:[#allocation2 + $0x51] sm:$0x1] }
 0x659   : > { %v2046_v7 = vadd.f32 %v5843_v6, %v1998_v8  ;;  %v2274_v8 = vadd.f32 %v5941_v23, %v5985_v2 }
 0x65d   : > { %3814 = vrot.lane.b32.xlu2 %v3795_v53, %s4992_s26  ;;  %v2062_v53 = vadd.f32 %v6024_v58, %v2046_v7 }
 0x65f   : > { %3760 = vrot.lane.b32.xlu1 %v3744_v5, %s4991_s25  ;;  %3762 = vrot.lane.b32.xlu0 %v3745_v39, %s4991_s25  ;;  %v2110_v5 = vadd.f32 %v5827_v48, %v2062_v53  ;;  %v2047_v39 = vadd.f32 %v5845_v25, %v1999_v36 }
 0x661   : > { %v2158_v6 = vadd.f32 %v5857_v0, %v2110_v5  ;;  %v2063_v34 = vadd.f32 %v6028_v17, %v2047_v39  ;;  %v3685_v17 = vld [vmem:[#allocation2 + $0x52] sm:$0x1] }
 0x663   : > { %v2175_v58 = vadd.f32 %v6030_v14, %v2158_v6  ;;  %v2111_v61 = vadd.f32 %v5867_v27, %v2063_v34 }
 0x665   : > { %3924 = vrot.lane.b32.xlu2 %v3906_v45, %s4992_s26  ;;  %v2223_v35 = vadd.f32 %v5871_v52, %v2175_v58  ;;  %v2159_v48 = vadd.f32 %v5847_v16, %v2111_v61  ;;  %v3796_v16 = vld [vmem:[#allocation2 + $0x55] sm:$0x1] }
 0x667   : > { %v3552_v37 = vpop.permute.xlu0 %3551  ;;  %4397 = vperm.xlu1 %4837, %v4392_v30   ;;  %3872 = vrot.lane.b32.xlu0 %v3856_v10, %s4991_s25  ;;  %v3600_v21 = vpop.permute.xlu2 %3599  ;;  %v2271_v25 = vadd.f32 %v5861_v33, %v2223_v35  ;;  %v2176_v10 = vadd.f32 %v6039_v19, %v2159_v48 }
 0x668   : > { %3589 = vst.msk [vmem:[#allocation2 + $0x60] sm:$0xff] %vm1902_vm5, %v3552_v37 }
 0x669   : > { %v4776_v14 = vmul.f32 -1.442695, %v2271_v25  ;;  %v2224_v37 = vadd.f32 %v5876_v41, %v2176_v10  ;;  %v2275_v25 = vadd.f32 %v6010_v44, %v5983_v38 }
 0x66b   : > { %4857 = vpow2.f32 %v4776_v14  ;;  %v2272_v52 = vadd.f32 %v5928_v26, %v2224_v37  ;;  %v2273_v26 = vadd.f32 %v5938_v55, %v5881_v57  ;;  %v4780_v38 = vmul.f32 -1.442695, %v2275_v25 }
 0x66d   : > { %v4777_v33 = vmul.f32 -1.442695, %v2272_v52 }
 0x66f   : > { %3700 = vrot.lane.b32.xlu1 %v3682_v56, %s4992_s26  ;;  %3702 = vrot.lane.b32.xlu0 %v3683_v43, %s4992_s26  ;;  %v3638_v49 = vld [vmem:[#allocation2 + $0x61] sm:$0x1]  ;;  %v3749_v13 = vld [vmem:[#allocation2 + $0x64] sm:$0x1]  ;;  %v3860_v11 = vld [vmem:[#allocation2 + $0x67] sm:$0x1]  ;;  %4859 = vpow2.f32 %v4777_v33 }
 0x670   : > { %3660 = vrot.lane.b32.xlu2 %v3638_v49, %s4991_s25  ;;  %4840 = vset.pattern.permute.xlu1 %v6062_v29  ;;  %v3686_v0 = vld [vmem:[#allocation2 + $0x62] sm:$0x1]  ;;  %v3797_v21 = vld [vmem:[#allocation2 + $0x65] sm:$0x1]  ;;  %v3908_v49 = vld [vmem:[#allocation2 + $0x68] sm:$0x1] }
 0x671   : > { %v4858_v43 = vpop.eup %4857 }
 0x672   : > { %v6141_v41 = vadd.f32 1.0, %v4858_v43 }
 0x674   : > { %4861 = vrcp.f32 %v6141_v41  ;;  %v4010_v61 = vand.u32 2147483648, %v6141_v41  ;;  %vm4004_vm11 = vweird.f32 %v6141_v41  ;;  %v4008_v35 = vand.u32 2147483647, %v6141_v41 }
 0x676   : > { %v3550_v54 = vpop.permute.xlu1 %3549  ;;  %vm4009_vm13 = vcmp.eq.f32.partialorder %v4008_v35, 8.507059e+37 }
 0x677   : > { %3810 = vrot.lane.b32.xlu1 %v3793_v12, %s4992_s26  ;;  %3812 = vrot.lane.b32.xlu0 %v3794_v22, %s4992_s26  ;;  %v3598_v40 = vpop.permute.xlu0 %3597  ;;  %3588 = vst.msk [vmem:[#allocation2 + $0x58] sm:$0xff] %vm1902_vm5, %v3550_v54  ;;  %v4778_v54 = vmul.f32 -1.442695, %v2273_v26 }
 0x678   : > { %3770 = vrot.lane.b32.xlu2 %v3749_v13, %s4991_s25  ;;  %3603 = vst.msk [vmem:[#allocation2] sm:$0xff] %vm1902_vm5, %v3598_v40  ;;  %v4860_v40 = vpop.eup %4859 }
 0x679   : > { %4863 = vpow2.f32 %v4778_v54 }
 0x67a   : > { %v4862_v60 = vpop.eup %4861 }
 0x67b   : > { %vm4005_vm10 = vweird.f32 %v4862_v60 }
 0x67c   : > { %vm4006_vm12 = vmor %vm4004_vm11, %vm4005_vm10 }
 0x67e   : > { %v3907_v13 = vld [vmem:[#allocation2 + $0x58] sm:$0x1] }
 0x67f   : > { %v3560_v3 = vpop.permute.xlu2 %3559  ;;  %3920 = vrot.lane.b32.xlu1 %v3904_v9, %s4992_s26  ;;  %3922 = vrot.lane.b32.xlu0 %v3905_v32, %s4992_s26  ;;  %v3632_v63 = vld [vmem:[#allocation2 + $0x1] sm:$0x1]  ;;  %v6150_v9 = vadd.f32 1.0, %v4860_v40 }
 0x680   : > { %3593 = vst.msk [vmem:[#allocation2 + $0x80] sm:$0xff] %vm1902_vm5, %v3560_v3  ;;  %3880 = vrot.lane.b32.xlu2 %v3860_v11, %s4991_s25  ;;  %v3680_v11 = vld [vmem:[#allocation2 + $0x2] sm:$0x1] }
 0x681   : > { %4865 = vrcp.f32 %v6150_v9  ;;  %vm4019_vm15 = vweird.f32 %v6150_v9 }
 0x687   : > { %3656 = vrot.lane.b32.xlu1 %v3636_v31, %s4991_s25  ;;  %3658 = vrot.lane.b32.xlu0 %v3637_v24, %s4991_s25  ;;  %v6125_v45 = vpop.permute.xlu2 %3698  ;;  %v4864_v31 = vpop.eup %4863  ;;  %v3751_v7 = vld [vmem:[#allocation2 + $0x84] sm:$0x1]  ;;  %v3862_v58 = vld [vmem:[#allocation2 + $0x87] sm:$0x1]  ;;  %v3799_v43 = vld [vmem:[#allocation2 + $0x85] sm:$0x1] }
 0x688   : > { %3648 = vrot.lane.b32.xlu2 %v3632_v63, %s4991_s25  ;;  %v4000_v63 = vmul.f32 %v4862_v60, %v6141_v41  ;;  %v6162_v47 = vpop.eup %4865  ;;  %v6170_v23 = vadd.f32 1.0, %v4864_v31 }
 0x689   : > { %v4015_v6 = vmul.f32 %v6162_v47, %v6150_v9  ;;  %vm4020_vm14 = vweird.f32 %v6162_v47 }
 0x68a   : > { %v4001_v24 = vsub.f32 1.0, %v4000_v63  ;;  %vm4021_vm0 = vmor %vm4019_vm15, %vm4020_vm14 }
 0x68b   : > { %v4016_v34 = vsub.f32 1.0, %v4015_v6 }
 0x68c   : > { %v4002_v2 = vmul.f32 %v4862_v60, %v4001_v24  ;;  %v6216_v24 = vstv %s2283_s10 }
 0x68d   : > { %v4017_v52 = vmul.f32 %v6162_v47, %v4016_v34  ;;  %v4038_v34 = vand.u32 2147483647, %v6170_v23 }
 0x68f   : > { %3766 = vrot.lane.b32.xlu1 %v3747_v4, %s4991_s25  ;;  %3768 = vrot.lane.b32.xlu0 %v3748_v28, %s4991_s25  ;;  %v6133_v27 = vpop.permute.xlu2 %3808  ;;  %v4779_v4 = vmul.f32 -1.442695, %v2274_v8  ;;  %v4018_v41 = vadd.f32 %v6162_v47, %v4017_v52  ;;  %vm4039_vm7 = vcmp.eq.f32.partialorder %v4038_v34, 8.507059e+37 }
 0x691   : > { %4867 = vpow2.f32 %v4779_v4  ;;  %v4022_v54 = vsel %vm4021_vm0, %v6162_v47, %v4018_v41  ;;  %v4917_v4 = vld [vmem:[%s5502_s21] sm:$0xff] }
 0x692   : > { %4869 = vrcp.f32 %v6170_v23 }
 0x697   : > { %3876 = vrot.lane.b32.xlu1 %v3858_v15, %s4991_s25  ;;  %3878 = vrot.lane.b32.xlu0 %v3859_v46, %s4991_s25  ;;  %v6139_v19 = vpop.permute.xlu2 %3654  ;;  %v4003_v46 = vadd.f32 %v4862_v60, %v4002_v2  ;;  %v4868_v48 = vpop.eup %4867  ;;  %v4040_v2 = vand.u32 2147483648, %v6170_v23 }
 0x698   : > { %v6193_v33 = vadd.f32 1.0, %v4868_v48 }
 0x699   : > { %v4007_v37 = vsel %vm4006_vm12, %v4862_v60, %v4003_v46 }
 0x69a   : > { %4871 = vrcp.f32 %v6193_v33  ;;  %vm4049_vm9 = vweird.f32 %v6193_v33 }
 0x69b   : > { %4873 = vpow2.f32 %v4780_v38 }
 0x69f   : > { %3706 = vrot.lane.b32.xlu1 %v3685_v17, %s4992_s26  ;;  %3708 = vrot.lane.b32.xlu0 %v3686_v0, %s4992_s26  ;;  %v6152_v32 = vpop.permute.xlu2 %3764 }
 0x6a7   : > { %3816 = vrot.lane.b32.xlu1 %v3796_v16, %s4992_s26  ;;  %3818 = vrot.lane.b32.xlu0 %v3797_v21, %s4992_s26  ;;  %v6166_v28 = vpop.permute.xlu2 %3874  ;;  %v4011_v21 = vor.u32 1.1754944e-38, %v4010_v61  ;;  %v6191_v16 = vpop.eup %4869  ;;  %v4041_v61 = vor.u32 1.1754944e-38, %v4040_v2 }
 0x6a8   : > { %vm4035_vm3 = vweird.f32 %v6191_v16 }
 0x6a9   : > { %v3556_v56 = vpop.permute.xlu1 %3555  ;;  %v4012_v44 = vsel %vm4009_vm13, %v4011_v21, %v4007_v37 }
 0x6aa   : > { %3591 = vst.msk [vmem:[#allocation2 + $0x70] sm:$0xff] %vm1902_vm5, %v3556_v56  ;;  %v4405_v26 = vperm.slane %v4012_v44, 0 }
 0x6af   : > { %3928 = vrot.lane.b32.xlu0 %v3908_v49, %s4992_s26  ;;  %3926 = vrot.lane.b32.xlu1 %v3907_v13, %s4992_s26  ;;  %v6187_v10 = vpop.permute.xlu2 %3704  ;;  %v4030_v49 = vmul.f32 %v6191_v16, %v6170_v23  ;;  %v4025_v13 = vand.u32 2147483648, %v6150_v9 }
 0x6b1   : > { %v3558_v12 = vpop.permute.xlu0 %3557  ;;  %v3687_v22 = vld [vmem:[#allocation2 + $0x72] sm:$0x1]  ;;  %v3639_v3 = vld [vmem:[#allocation2 + $0x71] sm:$0x1]  ;;  %v3798_v55 = vld [vmem:[#allocation2 + $0x75] sm:$0x1] }
 0x6b2   : > { %3592 = vst.msk [vmem:[#allocation2 + $0x78] sm:$0xff] %vm1902_vm5, %v3558_v12  ;;  %3710 = vrot.lane.b32.xlu2 %v3687_v22, %s4992_s26  ;;  %v3750_v53 = vld [vmem:[#allocation2 + $0x74] sm:$0x1]  ;;  %v3861_v15 = vld [vmem:[#allocation2 + $0x77] sm:$0x1] }
 0x6b3   : > { %v4023_v12 = vand.u32 2147483647, %v6150_v9 }
 0x6b5   : > { %vm4024_vm2 = vcmp.eq.f32.partialorder %v4023_v12, 8.507059e+37 }
 0x6b7   : > { %3696 = vrot.lane.b32.xlu0 %v3680_v11, %s4992_s26  ;;  %3662 = vrot.lane.b32.xlu1 %v3639_v3, %s4991_s25  ;;  %v4031_v11 = vsub.f32 1.0, %v4030_v49  ;;  %v4026_v3 = vor.u32 1.1754944e-38, %v4025_v13  ;;  %v6208_v60 = vpop.permute.xlu2 %3814 }
 0x6b9   : > { %v3608_v57 = vpop.permute.xlu1 %3607  ;;  %v3909_v39 = vld [vmem:[#allocation2 + $0x78] sm:$0x1]  ;;  %v4032_v8 = vmul.f32 %v6191_v16, %v4031_v11 }
 0x6ba   : > { %3613 = vst.msk [vmem:[#allocation2 + $0x90] sm:$0xff] %vm1902_vm5, %v3608_v57  ;;  %3820 = vrot.lane.b32.xlu2 %v3798_v55, %s4992_s26  ;;  %v4027_v57 = vsel %vm4024_vm2, %v4026_v3, %v4022_v54  ;;  %v6210_v55 = vpop.eup %4871  ;;  %v3841_v54 = vld [vmem:[#allocation2 + $0x36] sm:$0x1] }
 0x6bb   : > { %v4874_v63 = vpop.eup %4873  ;;  %v4418_v31 = vperm.slane %v4027_v57, 0  ;;  %v4045_v51 = vmul.f32 %v6210_v55, %v6193_v33  ;;  %vm4050_vm8 = vweird.f32 %v6210_v55 }
 0x6bc   : > { %vm4051_vm10 = vmor %vm4049_vm9, %vm4050_vm8 }
 0x6bf   : > { %3774 = vrot.lane.b32.xlu0 %v3751_v7, %s4991_s25  ;;  %3772 = vrot.lane.b32.xlu1 %v3750_v53, %s4991_s25  ;;  %v3617_v7 = vld [vmem:[#allocation2 + $0x10] sm:$0x1] }
 0x6c0   : > { %v3625_v6 = vadd.f32 %v3617_v7, %v6216_v24 }
 0x6c1   : > { %v3610_v36 = vpop.permute.xlu0 %3609  ;;  %v3562_v5 = vpop.permute.xlu1 %3561  ;;  %v3863_v14 = vld [vmem:[#allocation2 + $0x97] sm:$0x1] }
 0x6c2   : > { %3614 = vst.msk [vmem:[#allocation2 + $0x98] sm:$0xff] %vm1902_vm5, %v3610_v36  ;;  %3930 = vrot.lane.b32.xlu2 %v3909_v39, %s4992_s26  ;;  %v6233_v39 = vpop.permute.xlu2 %3924 }
 0x6c3   : > { %3594 = vst.msk [vmem:[#allocation2 + $0x88] sm:$0xff] %vm1902_vm5, %v3562_v5  ;;  %v4033_v5 = vadd.f32 %v6191_v16, %v4032_v8  ;;  %vm4034_vm5 = vweird.f32 %v6170_v23 }
 0x6c4   : > { %vm4036_vm6 = vmor %vm4034_vm5, %vm4035_vm3 }
 0x6c5   : > { %v4037_v46 = vsel %vm4036_vm6, %v6191_v16, %v4033_v5 }
 0x6c6   : > { %v4042_v23 = vsel %vm4039_vm7, %v4041_v61, %v4037_v46 }
 0x6c7   : > { %3884 = vrot.lane.b32.xlu0 %v3862_v58, %s4991_s25  ;;  %3882 = vrot.lane.b32.xlu1 %v3861_v15, %s4991_s25  ;;  %v4046_v58 = vsub.f32 1.0, %v4045_v51  ;;  %v4431_v52 = vperm.slane %v4042_v23, 0 }
 0x6c9   : > { %v6183_v0 = vpop.permute.xlu0 %3652  ;;  %v6185_v17 = vpop.permute.xlu1 %3650  ;;  %v3911_v56 = vld [vmem:[#allocation2 + $0x98] sm:$0x1] }
 0x6ca   : > { %3886 = vrot.lane.b32.xlu2 %v3863_v14, %s4991_s25  ;;  %v3910_v9 = vld [vmem:[#allocation2 + $0x88] sm:$0x1]  ;;  %v3673_v15 = vadd.f32 %v6185_v17, %v3625_v6  ;;  %v4047_v14 = vmul.f32 %v6210_v55, %v4046_v58  ;;  %v3729_v17 = vld [vmem:[#allocation2 + $0x23] sm:$0x1]  ;;  %v6250_v21 = vpop.permute.xlu2 %3660 }
 0x6cc   : > { %v3721_v25 = vadd.f32 %v6125_v45, %v3673_v15  ;;  %v4048_v16 = vadd.f32 %v6210_v55, %v4047_v14  ;;  %v4055_v45 = vand.u32 2147483648, %v6193_v33 }
 0x6ce   : > { %v4056_v11 = vor.u32 1.1754944e-38, %v4055_v45 }
 0x6cf   : > { %3934 = vrot.lane.b32.xlu0 %v3911_v56, %s4992_s26  ;;  %3822 = vrot.lane.b32.xlu1 %v3799_v43, %s4992_s26  ;;  %v3737_v56 = vadd.f32 %v3729_v17, %v3721_v25  ;;  %v4053_v43 = vand.u32 2147483647, %v6193_v33 }
 0x6d1   : > { %v3763_v22 = vpop.permute.xlu0 %3762  ;;  %v6205_v40 = vpop.permute.xlu1 %3760  ;;  %vm4054_vm11 = vcmp.eq.f32.partialorder %v4053_v43, 8.507059e+37 }
 0x6d2   : > { %4410 = vperm.xlu2 %4839, %v4405_v26   ;;  %v3785_v44 = vadd.f32 %v3763_v22, %v3737_v56 }
 0x6d7   : > { %4403 = vperm.xlu0 %4838, %v4392_v30   ;;  %3932 = vrot.lane.b32.xlu1 %v3910_v9, %s4992_s26  ;;  %v6228_v30 = vadd.f32 1.0, %v4874_v63  ;;  %v6260_v9 = vpop.permute.xlu2 %3770 }
 0x6d9   : > { %v6218_v53 = vpop.permute.xlu0 %3872  ;;  %v4398_v47 = vpop.permute.xlu1 %4397  ;;  %4875 = vrcp.f32 %v6228_v30  ;;  %vm4064_vm13 = vweird.f32 %v6228_v30  ;;  %v4068_v5 = vand.u32 2147483647, %v6228_v30 }
 0x6da   : > { %v4496_v36 = vmul.f32 %v4917_v4, %v4398_v47  ;;  %4423 = vperm.xlu2 %4839, %v4418_v31   ;;  %v4070_v4 = vand.u32 2147483648, %v6228_v30 }
 0x6db   : > { %vm4069_vm15 = vcmp.eq.f32.partialorder %v4068_v5, 8.507059e+37 }
 0x6dc   : > { %4512 = vst.msk [vmem:[%s6224_s14] sm:$0xff] %vm2284_vm4, %v4496_v36  ;;  %v3619_v36 = vld [vmem:[#allocation2 + $0x30] sm:$0x1]  ;;  %v4071_v58 = vor.u32 1.1754944e-38, %v4070_v4 }
 0x6dd   : > { %v3627_v2 = vadd.f32 %v3619_v36, %v6216_v24 }
 0x6df   : > { %4841 = vset.pattern.permute.xlu0 %v6059_v20  ;;  %4416 = vperm.xlu1 %4840, %v4405_v26   ;;  %v4876_v37 = vpop.eup %4875  ;;  %v4052_v26 = vsel %vm4051_vm10, %v6210_v55, %v4048_v16  ;;  %v3618_v55 = vld [vmem:[#allocation2 + $0x20] sm:$0x1]  ;;  %v3675_v61 = vadd.f32 %v6139_v19, %v3627_v2  ;;  %v6274_v25 = vpop.permute.xlu2 %3880  ;;  %v3731_v16 = vld [vmem:[#allocation2 + $0x43] sm:$0x1] }
 0x6e0   : > { %v4060_v38 = vmul.f32 %v4876_v37, %v6228_v30  ;;  %v4057_v57 = vsel %vm4054_vm11, %v4056_v11, %v4052_v26  ;;  %vm4065_vm12 = vweird.f32 %v4876_v37  ;;  %v3626_v6 = vadd.f32 %v3618_v55, %v6216_v24 }
 0x6e1   : > { %v6245_v35 = vpop.permute.xlu0 %3702  ;;  %v3701_v48 = vpop.permute.xlu1 %3700  ;;  %v4444_v63 = vperm.slane %v4057_v57, 0  ;;  %vm4066_vm14 = vmor %vm4064_vm13, %vm4065_vm12 }
 0x6e2   : > { %4842 = vset.pattern.permute.xlu2 %v6062_v29  ;;  %v4061_v12 = vsub.f32 1.0, %v4060_v38  ;;  %v3674_v34 = vadd.f32 %v6183_v0, %v3626_v6  ;;  %v3723_v17 = vadd.f32 %v6245_v35, %v3675_v61 }
 0x6e4   : > { %v4062_v22 = vmul.f32 %v4876_v37, %v4061_v12  ;;  %v3722_v30 = vadd.f32 %v3701_v48, %v3674_v34  ;;  %v3739_v38 = vadd.f32 %v3731_v16, %v3723_v17  ;;  %v3842_v12 = vld [vmem:[#allocation2 + $0x46] sm:$0x1] }
 0x6e6   : > { %v4063_v47 = vadd.f32 %v4876_v37, %v4062_v22 }
 0x6e7   : > { %4436 = vperm.xlu0 %4841, %v4431_v52   ;;  %4429 = vperm.xlu1 %4840, %v4418_v31   ;;  %v6283_v43 = vpop.permute.xlu2 %3648 }
 0x6e9   : > { %v3813_v41 = vpop.permute.xlu0 %3812  ;;  %v3811_v49 = vpop.permute.xlu1 %3810 }
 0x6ea   : > { %v3833_v13 = vadd.f32 %v3811_v49, %v3785_v44  ;;  %4442 = vperm.xlu2 %4842, %v4431_v52  }
 0x6ec   : > { %v3849_v3 = vadd.f32 %v3841_v54, %v3833_v13 }
 0x6ee   : > { %v3897_v33 = vadd.f32 %v6166_v28, %v3849_v3  ;;  %v4067_v28 = vsel %vm4066_vm14, %v4876_v37, %v4063_v47  ;;  %v3730_v37 = vld [vmem:[#allocation2 + $0x33] sm:$0x1]  ;;  %v3620_v3 = vld [vmem:[#allocation2 + $0x40] sm:$0x1] }
 0x6ef   : > { %4843 = vset.pattern.permute.xlu1 %v6059_v20  ;;  %v6276_v23 = vsel %vm4069_vm15, %v4071_v58, %v4067_v28  ;;  %v3738_v0 = vadd.f32 %v3730_v37, %v3722_v30  ;;  %v3732_v58 = vld [vmem:[#allocation2 + $0x53] sm:$0x1] }
 0x6f0   : > { %v4457_v56 = vperm.slane %v6276_v23, 0 }
 0x6f1   : > { %v3923_v8 = vpop.permute.xlu0 %3922  ;;  %v6263_v31 = vpop.permute.xlu1 %3920  ;;  %v3786_v48 = vadd.f32 %v6152_v32, %v3738_v0  ;;  %v3628_v32 = vadd.f32 %v3620_v3, %v6216_v24  ;;  %v3844_v0 = vld [vmem:[#allocation2 + $0x66] sm:$0x1] }
 0x6f2   : > { %v3945_v7 = vadd.f32 %v3923_v8, %v3897_v33  ;;  %4455 = vperm.xlu2 %4842, %v4444_v63  }
 0x6f3   : > { %v3834_v49 = vadd.f32 %v3813_v41, %v3786_v48 }
 0x6f4   : > { %v4784_v51 = vmul.f32 -1.442695, %v3945_v7 }
 0x6f5   : > { %v3850_v11 = vadd.f32 %v3842_v12, %v3834_v49  ;;  %v3621_v12 = vld [vmem:[#allocation2 + $0x50] sm:$0x1] }
 0x6f6   : > { %4877 = vpow2.f32 %v4784_v51 }
 0x6f7   : > { %4449 = vperm.xlu1 %4843, %v4444_v63  }
 0x6f9   : > { %v6271_v15 = vpop.permute.xlu0 %3658  ;;  %v3657_v46 = vpop.permute.xlu1 %3656 }
 0x6fa   : > { %v3676_v51 = vadd.f32 %v3657_v46, %v3628_v32 }
 0x6fc   : > { %v4878_v14 = vpop.eup %4877  ;;  %v3724_v34 = vadd.f32 %v6187_v10, %v3676_v51  ;;  %v3843_v10 = vld [vmem:[#allocation2 + $0x56] sm:$0x1] }
 0x6fd   : > { %v4129_v52 = vadd.f32 1.0, %v4878_v14 }
 0x6fe   : > { %v3740_v30 = vadd.f32 %v3732_v58, %v3724_v34 }
 0x6ff   : > { %4879 = vrcp.f32 %v4129_v52  ;;  %4462 = vperm.xlu1 %4843, %v4457_v56   ;;  %v4162_v33 = vand.u32 2147483648, %v4129_v52  ;;  %v4160_v7 = vand.u32 2147483647, %v4129_v52  ;;  %vm4156_vm2 = vweird.f32 %v4129_v52 }
 0x701   : > { %v3769_v19 = vpop.permute.xlu0 %3768  ;;  %v3767_v45 = vpop.permute.xlu1 %3766  ;;  %v4163_v47 = vor.u32 1.1754944e-38, %v4162_v33  ;;  %vm4161_vm5 = vcmp.eq.f32.partialorder %v4160_v7, 8.507059e+37 }
 0x702   : > { %v3787_v44 = vadd.f32 %v3767_v45, %v3739_v38  ;;  %v3788_v46 = vadd.f32 %v3769_v19, %v3740_v30 }
 0x704   : > { %v3835_v35 = vadd.f32 %v6208_v60, %v3787_v44 }
 0x705   : > { %v4880_v13 = vpop.eup %4879 }
 0x706   : > { %v4152_v26 = vmul.f32 %v4880_v13, %v4129_v52  ;;  %vm4157_vm0 = vweird.f32 %v4880_v13  ;;  %v3851_v45 = vadd.f32 %v3843_v10, %v3835_v35  ;;  %v3629_v35 = vadd.f32 %v3621_v12, %v6216_v24 }
 0x707   : > { %vm4158_vm3 = vmor %vm4156_vm2, %vm4157_vm0 }
 0x708   : > { %v4153_v54 = vsub.f32 1.0, %v4152_v26 }
 0x709   : > { %v3879_v57 = vpop.permute.xlu0 %3878  ;;  %v3877_v22 = vpop.permute.xlu1 %3876 }
 0x70a   : > { %v3898_v63 = vadd.f32 %v3877_v22, %v3850_v11  ;;  %v4154_v8 = vmul.f32 %v4880_v13, %v4153_v54  ;;  %v3899_v44 = vadd.f32 %v3879_v57, %v3851_v45  ;;  %v3616_v22 = vld [vmem:[#allocation2] sm:$0x1] }
 0x70b   : > { %v3624_v57 = vadd.f32 %v3616_v22, %v6216_v24 }
 0x70c   : > { %v3946_v55 = vadd.f32 %v6233_v39, %v3898_v63  ;;  %v6288_v41 = vpop.permute.xlu2 %3710  ;;  %v4155_v60 = vadd.f32 %v4880_v13, %v4154_v8 }
 0x70d   : > { %v3672_v51 = vadd.f32 %v6283_v43, %v3624_v57 }
 0x70e   : > { %v4785_v4 = vmul.f32 -1.442695, %v3946_v55  ;;  %v4159_v36 = vsel %vm4158_vm3, %v4880_v13, %v4155_v60  ;;  %v2180_v60 = vadd.f32 %v6097_v18, %v5995_v42 }
 0x70f   : > { %v4164_v5 = vsel %vm4161_vm5, %v4163_v47, %v4159_v36 }
 0x710   : > { %4881 = vpow2.f32 %v4785_v4  ;;  %v4269_v6 = vperm.slane %v4164_v5, 0  ;;  %v3677_v4 = vadd.f32 %v6271_v15, %v3629_v35  ;;  %v3733_v15 = vld [vmem:[#allocation2 + $0x63] sm:$0x1] }
 0x711   : > { %v6290_v28 = vpop.permute.xlu0 %3708  ;;  %v3707_v2 = vpop.permute.xlu1 %3706 }
 0x712   : > { %4280 = vperm.xlu2 %4842, %v4269_v6   ;;  %4274 = vperm.xlu0 %4841, %v4269_v6   ;;  %v3725_v58 = vadd.f32 %v3707_v2, %v3677_v4 }
 0x714   : > { %v6293_v39 = vpop.permute.xlu2 %3820  ;;  %v3741_v10 = vadd.f32 %v3733_v15, %v3725_v58 }
 0x716   : > { %v4882_v61 = vpop.eup %4881  ;;  %v3789_v12 = vadd.f32 %v6260_v9, %v3741_v10 }
 0x717   : > { %v4130_v14 = vadd.f32 1.0, %v4882_v61 }
 0x719   : > { %4883 = vrcp.f32 %v4130_v14  ;;  %v6295_v17 = vpop.permute.xlu0 %3818  ;;  %v3817_v37 = vpop.permute.xlu1 %3816  ;;  %v4175_v33 = vand.u32 2147483647, %v4130_v14  ;;  %v4177_v63 = vand.u32 2147483648, %v4130_v14  ;;  %vm4171_vm7 = vweird.f32 %v4130_v14 }
 0x71a   : > { %v3836_v52 = vadd.f32 %v3817_v37, %v3788_v46  ;;  %4844 = vset.pattern.permute.xlu0 %v6062_v29  ;;  %v3728_v46 = vld [vmem:[#allocation2 + $0x13] sm:$0x1] }
 0x71b   : > { %v4178_v47 = vor.u32 1.1754944e-38, %v4177_v63  ;;  %vm4176_vm9 = vcmp.eq.f32.partialorder %v4175_v33, 8.507059e+37 }
 0x71c   : > { %v3852_v16 = vadd.f32 %v3844_v0, %v3836_v52  ;;  %v6298_v38 = vpop.permute.xlu2 %3930  ;;  %v4918_v0 = vld [vmem:[%s5502_s21 + $0x10] sm:$0xff] }
 0x71e   : > { %v3900_v13 = vadd.f32 %v6274_v25, %v3852_v16 }
 0x71f   : > { %v4884_v48 = vpop.eup %4883 }
 0x720   : > { %v4167_v49 = vmul.f32 %v4884_v48, %v4130_v14  ;;  %vm4172_vm6 = vweird.f32 %v4884_v48  ;;  %v2228_v14 = vadd.f32 %v6016_v50, %v2180_v60 }
 0x721   : > { %v3929_v26 = vpop.permute.xlu0 %3928  ;;  %v3927_v19 = vpop.permute.xlu1 %3926  ;;  %vm4173_vm8 = vmor %vm4171_vm7, %vm4172_vm6 }
 0x722   : > { %v4168_v54 = vsub.f32 1.0, %v4167_v49  ;;  %v3948_v11 = vadd.f32 %v3929_v26, %v3900_v13  ;;  %v3947_v3 = vadd.f32 %v3927_v19, %v3899_v44  ;;  %v2276_v50 = vadd.f32 %v6012_v59, %v2228_v14  ;;  %v3622_v44 = vld [vmem:[#allocation2 + $0x60] sm:$0x1]  ;;  %v3840_v13 = vld [vmem:[#allocation2 + $0x26] sm:$0x1] }
 0x724   : > { %v4787_v8 = vmul.f32 -1.442695, %v3948_v11  ;;  %v4786_v7 = vmul.f32 -1.442695, %v3947_v3  ;;  %v6301_v32 = vpop.permute.xlu2 %3886  ;;  %v4169_v55 = vmul.f32 %v4884_v48, %v4168_v54  ;;  %v4781_v54 = vmul.f32 -1.442695, %v2276_v50 }
 0x725   : > { %v3630_v11 = vadd.f32 %v3622_v44, %v6216_v24  ;;  %v3837_v3 = vadd.f32 %v6295_v17, %v3789_v12 }
 0x726   : > { %4885 = vpow2.f32 %v4787_v8  ;;  %v4170_v25 = vadd.f32 %v4884_v48, %v4169_v55 }
 0x727   : > { %4887 = vpow2.f32 %v4786_v7  ;;  %v3678_v8 = vadd.f32 %v6250_v21, %v3630_v11  ;;  %v4919_v7 = vld [vmem:[%s5502_s21 + $0x20] sm:$0xff] }
 0x728   : > { %v4174_v36 = vsel %vm4173_vm8, %v4884_v48, %v4170_v25  ;;  %v3623_v48 = vld [vmem:[#allocation2 + $0x70] sm:$0x1] }
 0x729   : > { %v3697_v5 = vpop.permute.xlu0 %3696  ;;  %v3663_v6 = vpop.permute.xlu1 %3662  ;;  %v4179_v34 = vsel %vm4176_vm9, %v4178_v47, %v4174_v36  ;;  %v3631_v59 = vadd.f32 %v3623_v48, %v6216_v24  ;;  %v3726_v24 = vadd.f32 %v6290_v28, %v3678_v8  ;;  %v3734_v28 = vld [vmem:[#allocation2 + $0x73] sm:$0x1] }
 0x72a   : > { %v3720_v61 = vadd.f32 %v3697_v5, %v3672_v51  ;;  %v4282_v30 = vperm.slane %v4179_v34, 0 }
 0x72b   : > { %v3679_v33 = vadd.f32 %v3663_v6, %v3631_v59 }
 0x72c   : > { %v4886_v42 = vpop.eup %4885  ;;  %v3736_v18 = vadd.f32 %v3728_v46, %v3720_v61  ;;  %v4411_v37 = vpop.permute.xlu2 %4410  ;;  %4293 = vperm.xlu2 %4842, %v4282_v30   ;;  %4287 = vperm.xlu1 %4843, %v4282_v30   ;;  %v3735_v61 = vld [vmem:[#allocation2 + $0x83] sm:$0x1]  ;;  %v3742_v30 = vadd.f32 %v3734_v28, %v3726_v24 }
 0x72d   : > { %v4888_v43 = vpop.eup %4887  ;;  %v6310_v52 = vadd.f32 1.0, %v4886_v42  ;;  %v4498_v16 = vmul.f32 %v4918_v0, %v4411_v37  ;;  %v3727_v47 = vadd.f32 %v6288_v41, %v3679_v33 }
 0x72e   : > { %v6313_v45 = vadd.f32 1.0, %v4888_v43  ;;  %v3784_v2 = vadd.f32 %v6205_v40, %v3736_v18 }
 0x72f   : > { %4889 = vrcp.f32 %v6310_v52  ;;  %4514 = vst.msk [vmem:[%s6224_s14 + $0x10] sm:$0xff] %vm2284_vm4, %v4498_v16  ;;  %v4205_v5 = vand.u32 2147483647, %v6310_v52  ;;  %v3743_v46 = vadd.f32 %v3735_v61, %v3727_v47  ;;  %vm4201_vm12 = vweird.f32 %v6310_v52 }
 0x730   : > { %4891 = vrcp.f32 %v6313_v45  ;;  %v3832_v49 = vadd.f32 %v6133_v27, %v3784_v2  ;;  %v4192_v6 = vand.u32 2147483648, %v6313_v45  ;;  %v4190_v41 = vand.u32 2147483647, %v6313_v45 }
 0x731   : > { %v6322_v26 = vpop.permute.xlu0 %3774  ;;  %v3773_v19 = vpop.permute.xlu1 %3772  ;;  %4893 = vpow2.f32 %v4781_v54  ;;  %vm4206_vm14 = vcmp.eq.f32.partialorder %v4205_v5, 8.507059e+37  ;;  %vm4186_vm15 = vweird.f32 %v6313_v45  ;;  %v3847_v54 = vld [vmem:[#allocation2 + $0x96] sm:$0x1] }
 0x732   : > { %v3848_v40 = vadd.f32 %v3840_v13, %v3832_v49  ;;  %v3790_v0 = vadd.f32 %v3773_v19, %v3742_v30  ;;  %v4193_v2 = vor.u32 1.1754944e-38, %v4192_v6  ;;  %vm4191_vm2 = vcmp.eq.f32.partialorder %v4190_v41, 8.507059e+37 }
 0x733   : > { %v3791_v44 = vadd.f32 %v6322_v26, %v3743_v46 }
 0x734   : > { %v3896_v22 = vadd.f32 %v6218_v53, %v3848_v40  ;;  %v4424_v27 = vpop.permute.xlu2 %4423  ;;  %4845 = vset.pattern.permute.xlu2 %v6059_v20  ;;  %v3845_v53 = vld [vmem:[#allocation2 + $0x76] sm:$0x1]  ;;  %v3838_v40 = vadd.f32 %v6293_v39, %v3790_v0 }
 0x735   : > { %v4890_v63 = vpop.eup %4889  ;;  %v4500_v9 = vmul.f32 %v4919_v7, %v4424_v27  ;;  %v3853_v21 = vadd.f32 %v3845_v53, %v3837_v3  ;;  %v3846_v3 = vld [vmem:[#allocation2 + $0x86] sm:$0x1]  ;;  %v4921_v53 = vld [vmem:[%s5502_s21 + $0x8] sm:$0xff] }
 0x736   : > { %v4892_v55 = vpop.eup %4891  ;;  %v4197_v35 = vmul.f32 %v4890_v63, %v6310_v52  ;;  %v3944_v57 = vadd.f32 %v6263_v31, %v3896_v22  ;;  %v4207_v31 = vand.u32 2147483648, %v6310_v52  ;;  %vm4202_vm10 = vweird.f32 %v4890_v63  ;;  %v4920_v22 = vld [vmem:[%s5502_s21 + $0x38] sm:$0xff] }
 0x737   : > { %v4182_v17 = vmul.f32 %v4892_v55, %v6313_v45  ;;  %4516 = vst.msk [vmem:[%s6224_s14 + $0x20] sm:$0xff] %vm2284_vm4, %v4500_v9  ;;  %vm4187_vm11 = vweird.f32 %v4892_v55  ;;  %v4894_v37 = vpop.eup %4893  ;;  %vm4203_vm13 = vmor %vm4201_vm12, %vm4202_vm10  ;;  %v3854_v8 = vadd.f32 %v3846_v3, %v3838_v40 }
 0x738   : > { %v4198_v25 = vsub.f32 1.0, %v4197_v35  ;;  %v4783_v60 = vmul.f32 -1.442695, %v3944_v57  ;;  %v4208_v43 = vor.u32 1.1754944e-38, %v4207_v31  ;;  %vm4188_vm0 = vmor %vm4186_vm15, %vm4187_vm11 }
 0x739   : > { %v4183_v51 = vsub.f32 1.0, %v4182_v17  ;;  %v3885_v4 = vpop.permute.xlu0 %3884  ;;  %v3883_v36 = vpop.permute.xlu1 %3882 }
 0x73a   : > { %4895 = vpow2.f32 %v4783_v60  ;;  %v3901_v34 = vadd.f32 %v3883_v36, %v3853_v21  ;;  %v4199_v58 = vmul.f32 %v4890_v63, %v4198_v25  ;;  %v3902_v9 = vadd.f32 %v3885_v4, %v3854_v8 }
 0x73b   : > { %v4184_v14 = vmul.f32 %v4892_v55, %v4183_v51  ;;  %v4922_v51 = vld [vmem:[%s5502_s21 + $0x48] sm:$0xff] }
 0x73c   : > { %v3949_v42 = vadd.f32 %v6298_v38, %v3901_v34  ;;  %v4200_v18 = vadd.f32 %v4890_v63, %v4199_v58  ;;  %v4923_v58 = vld [vmem:[%s5502_s21 + $0x18] sm:$0xff] }
 0x73d   : > { %v4185_v15 = vadd.f32 %v4892_v55, %v4184_v14 }
 0x73e   : > { %v4788_v16 = vmul.f32 -1.442695, %v3949_v42  ;;  %v4204_v10 = vsel %vm4203_vm13, %v4890_v63, %v4200_v18  ;;  %v6353_v63 = vadd.f32 1.0, %v4894_v37 }
 0x73f   : > { %v4209_v50 = vsel %vm4206_vm14, %v4208_v43, %v4204_v10  ;;  %v4189_v48 = vsel %vm4188_vm0, %v4892_v55, %v4185_v15  ;;  %v2277_v43 = vadd.f32 %v5945_v62, %v5997_v1 }
 0x740   : > { %v4896_v38 = vpop.eup %4895  ;;  %4897 = vpow2.f32 %v4788_v16  ;;  %v4308_v52 = vperm.slane %v4209_v50, 0  ;;  %v4194_v49 = vsel %vm4191_vm2, %v4193_v2, %v4189_v48  ;;  %vm4079_vm13 = vweird.f32 %v6353_v63 }
 0x741   : > { %v6348_v13 = vadd.f32 1.0, %v4896_v38  ;;  %v3935_v12 = vpop.permute.xlu0 %3934  ;;  %v3823_v45 = vpop.permute.xlu1 %3822  ;;  %v4295_v19 = vperm.slane %v4194_v49, 0  ;;  %v4782_v62 = vmul.f32 -1.442695, %v2277_v43  ;;  %v4924_v49 = vld [vmem:[%s5502_s21 + $0x30] sm:$0xff] }
 0x742   : > { %v3839_v59 = vadd.f32 %v3823_v45, %v3791_v44  ;;  %4313 = vperm.xlu2 %4845, %v4308_v52   ;;  %v4925_v45 = vld [vmem:[%s5502_s21 + $0x28] sm:$0xff] }
 0x743   : > { %4899 = vrcp.f32 %v6348_v13  ;;  %4306 = vperm.xlu0 %4844, %v4295_v19   ;;  %4300 = vperm.xlu1 %4843, %v4295_v19   ;;  %vm4141_vm9 = vweird.f32 %v6348_v13 }
 0x744   : > { %v3855_v26 = vadd.f32 %v3847_v54, %v3839_v59  ;;  %v4443_v11 = vpop.permute.xlu2 %4442  ;;  %v4145_v59 = vand.u32 2147483647, %v6348_v13 }
 0x745   : > { %v4503_v33 = vmul.f32 %v4920_v22, %v4443_v11 }
 0x746   : > { %v4898_v27 = vpop.eup %4897  ;;  %v3903_v39 = vadd.f32 %v6301_v32, %v3855_v26  ;;  %vm4146_vm11 = vcmp.eq.f32.partialorder %v4145_v59, 8.507059e+37 }
 0x747   : > { %v4133_v7 = vadd.f32 1.0, %v4898_v27  ;;  %4519 = vst.msk [vmem:[%s6224_s14 + $0x38] sm:$0xff] %vm2284_vm4, %v4503_v33 }
 0x748   : > { %v3951_v55 = vadd.f32 %v3935_v12, %v3903_v39 }
 0x749   : > { %v6358_v35 = vpop.eup %4899  ;;  %4901 = vrcp.f32 %v4133_v7  ;;  %v4404_v57 = vpop.permute.xlu0 %4403  ;;  %v4222_v14 = vand.u32 2147483648, %v4133_v7  ;;  %v4220_v18 = vand.u32 2147483647, %v4133_v7  ;;  %vm4216_vm5 = vweird.f32 %v4133_v7 }
 0x74a   : > { %v3933_v24 = vpop.permute.xlu1 %3932  ;;  %4903 = vrcp.f32 %v6353_v63  ;;  %v4790_v17 = vmul.f32 -1.442695, %v3951_v55  ;;  %v4497_v25 = vmul.f32 %v4921_v53, %v4404_v57  ;;  %v4137_v21 = vmul.f32 %v6358_v35, %v6348_v13 }
 0x74b   : > { %v3950_v60 = vadd.f32 %v3933_v24, %v3902_v9  ;;  %4846 = vset.pattern.permute.xlu1 %v6062_v29  ;;  %4847 = vset.pattern.permute.xlu0 %v6059_v20  ;;  %v4223_v10 = vor.u32 1.1754944e-38, %v4222_v14  ;;  %vm4221_vm7 = vcmp.eq.f32.partialorder %v4220_v18, 8.507059e+37  ;;  %vm4142_vm8 = vweird.f32 %v6358_v35  ;;  %v4936_v24 = vld [vmem:[%s5102_s27] sm:$0xff] }
 0x74c   : > { %4513 = vst.msk [vmem:[%s6224_s14 + $0x8] sm:$0xff] %vm2284_vm4, %v4497_v25  ;;  %v4456_v47 = vpop.permute.xlu2 %4455  ;;  %4905 = vpow2.f32 %v4790_v17  ;;  %v4138_v6 = vsub.f32 1.0, %v4137_v21  ;;  %vm4143_vm10 = vmor %vm4141_vm9, %vm4142_vm8  ;;  %v4085_v9 = vand.u32 2147483648, %v6353_v63 }
 0x74d   : > { %v4789_v32 = vmul.f32 -1.442695, %v3950_v60  ;;  %v4505_v4 = vmul.f32 %v4922_v51, %v4456_v47 }
 0x74e   : > { %v4139_v37 = vmul.f32 %v6358_v35, %v4138_v6 }
 0x74f   : > { %4907 = vpow2.f32 %v4789_v32  ;;  %v4902_v36 = vpop.eup %4901  ;;  %4521 = vst.msk [vmem:[%s6224_s14 + $0x48] sm:$0xff] %vm2284_vm4, %v4505_v4  ;;  %v4086_v32 = vor.u32 1.1754944e-38, %v4085_v9 }
 0x750   : > { %v6371_v5 = vpop.eup %4903  ;;  %v4212_v31 = vmul.f32 %v4902_v36, %v4133_v7  ;;  %vm4217_vm3 = vweird.f32 %v4902_v36  ;;  %v4140_v48 = vadd.f32 %v6358_v35, %v4139_v37  ;;  %v4083_v7 = vand.u32 2147483647, %v6353_v63  ;;  %v4928_v37 = vld [vmem:[%s5502_s21 + $0x50] sm:$0xff] }
 0x751   : > { %v4075_v41 = vmul.f32 %v6371_v5, %v6353_v63  ;;  %vm4218_vm6 = vmor %vm4216_vm5, %vm4217_vm3  ;;  %vm4080_vm12 = vweird.f32 %v6371_v5 }
 0x752   : > { %v4417_v28 = vpop.permute.xlu1 %4416  ;;  %v4213_v34 = vsub.f32 1.0, %v4212_v31  ;;  %v4906_v30 = vpop.eup %4905  ;;  %v4144_v54 = vsel %vm4143_vm10, %v6358_v35, %v4140_v48  ;;  %vm6410_vm15 = vmor %vm4079_vm13, %vm4080_vm12  ;;  %vm4084_vm5 = vcmp.eq.f32.partialorder %v4083_v7, 8.507059e+37 }
 0x753   : > { %v4499_v61 = vmul.f32 %v4923_v58, %v4417_v28  ;;  %4319 = vperm.xlu1 %4846, %v4308_v52   ;;  %v6383_v16 = vadd.f32 1.0, %v4906_v30  ;;  %v4076_v2 = vsub.f32 1.0, %v4075_v41  ;;  %v4147_v52 = vand.u32 2147483648, %v6348_v13  ;;  %v4926_v28 = vld [vmem:[%s5502_s21 + $0x40] sm:$0xff]  ;;  %v4927_v30 = vld [vmem:[%s5102_s27 + $0x18] sm:$0xff] }
 0x754   : > { %v4214_v42 = vmul.f32 %v4902_v36, %v4213_v34 }
 0x755   : > { %v4908_v46 = vpop.eup %4907  ;;  %4515 = vst.msk [vmem:[%s6224_s14 + $0x18] sm:$0xff] %vm2284_vm4, %v4499_v61  ;;  %v4077_v26 = vmul.f32 %v6371_v5, %v4076_v2  ;;  %v4148_v3 = vor.u32 1.1754944e-38, %v4147_v52  ;;  %v4252_v18 = vand.u32 2147483648, %v6383_v16 }
 0x756   : > { %v6381_v15 = vadd.f32 1.0, %v4908_v46  ;;  %v4215_v0 = vadd.f32 %v4902_v36, %v4214_v42 }
 0x757   : > { %v4149_v13 = vsel %vm4146_vm11, %v4148_v3, %v4144_v54  ;;  %v4078_v27 = vadd.f32 %v6371_v5, %v4077_v26  ;;  %v4253_v2 = vor.u32 1.1754944e-38, %v4252_v18  ;;  %v4931_v26 = vld [vmem:[%s5102_s27 + $0x40] sm:$0xff]  ;;  %v4944_v18 = vld [vmem:[%s5502_s21 + $0x68] sm:$0xff] }
 0x758   : > { %4909 = vrcp.f32 %v6381_v15  ;;  %v4219_v50 = vsel %vm4218_vm6, %v4902_v36, %v4215_v0  ;;  %v4237_v39 = vand.u32 2147483648, %v6381_v15  ;;  %v4256_v55 = vperm.slane %v4149_v13, 0 }
 0x759   : > { %v4437_v1 = vpop.permute.xlu0 %4436  ;;  %v4224_v44 = vsel %vm4221_vm7, %v4223_v10, %v4219_v50  ;;  %4911 = vrcp.f32 %v6383_v16  ;;  %v4235_v57 = vand.u32 2147483647, %v6381_v15  ;;  %vm4231_vm0 = vweird.f32 %v6381_v15 }
 0x75a   : > { %v4430_v38 = vpop.permute.xlu1 %4429  ;;  %v4502_v12 = vmul.f32 %v4924_v49, %v4437_v1  ;;  %v4321_v40 = vperm.slane %v4224_v44, 0  ;;  %4913 = vpow2.f32 %v4782_v62  ;;  %v4082_v63 = vsel %vm6410_vm15, %v6371_v5, %v4078_v27 }
 0x75b   : > { %v4501_v19 = vmul.f32 %v4925_v45, %v4430_v38  ;;  %v4238_v60 = vor.u32 1.1754944e-38, %v4237_v39  ;;  %vm4236_vm3 = vcmp.eq.f32.partialorder %v4235_v57, 8.507059e+37  ;;  %v4087_v4 = vsel %vm4084_vm5, %v4086_v32, %v4082_v63  ;;  %v4934_v39 = vld [vmem:[%s5102_s27 + $0x30] sm:$0xff]  ;;  %v4937_v63 = vld [vmem:[%s5102_s27 + $0x48] sm:$0xff]  ;;  %v4938_v32 = vld [vmem:[%s5502_s21 + $0x60] sm:$0xff] }
 0x75c   : > { %4518 = vst.msk [vmem:[%s6224_s14 + $0x30] sm:$0xff] %vm2284_vm4, %v4502_v12  ;;  %4332 = vperm.xlu1 %4846, %v4321_v40   ;;  %4326 = vperm.xlu2 %4845, %v4321_v40   ;;  %v4470_v34 = vperm.slane %v4087_v4, 0  ;;  %vm4246_vm7 = vweird.f32 %v6383_v16 }
 0x75d   : > { %4517 = vst.msk [vmem:[%s6224_s14 + $0x28] sm:$0xff] %vm2284_vm4, %v4501_v19  ;;  %v4930_v19 = vld [vmem:[%s5102_s27 + $0x28] sm:$0xff] }
 0x75e   : > { %v4910_v11 = vpop.eup %4909 }
 0x75f   : > { %v4227_v22 = vmul.f32 %v4910_v11, %v6381_v15  ;;  %v6403_v8 = vpop.eup %4911  ;;  %vm4232_vm14 = vweird.f32 %v4910_v11  ;;  %v4250_v15 = vand.u32 2147483647, %v6383_v16 }
 0x760   : > { %v4914_v17 = vpop.eup %4913  ;;  %v4242_v25 = vmul.f32 %v6403_v8, %v6383_v16  ;;  %vm4233_vm2 = vmor %vm4231_vm0, %vm4232_vm14  ;;  %vm4247_vm6 = vweird.f32 %v6403_v8 }
 0x761   : > { %v4228_v33 = vsub.f32 1.0, %v4227_v22  ;;  %v3983_v21 = vadd.f32 1.0, %v4914_v17  ;;  %vm4248_vm8 = vmor %vm4246_vm7, %vm4247_vm6  ;;  %vm4251_vm9 = vcmp.eq.f32.partialorder %v4250_v15, 8.507059e+37  ;;  %v4932_v22 = vld [vmem:[%s5102_s27 + $0x20] sm:$0xff]  ;;  %v4945_v15 = vld [vmem:[%s5502_s21 + $0x58] sm:$0xff] }
 0x762   : > { %v4243_v31 = vsub.f32 1.0, %v4242_v25 }
 0x763   : > { %v4229_v35 = vmul.f32 %v4910_v11, %v4228_v33  ;;  %4915 = vrcp.f32 %v3983_v21  ;;  %v4100_v38 = vand.u32 2147483648, %v3983_v21  ;;  %vm4094_vm11 = vweird.f32 %v3983_v21 }
 0x764   : > { %4267 = vperm.xlu1 %4846, %v4256_v55   ;;  %4261 = vperm.xlu2 %4845, %v4256_v55   ;;  %v4244_v61 = vmul.f32 %v6403_v8, %v4243_v31  ;;  %v4098_v44 = vand.u32 2147483647, %v3983_v21  ;;  %v4935_v55 = vld [vmem:[%s5102_s27 + $0x50] sm:$0xff] }
 0x765   : > { %v4230_v53 = vadd.f32 %v4910_v11, %v4229_v35  ;;  %v4101_v12 = vor.u32 1.1754944e-38, %v4100_v38  ;;  %v4948_v38 = vld [vmem:[%s5502_s21 + $0x78] sm:$0xff] }
 0x766   : > { %v4245_v41 = vadd.f32 %v6403_v8, %v4244_v61  ;;  %vm4099_vm13 = vcmp.eq.f32.partialorder %v4098_v44, 8.507059e+37  ;;  %v4942_v61 = vld [vmem:[%s5102_s27 + $0x60] sm:$0xff] }
 0x767   : > { %v4234_v47 = vsel %vm4233_vm2, %v4910_v11, %v4230_v53 }
 0x768   : > { %v4239_v51 = vsel %vm4236_vm3, %v4238_v60, %v4234_v47  ;;  %v4249_v0 = vsel %vm4248_vm8, %v6403_v8, %v4245_v41 }
 0x769   : > { %v4334_v36 = vperm.slane %v4239_v51, 0  ;;  %v4450_v6 = vpop.permute.xlu1 %4449  ;;  %v4916_v46 = vpop.eup %4915  ;;  %v4254_v50 = vsel %vm4251_vm9, %v4253_v2, %v4249_v0  ;;  %v4939_v51 = vld [vmem:[%s5102_s27 + $0x58] sm:$0xff] }
 0x76a   : > { %v4504_v5 = vmul.f32 %v4926_v28, %v4450_v6  ;;  %v4090_v10 = vmul.f32 %v4916_v46, %v3983_v21  ;;  %v4347_v62 = vperm.slane %v4254_v50, 0  ;;  %vm4095_vm10 = vweird.f32 %v4916_v46  ;;  %v4940_v6 = vld [vmem:[%s5102_s27 + $0x68] sm:$0xff]  ;;  %v4946_v50 = vld [vmem:[%s5502_s21 + $0x70] sm:$0xff] }
 0x76b   : > { %4339 = vperm.xlu0 %4847, %v4334_v36   ;;  %vm4096_vm12 = vmor %vm4094_vm11, %vm4095_vm10 }
 0x76c   : > { %4520 = vst.msk [vmem:[%s6224_s14 + $0x40] sm:$0xff] %vm2284_vm4, %v4504_v5  ;;  %v4281_v58 = vpop.permute.xlu2 %4280  ;;  %4481 = vperm.xlu1 %4846, %v4470_v34   ;;  %4475 = vperm.xlu2 %4845, %v4470_v34   ;;  %v4091_v48 = vsub.f32 1.0, %v4090_v10  ;;  %v4941_v5 = vld [vmem:[%s5102_s27 + $0x8] sm:$0xff] }
 0x76d   : > { %v4363_v14 = vmul.f32 %v4927_v30, %v4281_v58 }
 0x76e   : > { %v4092_v16 = vmul.f32 %v4916_v46, %v4091_v48 }
 0x76f   : > { %4379 = vst.msk [vmem:[%s6427_s20 + $0x18] sm:$0xff] %vm602_vm1, %v4363_v14 }
 0x770   : > { %v4093_v1 = vadd.f32 %v4916_v46, %v4092_v16 }
 0x771   : > { %v4463_v42 = vpop.permute.xlu1 %4462 }
 0x772   : > { %v4506_v43 = vmul.f32 %v4928_v37, %v4463_v42  ;;  %v4097_v23 = vsel %vm4096_vm12, %v4916_v46, %v4093_v1  ;;  %v4943_v46 = vld [vmem:[%s5102_s27 + $0x78] sm:$0xff] }
 0x773   : > { %4848 = vset.pattern.permute.xlu0 %v6062_v29  ;;  %v4102_v59 = vsel %vm4099_vm13, %v4101_v12, %v4097_v23 }
 0x774   : > { %4522 = vst.msk [vmem:[%s6224_s14 + $0x50] sm:$0xff] %vm2284_vm4, %v4506_v43  ;;  %4850 = vset.pattern.permute.xlu1 %v6059_v20  ;;  %4849 = vset.pattern.permute.xlu2 %v6062_v29 }
 0x77b   : > { %4468 = vperm.xlu0 %4848, %v4457_v56   ;;  %v4929_v56 = vld [vmem:[%s5102_s27 + $0x10] sm:$0xff] }
 0x77c   : > { %4352 = vperm.xlu1 %4850, %v4347_v62   ;;  %4345 = vperm.xlu2 %4849, %v4334_v36  }
 0x784   : > { %v4275_v52 = vpop.permute.xlu0 %4274  ;;  %4852 = vset.pattern.permute.xlu1 %v6062_v29  ;;  %4358 = vperm.xlu2 %4849, %v4347_v62   ;;  %v4483_v29 = vperm.slane %v4102_v59, 0  ;;  %v4947_v62 = vld [vmem:[%s5102_s27 + $0x70] sm:$0xff] }
 0x785   : > { %v4362_v49 = vmul.f32 %v4929_v56, %v4275_v52 }
 0x786   : > { %v4294_v45 = vpop.permute.xlu2 %4293 }
 0x787   : > { %4378 = vst.msk [vmem:[%s6427_s20 + $0x10] sm:$0xff] %vm602_vm1, %v4362_v49  ;;  %v4365_v40 = vmul.f32 %v4930_v19, %v4294_v45 }
 0x789   : > { %4381 = vst.msk [vmem:[%s6427_s20 + $0x28] sm:$0xff] %vm602_vm1, %v4365_v40 }
 0x78c   : > { %4494 = vperm.xlu1 %4852, %v4483_v29   ;;  %4851 = vset.pattern.permute.xlu2 %v6059_v20  ;;  %v4933_v20 = vld [vmem:[%s5102_s27 + $0x38] sm:$0xff] }
 0x794   : > { %4488 = vperm.xlu2 %4851, %v4483_v29  }
 0x79c   : > { %v4314_v54 = vpop.permute.xlu2 %4313 }
 0x79d   : > { %v4368_v11 = vmul.f32 %v4931_v26, %v4314_v54 }
 0x79e   : > { %v4288_v3 = vpop.permute.xlu1 %4287 }
 0x79f   : > { %4384 = vst.msk [vmem:[%s6427_s20 + $0x40] sm:$0xff] %vm602_vm1, %v4368_v11  ;;  %v4364_v13 = vmul.f32 %v4932_v22, %v4288_v3 }
 0x7a1   : > { %4380 = vst.msk [vmem:[%s6427_s20 + $0x20] sm:$0xff] %vm602_vm1, %v4364_v13 }
 0x7b5   : > { %v4307_v33 = vpop.permute.xlu0 %4306  ;;  %v4301_v27 = vpop.permute.xlu1 %4300 }
 0x7b6   : > { %v4367_v8 = vmul.f32 %v4933_v20, %v4307_v33  ;;  %v4366_v7 = vmul.f32 %v4934_v39, %v4301_v27  ;;  %v4327_v9 = vpop.permute.xlu2 %4326 }
 0x7b7   : > { %v4370_v35 = vmul.f32 %v4935_v55, %v4327_v9 }
 0x7b8   : > { %4383 = vst.msk [vmem:[%s6427_s20 + $0x38] sm:$0xff] %vm602_vm1, %v4367_v8 }
 0x7b9   : > { %4382 = vst.msk [vmem:[%s6427_s20 + $0x30] sm:$0xff] %vm602_vm1, %v4366_v7 }
 0x7ba   : > { %4386 = vst.msk [vmem:[%s6427_s20 + $0x50] sm:$0xff] %vm602_vm1, %v4370_v35 }
 0x7be   : > { %v4262_v57 = vpop.permute.xlu2 %4261 }
 0x7bf   : > { %v4360_v17 = vmul.f32 %v4936_v24, %v4262_v57 }
 0x7c1   : > { %4376 = vst.msk [vmem:[%s6427_s20] sm:$0xff] %vm602_vm1, %v4360_v17 }
 0x7c5   : > { %v4320_v53 = vpop.permute.xlu1 %4319 }
 0x7c6   : > { %v4369_v25 = vmul.f32 %v4937_v63, %v4320_v53  ;;  %v4476_v60 = vpop.permute.xlu2 %4475 }
 0x7c7   : > { %v4508_v47 = vmul.f32 %v4938_v32, %v4476_v60 }
 0x7c8   : > { %4385 = vst.msk [vmem:[%s6427_s20 + $0x48] sm:$0xff] %vm602_vm1, %v4369_v25 }
 0x7c9   : > { %4524 = vst.msk [vmem:[%s6224_s14 + $0x60] sm:$0xff] %vm2284_vm4, %v4508_v47 }
 0x7ce   : > { %v4333_v21 = vpop.permute.xlu1 %4332 }
 0x7cf   : > { %v4371_v4 = vmul.f32 %v4939_v51, %v4333_v21 }
 0x7d1   : > { %4387 = vst.msk [vmem:[%s6427_s20 + $0x58] sm:$0xff] %vm602_vm1, %v4371_v4 }
 0x7d6   : > { %v4346_v36 = vpop.permute.xlu2 %4345  ;;  %v4268_v31 = vpop.permute.xlu1 %4267 }
 0x7d7   : > { %v4373_v28 = vmul.f32 %v4940_v6, %v4346_v36  ;;  %v4361_v34 = vmul.f32 %v4941_v5, %v4268_v31 }
 0x7d9   : > { %4389 = vst.msk [vmem:[%s6427_s20 + $0x68] sm:$0xff] %vm602_vm1, %v4373_v28 }
 0x7da   : > { %4377 = vst.msk [vmem:[%s6427_s20 + $0x8] sm:$0xff] %vm602_vm1, %v4361_v34 }
 0x7dd   : > { %v4340_v58 = vpop.permute.xlu0 %4339 }
 0x7de   : > { %v4372_v30 = vmul.f32 %v4942_v61, %v4340_v58  ;;  %v4359_v14 = vpop.permute.xlu2 %4358  ;;  %v4482_v41 = vpop.permute.xlu1 %4481 }
 0x7df   : > { %v4375_v42 = vmul.f32 %v4943_v46, %v4359_v14  ;;  %v4509_v37 = vmul.f32 %v4944_v18, %v4482_v41 }
 0x7e0   : > { %4388 = vst.msk [vmem:[%s6427_s20 + $0x60] sm:$0xff] %vm602_vm1, %v4372_v30 }
 0x7e1   : > { %4391 = vst.msk [vmem:[%s6427_s20 + $0x78] sm:$0xff] %vm602_vm1, %v4375_v42 }
 0x7e2   : > { %4525 = vst.msk [vmem:[%s6224_s14 + $0x68] sm:$0xff] %vm2284_vm4, %v4509_v37 }
 0x7ed   : > { %v4469_v43 = vpop.permute.xlu0 %4468 }
 0x7ee   : > { %v4507_v0 = vmul.f32 %v4945_v15, %v4469_v43  ;;  %v4489_v10 = vpop.permute.xlu2 %4488  ;;  %v4353_v2 = vpop.permute.xlu1 %4352 }
 0x7ef   : > { %v4510_v48 = vmul.f32 %v4946_v50, %v4489_v10  ;;  %v4374_v16 = vmul.f32 %v4947_v62, %v4353_v2 }
 0x7f0   : > { %4523 = vst.msk [vmem:[%s6224_s14 + $0x58] sm:$0xff] %vm2284_vm4, %v4507_v0 }
 0x7f1   : > { %4526 = vst.msk [vmem:[%s6224_s14 + $0x70] sm:$0xff] %vm2284_vm4, %v4510_v48 }
 0x7f2   : > { %4390 = vst.msk [vmem:[%s6427_s20 + $0x70] sm:$0xff] %vm602_vm1, %v4374_v16 }
 0x7fe   : > { %v4495_v1 = vpop.permute.xlu1 %4494 }
 0x7ff   : > { %v4511_v44 = vmul.f32 %v4948_v38, %v4495_v1 }
 0x801   : > { %4527 = vst.msk [vmem:[%s6224_s14 + $0x78] sm:$0xff] %vm2284_vm4, %v4511_v44 }
 0x802 PF: > { %s22_s17 = sadd.s32 1, %s4987_s17   ;;  %s6546_s13 = smov %s4979_s15 }
 0x803   : > { %p19_p8 = scmp.ge.s32.totalorder %s22_s17, 6   ;;  %s6547_s14 = smov %s4983_s16 }
 0x804   : > { %s6548_s15 = smov %s6551_s6  ;;  %s6549_s16 = smov %s6555_s7 }
 0x805   :  { %21 = sbr.rel (!%p19_p8) target bundleno = 4 (0x4), region = 106 }

</bundles_post_ra>
